<compile_context>
chip_gen: v5e
topology: v5e:2x2
jax: 0.10.0
libtpu: 0.0.40
codegen_flags: <defaults>
</compile_context>

<pallas_src>
import functools

import jax
import jax.numpy as jnp
from jax import lax
from jax.experimental import pallas as pl
from jax.experimental.pallas import tpu as pltpu

LANES = 128                      # TPU lane width; channel axes padded to this
_VMEM_LIMIT = 32 * 1024 * 1024   # explicit scoped-VMEM budget (safe on v5e/v6e/v7x)


def _round_up(v, m):
    return ((v + m - 1) // m) * m


# ----------------------- fused BN(affine) + ReLU kernel ---------------------

def _bn_relu_kernel(x_ref, scale_ref, shift_ref, o_ref):
    y = x_ref[...].astype(jnp.float32) * scale_ref[...] + shift_ref[...]
    o_ref[...] = jnp.maximum(y, 0.0).astype(o_ref.dtype)


def bn_relu_pallas(x2d, scale, shift):
    """Row-tiled, lane-dense inference BatchNorm (pre-folded affine) + ReLU."""
    m, cp = x2d.shape
    tm = m
    for cand in (1024, 512, 256, 128, 64, 32, 16, 8):
        if m % cand == 0:
            tm = cand
            break
    return pl.pallas_call(
        _bn_relu_kernel,
        out_shape=jax.ShapeDtypeStruct((m, cp), jnp.bfloat16),
        grid=(m // tm,),
        in_specs=[pl.BlockSpec((tm, cp), lambda i: (i, 0)),
                  pl.BlockSpec((1, cp), lambda i: (0, 0)),
                  pl.BlockSpec((1, cp), lambda i: (0, 0))],
        out_specs=pl.BlockSpec((tm, cp), lambda i: (i, 0)),
        compiler_params=pltpu.CompilerParams(
            dimension_semantics=("parallel",),
            vmem_limit_bytes=_VMEM_LIMIT),
    )(x2d, scale.reshape(1, cp), shift.reshape(1, cp))


# --------------------- tap-accumulating conv (MXU) kernel -------------------

def _make_conv_kernel(taps, m_img, n_inputs, epilogue):
    """Conv = unrolled sum over taps of (m_img, Cp) @ (Cp, tn) MXU matmuls,
    f32 accumulate, with an optional fused epilogue."""

    def kernel(*refs):
        x_refs = refs[:n_inputs]
        w_ref = refs[n_inputs]
        rest = refs[n_inputs + 1:]
        if epilogue == 'bn_relu':
            scale_ref, shift_ref, o_ref = rest
        elif epilogue == 'add':
            res_ref, o_ref = rest
        else:
            (o_ref,) = rest

        acc = jnp.zeros((m_img, o_ref.shape[-1]), jnp.float32)
        for t, (ai, roff) in enumerate(taps):          # statically unrolled
            a = x_refs[ai][0, pl.ds(roff, m_img), :]   # aligned VMEM slice
            acc = acc + jnp.dot(a, w_ref[t],           # bf16 MXU, f32 acc
                                preferred_element_type=jnp.float32)

        if epilogue == 'bn_relu':          # fused BN2(affine) + ReLU
            acc = jnp.maximum(acc * scale_ref[...] + shift_ref[...], 0.0)
        elif epilogue == 'add':            # fused residual add
            acc = acc + res_ref[0].astype(jnp.float32)
        o_ref[0] = acc.astype(o_ref.dtype)

    return kernel


def conv_pallas(x_list, w, taps, m_img, *, epilogue=None, scale=None,
                shift=None, residual=None):
    """x_list: shifted flattened activation views, each (N, rows, Cp) bf16.
    w: (T, Cp, Coutp) bf16.  Output (N, m_img, Coutp) bf16."""
    n_batch, rows, cp = x_list[0].shape
    t_count, _, cout_p = w.shape
    tn = 256 if cout_p % 256 == 0 else 128
    grid = (n_batch, cout_p // tn)

    in_specs = [pl.BlockSpec((1, rows, cp), lambda n, j: (n, 0, 0))
                for _ in x_list]
    in_specs.append(pl.BlockSpec((t_count, cp, tn), lambda n, j: (0, 0, j)))
    args = list(x_list) + [w]

    if epilogue == 'bn_relu':
        in_specs += [pl.BlockSpec((1, tn), lambda n, j: (0, j)),
                     pl.BlockSpec((1, tn), lambda n, j: (0, j))]
        args += [scale.reshape(1, cout_p), shift.reshape(1, cout_p)]
    elif epilogue == 'add':
        in_specs.append(pl.BlockSpec((1, m_img, tn), lambda n, j: (n, 0, j)))
        args.append(residual)

    return pl.pallas_call(
        _make_conv_kernel(taps, m_img, len(x_list), epilogue),
        out_shape=jax.ShapeDtypeStruct((n_batch, m_img, cout_p), jnp.bfloat16),
        grid=grid,
        in_specs=in_specs,
        out_specs=pl.BlockSpec((1, m_img, tn), lambda n, j: (n, 0, j)),
        compiler_params=pltpu.CompilerParams(
            dimension_semantics=("parallel", "parallel"),
            vmem_limit_bytes=_VMEM_LIMIT),
    )(*args)


def conv3x3_operands(x, stride):
    """Build 3*stride shifted flattened views of the zero-padded activation.

    Returns (arrays, taps): arrays[i] has shape (N, rows, Cp); tap t = dy*3+dx
    of the 3x3/stride conv is arrays[ai][:, roff:roff+Ho*Wo, :] @ w[t], with
    (ai, roff) = taps[t].  Row offsets are multiples of Wo (sublane aligned)."""
    n, h, w, cp = x.shape
    s = stride
    ho = (h - 1) // s + 1
    wo = (w - 1) // s + 1
    hneed = ho + 2 // s
    xp = jnp.pad(x, ((0, 0), (1, 1), (1, 1), (0, 0)))
    arrays, index_of = [], {}
    for r in range(s):
        for dx in range(3):
            sl = xp[:, r:r + s * (hneed - 1) + 1:s,
                    dx:dx + s * (wo - 1) + 1:s, :]
            assert sl.shape[1:3] == (hneed, wo), sl.shape
            arrays.append(sl.reshape(n, hneed * wo, cp))
            index_of[(r, dx)] = len(arrays) - 1
    taps = [(index_of[(dy % s, dx)], (dy // s) * wo)
            for dy in range(3) for dx in range(3)]
    return arrays, taps


# -------------------------- BasicBlock / NetworkBlock -----------------------

def basic_block(x, p, stride):
    """WRN BasicBlock, inference mode.  x: (N, H, W, Cp) bf16, channel-padded."""
    n, h, w, cp = x.shape
    cout_p = p['conv1_w'].shape[-1]
    equal = 'shortcut_w' not in p

    # bn1 + relu (standalone so the convs' zero spatial padding is applied to
    # post-activation values, matching pad-after-relu semantics).
    act = bn_relu_pallas(x.reshape(n * h * w, cp),
                         p['bn1_scale'], p['bn1_shift']).reshape(n, h, w, cp)

    ho = (h - 1) // stride + 1
    wo = (w - 1) // stride + 1
    m_img = ho * wo

    # conv1 (3x3, stride) with bn2-affine + ReLU fused into the epilogue.
    ops1, taps1 = conv3x3_operands(act, stride)
    hmid = conv_pallas(ops1, p['conv1_w'], taps1, m_img,
                       epilogue='bn_relu',
                       scale=p['bn2_scale'], shift=p['bn2_shift'])

    # TODO(synk): training-mode dropout (drop_rate > 0) not implemented;
    # inference semantics only (dropout is identity in eval mode).

    if equal:
        residual = x.reshape(n, h * w, cp)        # stride == 1 in this case
    else:
        # Shortcut consumes relu(bn1(x)), exactly like the torch module.
        xs = act[:, ::stride, ::stride, :].reshape(n, m_img, cp)
        residual = conv_pallas([xs], p['shortcut_w'], [(0, 0)], m_img)

    # conv2 (3x3, stride 1) with the residual add fused into the epilogue.
    ops2, taps2 = conv3x3_operands(hmid.reshape(n, ho, wo, cout_p), 1)
    out = conv_pallas(ops2, p['conv2_w'], taps2, m_img,
                      epilogue='add', residual=residual)
    return out.reshape(n, ho, wo, cout_p)


@functools.partial(jax.jit, static_argnames=('stride', 'out_planes'))
def network_block_forward(x_nchw, prepped_params, stride, out_planes):
    """NetworkBlock forward: NCHW f32 in, NCHW f32 out (PyTorch interface)."""
    x = jnp.transpose(x_nchw, (0, 2, 3, 1))                  # NCHW -> NHWC once
    n, h, w, c = x.shape
    cin_p = prepped_params[0]['bn1_scale'].shape[0]
    x = jnp.pad(x, ((0, 0), (0, 0), (0, 0), (0, cin_p - c))).astype(jnp.bfloat16)
    for i, p in enumerate(prepped_params):
        x = basic_block(x, p, stride if i == 0 else 1)
    x = x[..., :out_planes].astype(jnp.float32)
    return jnp.transpose(x, (0, 3, 1, 2))                    # NHWC -> NCHW once


# ---------------------------- parameter handling ----------------------------

def _fold_and_pad_bn(gamma, beta, mean, var, cp, eps=1e-5):
    scale = gamma / jnp.sqrt(var + eps)
    shift = beta - mean * scale
    pad = cp - scale.shape[0]
    return (jnp.pad(scale, (0, pad)).astype(jnp.float32),
            jnp.pad(shift, (0, pad)).astype(jnp.float32))


def _pad_conv3x3(w, cin_p, cout_p):
    ci, co = w.shape[2], w.shape[3]
    wp = jnp.pad(w, ((0, 0), (0, 0), (0, cin_p - ci), (0, cout_p - co)))
    return wp.reshape(9, cin_p, cout_p).astype(jnp.bfloat16)


def _pad_conv1x1(w, cin_p, cout_p):
    ci, co = w.shape
    wp = jnp.pad(w, ((0, cin_p - ci), (0, cout_p - co)))
    return wp.reshape(1, cin_p, cout_p).astype(jnp.bfloat16)


def prepare_network_block_params(raw_params):
    """One-time prep: fold BN to affine, pad channels to 128, cast conv weights
    to bf16, reshape 3x3 weights to (9, Cp, Coutp) tap-major."""
    prepped = []
    for p in raw_params:
        cin, cout = p['conv1_w'].shape[2], p['conv1_w'].shape[3]
        cin_p, cout_p = _round_up(cin, LANES), _round_up(cout, LANES)
        q = {
            'conv1_w': _pad_conv3x3(p['conv1_w'], cin_p, cout_p),
            'conv2_w': _pad_conv3x3(p['conv2_w'], cout_p, cout_p),
        }
        q['bn1_scale'], q['bn1_shift'] = _fold_and_pad_bn(
            p['bn1_gamma'], p['bn1_beta'], p['bn1_mean'], p['bn1_var'], cin_p)
        q['bn2_scale'], q['bn2_shift'] = _fold_and_pad_bn(
            p['bn2_gamma'], p['bn2_beta'], p['bn2_mean'], p['bn2_var'], cout_p)
        if 'shortcut_w' in p:
            q['shortcut_w'] = _pad_conv1x1(p['shortcut_w'], cin_p, cout_p)
        prepped.append(q)
    return prepped


def init_basic_block(key, cin, cout):
    ks = jax.random.split(key, 12)

    def he(kk, shape, fan_in):
        return jax.random.normal(kk, shape, jnp.float32) * jnp.sqrt(2.0 / fan_in)

    p = {
        'bn1_gamma': 1.0 + 0.1 * jax.random.normal(ks[0], (cin,), jnp.float32),
        'bn1_beta': 0.1 * jax.random.normal(ks[1], (cin,), jnp.float32),
        'bn1_mean': 0.1 * jax.random.normal(ks[2], (cin,), jnp.float32),
        'bn1_var': 1.0 + 0.1 * jnp.abs(jax.random.normal(ks[3], (cin,), jnp.float32)),
        'conv1_w': he(ks[4], (3, 3, cin, cout), 9 * cin),
        'bn2_gamma': 1.0 + 0.1 * jax.random.normal(ks[5], (cout,), jnp.float32),
        'bn2_beta': 0.1 * jax.random.normal(ks[6], (cout,), jnp.float32),
        'bn2_mean': 0.1 * jax.random.normal(ks[7], (cout,), jnp.float32),
        'bn2_var': 1.0 + 0.1 * jnp.abs(jax.random.normal(ks[8], (cout,), jnp.float32)),
        'conv2_w': he(ks[9], (3, 3, cout, cout), 9 * cout),
    }
    if cin != cout:
        p['shortcut_w'] = he(ks[10], (cin, cout), cin)
    return p


def init_network_block(key, nb_layers, in_planes, out_planes):
    keys = jax.random.split(key, nb_layers)
    return [init_basic_block(keys[i],
                             in_planes if i == 0 else out_planes, out_planes)
            for i in range(nb_layers)]


# ----------------------------- pure-JAX reference ---------------------------

def reference_forward(x_nchw, raw_params, stride, quantize_bf16):
    """Pure-JAX reference.  With quantize_bf16=True it mirrors the kernel's
    bf16 storage / MXU-operand rounding so the tight comparison isolates the
    structural correctness of the Pallas path; with False it is pure f32."""
    if quantize_bf16:
        q = lambda v: v.astype(jnp.bfloat16).astype(jnp.float32)
    else:
        q = lambda v: v

    def fold(p, pre):
        scale = p[pre + '_gamma'] / jnp.sqrt(p[pre + '_var'] + 1e-5)
        shift = p[pre + '_beta'] - p[pre + '_mean'] * scale
        return scale, shift

    dn = ('NHWC', 'HWIO', 'NHWC')
    x = q(jnp.transpose(x_nchw, (0, 2, 3, 1)))
    for i, p in enumerate(raw_params):
        s = stride if i == 0 else 1
        sc1, sh1 = fold(p, 'bn1')
        act = q(jnp.maximum(x * sc1 + sh1, 0.0))
        if 'shortcut_w' in p:
            residual = q(lax.conv_general_dilated(
                act, q(p['shortcut_w'])[None, None], (s, s), 'VALID',
                dimension_numbers=dn, preferred_element_type=jnp.float32))
        else:
            residual = x
        h = lax.conv_general_dilated(
            act, q(p['conv1_w']), (s, s), [(1, 1), (1, 1)],
            dimension_numbers=dn, preferred_element_type=jnp.float32)
        sc2, sh2 = fold(p, 'bn2')
        h = q(jnp.maximum(h * sc2 + sh2, 0.0))
        h = lax.conv_general_dilated(
            h, q(p['conv2_w']), (1, 1), [(1, 1), (1, 1)],
            dimension_numbers=dn, preferred_element_type=jnp.float32)
        x = q(residual + h)
    return jnp.transpose(x, (0, 3, 1, 2))


# ------------------------------------ main ----------------------------------

if __name__ == "__main__":
    # NetworkBlock(nb_layers=2, in_planes=4, out_planes=8, block=BasicBlock,
    #              stride=2, drop_rate=0.0), inference mode.
    nb_layers, in_planes, out_planes, stride = 2, 4, 8, 2

    key = jax.random.PRNGKey(0)
    kx, kp = jax.random.split(key)
    x = jax.random.normal(kx, (2, in_planes, 16, 16), jnp.float32)   # NCHW
    raw_params = init_network_block(kp, nb_layers, in_planes, out_planes)
    prepped = prepare_network_block_params(raw_params)

    out = network_block_forward(x, prepped, stride=stride, out_planes=out_planes)
    out = jax.block_until_ready(out)
    assert out.shape == (2, out_planes, 8, 8), out.shape

    # Tight check vs. a reference that mirrors the kernel's bf16 rounding.
    ref_q = jax.block_until_ready(reference_forward(x, raw_params, stride, True))
    assert jnp.allclose(out, ref_q, rtol=1e-2, atol=1e-2), \
        float(jnp.max(jnp.abs(out - ref_q)))
    # Loose check vs. the pure-f32 reference (gap == bf16 MXU quantization).
    ref_f = jax.block_until_ready(reference_forward(x, raw_params, stride, False))
    assert jnp.allclose(out, ref_f, rtol=5e-2, atol=5e-2), \
        float(jnp.max(jnp.abs(out - ref_f)))

    print("KERNEL_OK")
</pallas_src>

<mosaic_0001>
module attributes {stable_mosaic.version = 11 : i64} {
  func.func @_bn_relu_kernel(%arg0: i32, %arg1: memref<512x128xbf16, #tpu.memory_space<vmem>>, %arg2: memref<1x128xf32, #tpu.memory_space<vmem>>, %arg3: memref<1x128xf32, #tpu.memory_space<vmem>>, %arg4: memref<512x128xbf16, #tpu.memory_space<vmem>>) attributes {dimension_semantics = [#tpu.dimension_semantics<parallel>], iteration_bounds = array<i64: 1>, scalar_prefetch = 0 : i64, scratch_operands = 0 : i64, tpu.core_type = #tpu.core_type<tc>, window_params = [{transform_indices = @transform_0, window_bounds = array<i64: 512, 128>}, {pipeline_mode = #tpu.pipeline_mode<synchronous>, transform_indices = @transform_1, window_bounds = array<i64: 1, 128>}, {pipeline_mode = #tpu.pipeline_mode<synchronous>, transform_indices = @transform_2, window_bounds = array<i64: 1, 128>}, {transform_indices = @transform_3, window_bounds = array<i64: 512, 128>}]} {
    %c0 = arith.constant 0 : index
    %c0_0 = arith.constant 0 : index
    %0 = vector.load %arg1[%c0, %c0_0] : memref<512x128xbf16, #tpu.memory_space<vmem>>, vector<512x128xbf16>
    %1 = arith.extf %0 : vector<512x128xbf16> to vector<512x128xf32>
    %c0_1 = arith.constant 0 : index
    %c0_2 = arith.constant 0 : index
    %2 = vector.load %arg2[%c0_1, %c0_2] : memref<1x128xf32, #tpu.memory_space<vmem>>, vector<1x128xf32>
    %3 = vector.broadcast %2 : vector<1x128xf32> to vector<512x128xf32>
    %4 = arith.mulf %1, %3 : vector<512x128xf32>
    %c0_3 = arith.constant 0 : index
    %c0_4 = arith.constant 0 : index
    %5 = vector.load %arg3[%c0_3, %c0_4] : memref<1x128xf32, #tpu.memory_space<vmem>>, vector<1x128xf32>
    %6 = vector.broadcast %5 : vector<1x128xf32> to vector<512x128xf32>
    %7 = arith.addf %4, %6 : vector<512x128xf32>
    %cst = arith.constant 0.000000e+00 : f32
    %8 = vector.broadcast %cst : f32 to vector<512x128xf32>
    %9 = arith.maximumf %7, %8 : vector<512x128xf32>
    %10 = arith.truncf %9 : vector<512x128xf32> to vector<512x128xbf16>
    %c0_5 = arith.constant 0 : index
    %c0_6 = arith.constant 0 : index
    %11 = vector.load %arg4[%c0_5, %c0_6] : memref<512x128xbf16, #tpu.memory_space<vmem>>, vector<512x128xbf16>
    tpu.vector_store %arg4[%c0_5, %c0_6], %10 {strides = array<i32>} : memref<512x128xbf16, #tpu.memory_space<vmem>>, vector<512x128xbf16>,
    return
  }
  func.func @transform_0(%arg0: i32) -> (i32, i32) {
    %c0_i32 = arith.constant 0 : i32
    %c0_i32_0 = arith.constant 0 : i32
    return %arg0, %c0_i32 : i32, i32
  }
  func.func @transform_1(%arg0: i32) -> (i32, i32) {
    %c0_i32 = arith.constant 0 : i32
    %c0_i32_0 = arith.constant 0 : i32
    %c0_i32_1 = arith.constant 0 : i32
    return %c0_i32, %c0_i32_0 : i32, i32
  }
  func.func @transform_2(%arg0: i32) -> (i32, i32) {
    %c0_i32 = arith.constant 0 : i32
    %c0_i32_0 = arith.constant 0 : i32
    %c0_i32_1 = arith.constant 0 : i32
    return %c0_i32, %c0_i32_0 : i32, i32
  }
  func.func @transform_3(%arg0: i32) -> (i32, i32) {
    %c0_i32 = arith.constant 0 : i32
    %c0_i32_0 = arith.constant 0 : i32
    return %arg0, %c0_i32 : i32, i32
  }
}

module attributes {stable_mosaic.version = 11 : i64} {
  func.func @kernel(%arg0: i32, %arg1: i32, %arg2: memref<1x64x128xbf16, #tpu.memory_space<vmem>>, %arg3: memref<1x128x128xbf16, #tpu.memory_space<vmem>>, %arg4: memref<1x64x128xbf16, #tpu.memory_space<vmem>>) attributes {dimension_semantics = [#tpu.dimension_semantics<parallel>, #tpu.dimension_semantics<parallel>], iteration_bounds = array<i64: 2, 1>, scalar_prefetch = 0 : i64, scratch_operands = 0 : i64, tpu.core_type = #tpu.core_type<tc>, window_params = [{transform_indices = @transform_0, window_bounds = array<i64: 1, 64, 128>}, {transform_indices = @transform_1, window_bounds = array<i64: 1, 128, 128>}, {transform_indices = @transform_2, window_bounds = array<i64: 1, 64, 128>}]} {
    %cst = arith.constant 0.000000e+00 : f32
    %0 = vector.broadcast %cst : f32 to vector<64x128xf32>
    %c0 = arith.constant 0 : index
    %c0_0 = arith.constant 0 : index
    %c0_1 = arith.constant 0 : index
    %1 = vector.load %arg2[%c0, %c0_0, %c0_1] : memref<1x64x128xbf16, #tpu.memory_space<vmem>>, vector<1x64x128xbf16>
    %2 = vector.shape_cast %1 : vector<1x64x128xbf16> to vector<64x128xbf16>
    %c0_2 = arith.constant 0 : index
    %c0_3 = arith.constant 0 : index
    %c0_4 = arith.constant 0 : index
    %3 = vector.load %arg3[%c0_2, %c0_3, %c0_4] : memref<1x128x128xbf16, #tpu.memory_space<vmem>>, vector<1x128x128xbf16>
    %4 = vector.shape_cast %3 : vector<1x128x128xbf16> to vector<128x128xbf16>
    %cst_5 = arith.constant dense<0.000000e+00> : vector<64x128xf32>
    %5 = tpu.matmul %2, %4, %cst_5 {dimension_numbers = #tpu.dot_dimension_numbers<[1], [0], [0], [1], [0, 0, 1, 1], [], []>} : vector<64x128xbf16>, vector<128x128xbf16>, vector<64x128xf32> -> vector<64x128xf32>
    %6 = arith.addf %0, %5 : vector<64x128xf32>
    %7 = arith.truncf %6 : vector<64x128xf32> to vector<64x128xbf16>
    %c0_6 = arith.constant 0 : index
    %c0_7 = arith.constant 0 : index
    %c0_8 = arith.constant 0 : index
    %8 = vector.load %arg4[%c0_6, %c0_7, %c0_8] : memref<1x64x128xbf16, #tpu.memory_space<vmem>>, vector<1x64x128xbf16>
    %9 = vector.shape_cast %8 : vector<1x64x128xbf16> to vector<64x128xbf16>
    %10 = vector.shape_cast %7 : vector<64x128xbf16> to vector<1x64x128xbf16>
    tpu.vector_store %arg4[%c0_6, %c0_7, %c0_8], %10 {strides = array<i32>} : memref<1x64x128xbf16, #tpu.memory_space<vmem>>, vector<1x64x128xbf16>,
    return
  }
  func.func @transform_0(%arg0: i32, %arg1: i32) -> (i32, i32, i32) {
    %c0_i32 = arith.constant 0 : i32
    %c0_i32_0 = arith.constant 0 : i32
    %c0_i32_1 = arith.constant 0 : i32
    return %arg0, %c0_i32, %c0_i32_0 : i32, i32, i32
  }
  func.func @transform_1(%arg0: i32, %arg1: i32) -> (i32, i32, i32) {
    %c0_i32 = arith.constant 0 : i32
    %c0_i32_0 = arith.constant 0 : i32
    %c0_i32_1 = arith.constant 0 : i32
    return %c0_i32, %c0_i32_0, %arg1 : i32, i32, i32
  }
  func.func @transform_2(%arg0: i32, %arg1: i32) -> (i32, i32, i32) {
    %c0_i32 = arith.constant 0 : i32
    %c0_i32_0 = arith.constant 0 : i32
    return %arg0, %c0_i32, %arg1 : i32, i32, i32
  }
}

module attributes {stable_mosaic.version = 11 : i64} {
  func.func @kernel(%arg0: i32, %arg1: i32, %arg2: memref<1x80x128xbf16, #tpu.memory_space<vmem>>, %arg3: memref<1x80x128xbf16, #tpu.memory_space<vmem>>, %arg4: memref<1x80x128xbf16, #tpu.memory_space<vmem>>, %arg5: memref<9x128x128xbf16, #tpu.memory_space<vmem>>, %arg6: memref<1x64x128xbf16, #tpu.memory_space<vmem>>, %arg7: memref<1x64x128xbf16, #tpu.memory_space<vmem>>) attributes {dimension_semantics = [#tpu.dimension_semantics<parallel>, #tpu.dimension_semantics<parallel>], iteration_bounds = array<i64: 2, 1>, scalar_prefetch = 0 : i64, scratch_operands = 0 : i64, tpu.core_type = #tpu.core_type<tc>, window_params = [{transform_indices = @transform_0, window_bounds = array<i64: 1, 80, 128>}, {transform_indices = @transform_1, window_bounds = array<i64: 1, 80, 128>}, {transform_indices = @transform_2, window_bounds = array<i64: 1, 80, 128>}, {transform_indices = @transform_3, window_bounds = array<i64: 9, 128, 128>}, {transform_indices = @transform_4, window_bounds = array<i64: 1, 64, 128>}, {transform_indices = @transform_5, window_bounds = array<i64: 1, 64, 128>}]} {
    %cst = arith.constant 0.000000e+00 : f32
    %0 = vector.broadcast %cst : f32 to vector<64x128xf32>
    %c0 = arith.constant 0 : index
    %c0_0 = arith.constant 0 : index
    %c0_1 = arith.constant 0 : index
    %1 = vector.load %arg2[%c0, %c0_0, %c0_1] : memref<1x80x128xbf16, #tpu.memory_space<vmem>>, vector<1x64x128xbf16>
    %2 = vector.shape_cast %1 : vector<1x64x128xbf16> to vector<64x128xbf16>
    %c0_2 = arith.constant 0 : index
    %c0_3 = arith.constant 0 : index
    %c0_4 = arith.constant 0 : index
    %3 = vector.load %arg5[%c0_2, %c0_3, %c0_4] : memref<9x128x128xbf16, #tpu.memory_space<vmem>>, vector<1x128x128xbf16>
    %4 = vector.shape_cast %3 : vector<1x128x128xbf16> to vector<128x128xbf16>
    %cst_5 = arith.constant dense<0.000000e+00> : vector<64x128xf32>
    %5 = tpu.matmul %2, %4, %cst_5 {dimension_numbers = #tpu.dot_dimension_numbers<[1], [0], [0], [1], [0, 0, 1, 1], [], []>} : vector<64x128xbf16>, vector<128x128xbf16>, vector<64x128xf32> -> vector<64x128xf32>
    %6 = arith.addf %0, %5 : vector<64x128xf32>
    %c0_6 = arith.constant 0 : index
    %c0_7 = arith.constant 0 : index
    %c0_8 = arith.constant 0 : index
    %7 = vector.load %arg3[%c0_6, %c0_7, %c0_8] : memref<1x80x128xbf16, #tpu.memory_space<vmem>>, vector<1x64x128xbf16>
    %8 = vector.shape_cast %7 : vector<1x64x128xbf16> to vector<64x128xbf16>
    %c1 = arith.constant 1 : index
    %c0_9 = arith.constant 0 : index
    %c0_10 = arith.constant 0 : index
    %9 = vector.load %arg5[%c1, %c0_9, %c0_10] : memref<9x128x128xbf16, #tpu.memory_space<vmem>>, vector<1x128x128xbf16>
    %10 = vector.shape_cast %9 : vector<1x128x128xbf16> to vector<128x128xbf16>
    %cst_11 = arith.constant dense<0.000000e+00> : vector<64x128xf32>
    %11 = tpu.matmul %8, %10, %cst_11 {dimension_numbers = #tpu.dot_dimension_numbers<[1], [0], [0], [1], [0, 0, 1, 1], [], []>} : vector<64x128xbf16>, vector<128x128xbf16>, vector<64x128xf32> -> vector<64x128xf32>
    %12 = arith.addf %6, %11 : vector<64x128xf32>
    %c0_12 = arith.constant 0 : index
    %c0_13 = arith.constant 0 : index
    %c0_14 = arith.constant 0 : index
    %13 = vector.load %arg4[%c0_12, %c0_13, %c0_14] : memref<1x80x128xbf16, #tpu.memory_space<vmem>>, vector<1x64x128xbf16>
    %14 = vector.shape_cast %13 : vector<1x64x128xbf16> to vector<64x128xbf16>
    %c2 = arith.constant 2 : index
    %c0_15 = arith.constant 0 : index
    %c0_16 = arith.constant 0 : index
    %15 = vector.load %arg5[%c2, %c0_15, %c0_16] : memref<9x128x128xbf16, #tpu.memory_space<vmem>>, vector<1x128x128xbf16>
    %16 = vector.shape_cast %15 : vector<1x128x128xbf16> to vector<128x128xbf16>
    %cst_17 = arith.constant dense<0.000000e+00> : vector<64x128xf32>
    %17 = tpu.matmul %14, %16, %cst_17 {dimension_numbers = #tpu.dot_dimension_numbers<[1], [0], [0], [1], [0, 0, 1, 1], [], []>} : vector<64x128xbf16>, vector<128x128xbf16>, vector<64x128xf32> -> vector<64x128xf32>
    %18 = arith.addf %12, %17 : vector<64x128xf32>
    %c0_18 = arith.constant 0 : index
    %c8 = arith.constant 8 : index
    %c0_19 = arith.constant 0 : index
    %19 = vector.load %arg2[%c0_18, %c8, %c0_19] : memref<1x80x128xbf16, #tpu.memory_space<vmem>>, vector<1x64x128xbf16>
    %20 = vector.shape_cast %19 : vector<1x64x128xbf16> to vector<64x128xbf16>
    %c3 = arith.constant 3 : index
    %c0_20 = arith.constant 0 : index
    %c0_21 = arith.constant 0 : index
    %21 = vector.load %arg5[%c3, %c0_20, %c0_21] : memref<9x128x128xbf16, #tpu.memory_space<vmem>>, vector<1x128x128xbf16>
    %22 = vector.shape_cast %21 : vector<1x128x128xbf16> to vector<128x128xbf16>
    %cst_22 = arith.constant dense<0.000000e+00> : vector<64x128xf32>
    %23 = tpu.matmul %20, %22, %cst_22 {dimension_numbers = #tpu.dot_dimension_numbers<[1], [0], [0], [1], [0, 0, 1, 1], [], []>} : vector<64x128xbf16>, vector<128x128xbf16>, vector<64x128xf32> -> vector<64x128xf32>
    %24 = arith.addf %18, %23 : vector<64x128xf32>
    %c0_23 = arith.constant 0 : index
    %c8_24 = arith.constant 8 : index
    %c0_25 = arith.constant 0 : index
    %25 = vector.load %arg3[%c0_23, %c8_24, %c0_25] : memref<1x80x128xbf16, #tpu.memory_space<vmem>>, vector<1x64x128xbf16>
    %26 = vector.shape_cast %25 : vector<1x64x128xbf16> to vector<64x128xbf16>
    %c4 = arith.constant 4 : index
    %c0_26 = arith.constant 0 : index
    %c0_27 = arith.constant 0 : index
    %27 = vector.load %arg5[%c4, %c0_26, %c0_27] : memref<9x128x128xbf16, #tpu.memory_space<vmem>>, vector<1x128x128xbf16>
    %28 = vector.shape_cast %27 : vector<1x128x128xbf16> to vector<128x128xbf16>
    %cst_28 = arith.constant dense<0.000000e+00> : vector<64x128xf32>
    %29 = tpu.matmul %26, %28, %cst_28 {dimension_numbers = #tpu.dot_dimension_numbers<[1], [0], [0], [1], [0, 0, 1, 1], [], []>} : vector<64x128xbf16>, vector<128x128xbf16>, vector<64x128xf32> -> vector<64x128xf32>
    %30 = arith.addf %24, %29 : vector<64x128xf32>
    %c0_29 = arith.constant 0 : index
    %c8_30 = arith.constant 8 : index
    %c0_31 = arith.constant 0 : index
    %31 = vector.load %arg4[%c0_29, %c8_30, %c0_31] : memref<1x80x128xbf16, #tpu.memory_space<vmem>>, vector<1x64x128xbf16>
    %32 = vector.shape_cast %31 : vector<1x64x128xbf16> to vector<64x128xbf16>
    %c5 = arith.constant 5 : index
    %c0_32 = arith.constant 0 : index
    %c0_33 = arith.constant 0 : index
    %33 = vector.load %arg5[%c5, %c0_32, %c0_33] : memref<9x128x128xbf16, #tpu.memory_space<vmem>>, vector<1x128x128xbf16>
    %34 = vector.shape_cast %33 : vector<1x128x128xbf16> to vector<128x128xbf16>
    %cst_34 = arith.constant dense<0.000000e+00> : vector<64x128xf32>
    %35 = tpu.matmul %32, %34, %cst_34 {dimension_numbers = #tpu.dot_dimension_numbers<[1], [0], [0], [1], [0, 0, 1, 1], [], []>} : vector<64x128xbf16>, vector<128x128xbf16>, vector<64x128xf32> -> vector<64x128xf32>
    %36 = arith.addf %30, %35 : vector<64x128xf32>
    %c0_35 = arith.constant 0 : index
    %c16 = arith.constant 16 : index
    %c0_36 = arith.constant 0 : index
    %37 = vector.load %arg2[%c0_35, %c16, %c0_36] : memref<1x80x128xbf16, #tpu.memory_space<vmem>>, vector<1x64x128xbf16>
    %38 = vector.shape_cast %37 : vector<1x64x128xbf16> to vector<64x128xbf16>
    %c6 = arith.constant 6 : index
    %c0_37 = arith.constant 0 : index
    %c0_38 = arith.constant 0 : index
    %39 = vector.load %arg5[%c6, %c0_37, %c0_38] : memref<9x128x128xbf16, #tpu.memory_space<vmem>>, vector<1x128x128xbf16>
    %40 = vector.shape_cast %39 : vector<1x128x128xbf16> to vector<128x128xbf16>
    %cst_39 = arith.constant dense<0.000000e+00> : vector<64x128xf32>
    %41 = tpu.matmul %38, %40, %cst_39 {dimension_numbers = #tpu.dot_dimension_numbers<[1], [0], [0], [1], [0, 0, 1, 1], [], []>} : vector<64x128xbf16>, vector<128x128xbf16>, vector<64x128xf32> -> vector<64x128xf32>
    %42 = arith.addf %36, %41 : vector<64x128xf32>
    %c0_40 = arith.constant 0 : index
    %c16_41 = arith.constant 16 : index
    %c0_42 = arith.constant 0 : index
    %43 = vector.load %arg3[%c0_40, %c16_41, %c0_42] : memref<1x80x128xbf16, #tpu.memory_space<vmem>>, vector<1x64x128xbf16>
    %44 = vector.shape_cast %43 : vector<1x64x128xbf16> to vector<64x128xbf16>
    %c7 = arith.constant 7 : index
    %c0_43 = arith.constant 0 : index
    %c0_44 = arith.constant 0 : index
    %45 = vector.load %arg5[%c7, %c0_43, %c0_44] : memref<9x128x128xbf16, #tpu.memory_space<vmem>>, vector<1x128x128xbf16>
    %46 = vector.shape_cast %45 : vector<1x128x128xbf16> to vector<128x128xbf16>
    %cst_45 = arith.constant dense<0.000000e+00> : vector<64x128xf32>
    %47 = tpu.matmul %44, %46, %cst_45 {dimension_numbers = #tpu.dot_dimension_numbers<[1], [0], [0], [1], [0, 0, 1, 1], [], []>} : vector<64x128xbf16>, vector<128x128xbf16>, vector<64x128xf32> -> vector<64x128xf32>
    %48 = arith.addf %42, %47 : vector<64x128xf32>
    %c0_46 = arith.constant 0 : index
    %c16_47 = arith.constant 16 : index
    %c0_48 = arith.constant 0 : index
    %49 = vector.load %arg4[%c0_46, %c16_47, %c0_48] : memref<1x80x128xbf16, #tpu.memory_space<vmem>>, vector<1x64x128xbf16>
    %50 = vector.shape_cast %49 : vector<1x64x128xbf16> to vector<64x128xbf16>
    %c8_49 = arith.constant 8 : index
    %c0_50 = arith.constant 0 : index
    %c0_51 = arith.constant 0 : index
    %51 = vector.load %arg5[%c8_49, %c0_50, %c0_51] : memref<9x128x128xbf16, #tpu.memory_space<vmem>>, vector<1x128x128xbf16>
    %52 = vector.shape_cast %51 : vector<1x128x128xbf16> to vector<128x128xbf16>
    %cst_52 = arith.constant dense<0.000000e+00> : vector<64x128xf32>
    %53 = tpu.matmul %50, %52, %cst_52 {dimension_numbers = #tpu.dot_dimension_numbers<[1], [0], [0], [1], [0, 0, 1, 1], [], []>} : vector<64x128xbf16>, vector<128x128xbf16>, vector<64x128xf32> -> vector<64x128xf32>
    %54 = arith.addf %48, %53 : vector<64x128xf32>
    %c0_53 = arith.constant 0 : index
    %c0_54 = arith.constant 0 : index
    %c0_55 = arith.constant 0 : index
    %55 = vector.load %arg6[%c0_53, %c0_54, %c0_55] : memref<1x64x128xbf16, #tpu.memory_space<vmem>>, vector<1x64x128xbf16>
    %56 = vector.shape_cast %55 : vector<1x64x128xbf16> to vector<64x128xbf16>
    %57 = arith.extf %56 : vector<64x128xbf16> to vector<64x128xf32>
    %58 = arith.addf %54, %57 : vector<64x128xf32>
    %59 = arith.truncf %58 : vector<64x128xf32> to vector<64x128xbf16>
    %c0_56 = arith.constant 0 : index
    %c0_57 = arith.constant 0 : index
    %c0_58 = arith.constant 0 : index
    %60 = vector.load %arg7[%c0_56, %c0_57, %c0_58] : memref<1x64x128xbf16, #tpu.memory_space<vmem>>, vector<1x64x128xbf16>
    %61 = vector.shape_cast %60 : vector<1x64x128xbf16> to vector<64x128xbf16>
    %62 = vector.shape_cast %59 : vector<64x128xbf16> to vector<1x64x128xbf16>
    tpu.vector_store %arg7[%c0_56, %c0_57, %c0_58], %62 {strides = array<i32>} : memref<1x64x128xbf16, #tpu.memory_space<vmem>>, vector<1x64x128xbf16>,
    return
  }
  func.func @transform_0(%arg0: i32, %arg1: i32) -> (i32, i32, i32) {
    %c0_i32 = arith.constant 0 : i32
    %c0_i32_0 = arith.constant 0 : i32
    %c0_i32_1 = arith.constant 0 : i32
    return %arg0, %c0_i32, %c0_i32_0 : i32, i32, i32
  }
  func.func @transform_1(%arg0: i32, %arg1: i32) -> (i32, i32, i32) {
    %c0_i32 = arith.constant 0 : i32
    %c0_i32_0 = arith.constant 0 : i32
    %c0_i32_1 = arith.constant 0 : i32
    return %arg0, %c0_i32, %c0_i32_0 : i32, i32, i32
  }
  func.func @transform_2(%arg0: i32, %arg1: i32) -> (i32, i32, i32) {
    %c0_i32 = arith.constant 0 : i32
    %c0_i32_0 = arith.constant 0 : i32
    %c0_i32_1 = arith.constant 0 : i32
    return %arg0, %c0_i32, %c0_i32_0 : i32, i32, i32
  }
  func.func @transform_3(%arg0: i32, %arg1: i32) -> (i32, i32, i32) {
    %c0_i32 = arith.constant 0 : i32
    %c0_i32_0 = arith.constant 0 : i32
    %c0_i32_1 = arith.constant 0 : i32
    return %c0_i32, %c0_i32_0, %arg1 : i32, i32, i32
  }
  func.func @transform_4(%arg0: i32, %arg1: i32) -> (i32, i32, i32) {
    %c0_i32 = arith.constant 0 : i32
    %c0_i32_0 = arith.constant 0 : i32
    return %arg0, %c0_i32, %arg1 : i32, i32, i32
  }
  func.func @transform_5(%arg0: i32, %arg1: i32) -> (i32, i32, i32) {
    %c0_i32 = arith.constant 0 : i32
    %c0_i32_0 = arith.constant 0 : i32
    return %arg0, %c0_i32, %arg1 : i32, i32, i32
  }
}

module attributes {stable_mosaic.version = 11 : i64} {
  func.func @kernel(%arg0: i32, %arg1: i32, %arg2: memref<1x72x128xbf16, #tpu.memory_space<vmem>>, %arg3: memref<1x72x128xbf16, #tpu.memory_space<vmem>>, %arg4: memref<1x72x128xbf16, #tpu.memory_space<vmem>>, %arg5: memref<1x72x128xbf16, #tpu.memory_space<vmem>>, %arg6: memref<1x72x128xbf16, #tpu.memory_space<vmem>>, %arg7: memref<1x72x128xbf16, #tpu.memory_space<vmem>>, %arg8: memref<9x128x128xbf16, #tpu.memory_space<vmem>>, %arg9: memref<1x128xf32, #tpu.memory_space<vmem>>, %arg10: memref<1x128xf32, #tpu.memory_space<vmem>>, %arg11: memref<1x64x128xbf16, #tpu.memory_space<vmem>>) attributes {dimension_semantics = [#tpu.dimension_semantics<parallel>, #tpu.dimension_semantics<parallel>], iteration_bounds = array<i64: 2, 1>, scalar_prefetch = 0 : i64, scratch_operands = 0 : i64, tpu.core_type = #tpu.core_type<tc>, window_params = [{transform_indices = @transform_0, window_bounds = array<i64: 1, 72, 128>}, {transform_indices = @transform_1, window_bounds = array<i64: 1, 72, 128>}, {transform_indices = @transform_2, window_bounds = array<i64: 1, 72, 128>}, {transform_indices = @transform_3, window_bounds = array<i64: 1, 72, 128>}, {transform_indices = @transform_4, window_bounds = array<i64: 1, 72, 128>}, {transform_indices = @transform_5, window_bounds = array<i64: 1, 72, 128>}, {transform_indices = @transform_6, window_bounds = array<i64: 9, 128, 128>}, {transform_indices = @transform_7, window_bounds = array<i64: 1, 128>}, {transform_indices = @transform_8, window_bounds = array<i64: 1, 128>}, {transform_indices = @transform_9, window_bounds = array<i64: 1, 64, 128>}]} {
    %cst = arith.constant 0.000000e+00 : f32
    %0 = vector.broadcast %cst : f32 to vector<64x128xf32>
    %c0 = arith.constant 0 : index
    %c0_0 = arith.constant 0 : index
    %c0_1 = arith.constant 0 : index
    %1 = vector.load %arg2[%c0, %c0_0, %c0_1] : memref<1x72x128xbf16, #tpu.memory_space<vmem>>, vector<1x64x128xbf16>
    %2 = vector.shape_cast %1 : vector<1x64x128xbf16> to vector<64x128xbf16>
    %c0_2 = arith.constant 0 : index
    %c0_3 = arith.constant 0 : index
    %c0_4 = arith.constant 0 : index
    %3 = vector.load %arg8[%c0_2, %c0_3, %c0_4] : memref<9x128x128xbf16, #tpu.memory_space<vmem>>, vector<1x128x128xbf16>
    %4 = vector.shape_cast %3 : vector<1x128x128xbf16> to vector<128x128xbf16>
    %cst_5 = arith.constant dense<0.000000e+00> : vector<64x128xf32>
    %5 = tpu.matmul %2, %4, %cst_5 {dimension_numbers = #tpu.dot_dimension_numbers<[1], [0], [0], [1], [0, 0, 1, 1], [], []>} : vector<64x128xbf16>, vector<128x128xbf16>, vector<64x128xf32> -> vector<64x128xf32>
    %6 = arith.addf %0, %5 : vector<64x128xf32>
    %c0_6 = arith.constant 0 : index
    %c0_7 = arith.constant 0 : index
    %c0_8 = arith.constant 0 : index
    %7 = vector.load %arg3[%c0_6, %c0_7, %c0_8] : memref<1x72x128xbf16, #tpu.memory_space<vmem>>, vector<1x64x128xbf16>
    %8 = vector.shape_cast %7 : vector<1x64x128xbf16> to vector<64x128xbf16>
    %c1 = arith.constant 1 : index
    %c0_9 = arith.constant 0 : index
    %c0_10 = arith.constant 0 : index
    %9 = vector.load %arg8[%c1, %c0_9, %c0_10] : memref<9x128x128xbf16, #tpu.memory_space<vmem>>, vector<1x128x128xbf16>
    %10 = vector.shape_cast %9 : vector<1x128x128xbf16> to vector<128x128xbf16>
    %cst_11 = arith.constant dense<0.000000e+00> : vector<64x128xf32>
    %11 = tpu.matmul %8, %10, %cst_11 {dimension_numbers = #tpu.dot_dimension_numbers<[1], [0], [0], [1], [0, 0, 1, 1], [], []>} : vector<64x128xbf16>, vector<128x128xbf16>, vector<64x128xf32> -> vector<64x128xf32>
    %12 = arith.addf %6, %11 : vector<64x128xf32>
    %c0_12 = arith.constant 0 : index
    %c0_13 = arith.constant 0 : index
    %c0_14 = arith.constant 0 : index
    %13 = vector.load %arg4[%c0_12, %c0_13, %c0_14] : memref<1x72x128xbf16, #tpu.memory_space<vmem>>, vector<1x64x128xbf16>
    %14 = vector.shape_cast %13 : vector<1x64x128xbf16> to vector<64x128xbf16>
    %c2 = arith.constant 2 : index
    %c0_15 = arith.constant 0 : index
    %c0_16 = arith.constant 0 : index
    %15 = vector.load %arg8[%c2, %c0_15, %c0_16] : memref<9x128x128xbf16, #tpu.memory_space<vmem>>, vector<1x128x128xbf16>
    %16 = vector.shape_cast %15 : vector<1x128x128xbf16> to vector<128x128xbf16>
    %cst_17 = arith.constant dense<0.000000e+00> : vector<64x128xf32>
    %17 = tpu.matmul %14, %16, %cst_17 {dimension_numbers = #tpu.dot_dimension_numbers<[1], [0], [0], [1], [0, 0, 1, 1], [], []>} : vector<64x128xbf16>, vector<128x128xbf16>, vector<64x128xf32> -> vector<64x128xf32>
    %18 = arith.addf %12, %17 : vector<64x128xf32>
    %c0_18 = arith.constant 0 : index
    %c0_19 = arith.constant 0 : index
    %c0_20 = arith.constant 0 : index
    %19 = vector.load %arg5[%c0_18, %c0_19, %c0_20] : memref<1x72x128xbf16, #tpu.memory_space<vmem>>, vector<1x64x128xbf16>
    %20 = vector.shape_cast %19 : vector<1x64x128xbf16> to vector<64x128xbf16>
    %c3 = arith.constant 3 : index
    %c0_21 = arith.constant 0 : index
    %c0_22 = arith.constant 0 : index
    %21 = vector.load %arg8[%c3, %c0_21, %c0_22] : memref<9x128x128xbf16, #tpu.memory_space<vmem>>, vector<1x128x128xbf16>
    %22 = vector.shape_cast %21 : vector<1x128x128xbf16> to vector<128x128xbf16>
    %cst_23 = arith.constant dense<0.000000e+00> : vector<64x128xf32>
    %23 = tpu.matmul %20, %22, %cst_23 {dimension_numbers = #tpu.dot_dimension_numbers<[1], [0], [0], [1], [0, 0, 1, 1], [], []>} : vector<64x128xbf16>, vector<128x128xbf16>, vector<64x128xf32> -> vector<64x128xf32>
    %24 = arith.addf %18, %23 : vector<64x128xf32>
    %c0_24 = arith.constant 0 : index
    %c0_25 = arith.constant 0 : index
    %c0_26 = arith.constant 0 : index
    %25 = vector.load %arg6[%c0_24, %c0_25, %c0_26] : memref<1x72x128xbf16, #tpu.memory_space<vmem>>, vector<1x64x128xbf16>
    %26 = vector.shape_cast %25 : vector<1x64x128xbf16> to vector<64x128xbf16>
    %c4 = arith.constant 4 : index
    %c0_27 = arith.constant 0 : index
    %c0_28 = arith.constant 0 : index
    %27 = vector.load %arg8[%c4, %c0_27, %c0_28] : memref<9x128x128xbf16, #tpu.memory_space<vmem>>, vector<1x128x128xbf16>
    %28 = vector.shape_cast %27 : vector<1x128x128xbf16> to vector<128x128xbf16>
    %cst_29 = arith.constant dense<0.000000e+00> : vector<64x128xf32>
    %29 = tpu.matmul %26, %28, %cst_29 {dimension_numbers = #tpu.dot_dimension_numbers<[1], [0], [0], [1], [0, 0, 1, 1], [], []>} : vector<64x128xbf16>, vector<128x128xbf16>, vector<64x128xf32> -> vector<64x128xf32>
    %30 = arith.addf %24, %29 : vector<64x128xf32>
    %c0_30 = arith.constant 0 : index
    %c0_31 = arith.constant 0 : index
    %c0_32 = arith.constant 0 : index
    %31 = vector.load %arg7[%c0_30, %c0_31, %c0_32] : memref<1x72x128xbf16, #tpu.memory_space<vmem>>, vector<1x64x128xbf16>
    %32 = vector.shape_cast %31 : vector<1x64x128xbf16> to vector<64x128xbf16>
    %c5 = arith.constant 5 : index
    %c0_33 = arith.constant 0 : index
    %c0_34 = arith.constant 0 : index
    %33 = vector.load %arg8[%c5, %c0_33, %c0_34] : memref<9x128x128xbf16, #tpu.memory_space<vmem>>, vector<1x128x128xbf16>
    %34 = vector.shape_cast %33 : vector<1x128x128xbf16> to vector<128x128xbf16>
    %cst_35 = arith.constant dense<0.000000e+00> : vector<64x128xf32>
    %35 = tpu.matmul %32, %34, %cst_35 {dimension_numbers = #tpu.dot_dimension_numbers<[1], [0], [0], [1], [0, 0, 1, 1], [], []>} : vector<64x128xbf16>, vector<128x128xbf16>, vector<64x128xf32> -> vector<64x128xf32>
    %36 = arith.addf %30, %35 : vector<64x128xf32>
    %c0_36 = arith.constant 0 : index
    %c8 = arith.constant 8 : index
    %c0_37 = arith.constant 0 : index
    %37 = vector.load %arg2[%c0_36, %c8, %c0_37] : memref<1x72x128xbf16, #tpu.memory_space<vmem>>, vector<1x64x128xbf16>
    %38 = vector.shape_cast %37 : vector<1x64x128xbf16> to vector<64x128xbf16>
    %c6 = arith.constant 6 : index
    %c0_38 = arith.constant 0 : index
    %c0_39 = arith.constant 0 : index
    %39 = vector.load %arg8[%c6, %c0_38, %c0_39] : memref<9x128x128xbf16, #tpu.memory_space<vmem>>, vector<1x128x128xbf16>
    %40 = vector.shape_cast %39 : vector<1x128x128xbf16> to vector<128x128xbf16>
    %cst_40 = arith.constant dense<0.000000e+00> : vector<64x128xf32>
    %41 = tpu.matmul %38, %40, %cst_40 {dimension_numbers = #tpu.dot_dimension_numbers<[1], [0], [0], [1], [0, 0, 1, 1], [], []>} : vector<64x128xbf16>, vector<128x128xbf16>, vector<64x128xf32> -> vector<64x128xf32>
    %42 = arith.addf %36, %41 : vector<64x128xf32>
    %c0_41 = arith.constant 0 : index
    %c8_42 = arith.constant 8 : index
    %c0_43 = arith.constant 0 : index
    %43 = vector.load %arg3[%c0_41, %c8_42, %c0_43] : memref<1x72x128xbf16, #tpu.memory_space<vmem>>, vector<1x64x128xbf16>
    %44 = vector.shape_cast %43 : vector<1x64x128xbf16> to vector<64x128xbf16>
    %c7 = arith.constant 7 : index
    %c0_44 = arith.constant 0 : index
    %c0_45 = arith.constant 0 : index
    %45 = vector.load %arg8[%c7, %c0_44, %c0_45] : memref<9x128x128xbf16, #tpu.memory_space<vmem>>, vector<1x128x128xbf16>
    %46 = vector.shape_cast %45 : vector<1x128x128xbf16> to vector<128x128xbf16>
    %cst_46 = arith.constant dense<0.000000e+00> : vector<64x128xf32>
    %47 = tpu.matmul %44, %46, %cst_46 {dimension_numbers = #tpu.dot_dimension_numbers<[1], [0], [0], [1], [0, 0, 1, 1], [], []>} : vector<64x128xbf16>, vector<128x128xbf16>, vector<64x128xf32> -> vector<64x128xf32>
    %48 = arith.addf %42, %47 : vector<64x128xf32>
    %c0_47 = arith.constant 0 : index
    %c8_48 = arith.constant 8 : index
    %c0_49 = arith.constant 0 : index
    %49 = vector.load %arg4[%c0_47, %c8_48, %c0_49] : memref<1x72x128xbf16, #tpu.memory_space<vmem>>, vector<1x64x128xbf16>
    %50 = vector.shape_cast %49 : vector<1x64x128xbf16> to vector<64x128xbf16>
    %c8_50 = arith.constant 8 : index
    %c0_51 = arith.constant 0 : index
    %c0_52 = arith.constant 0 : index
    %51 = vector.load %arg8[%c8_50, %c0_51, %c0_52] : memref<9x128x128xbf16, #tpu.memory_space<vmem>>, vector<1x128x128xbf16>
    %52 = vector.shape_cast %51 : vector<1x128x128xbf16> to vector<128x128xbf16>
    %cst_53 = arith.constant dense<0.000000e+00> : vector<64x128xf32>
    %53 = tpu.matmul %50, %52, %cst_53 {dimension_numbers = #tpu.dot_dimension_numbers<[1], [0], [0], [1], [0, 0, 1, 1], [], []>} : vector<64x128xbf16>, vector<128x128xbf16>, vector<64x128xf32> -> vector<64x128xf32>
    %54 = arith.addf %48, %53 : vector<64x128xf32>
    %c0_54 = arith.constant 0 : index
    %c0_55 = arith.constant 0 : index
    %55 = vector.load %arg9[%c0_54, %c0_55] : memref<1x128xf32, #tpu.memory_space<vmem>>, vector<1x128xf32>
    %56 = vector.broadcast %55 : vector<1x128xf32> to vector<64x128xf32>
    %57 = arith.mulf %54, %56 : vector<64x128xf32>
    %c0_56 = arith.constant 0 : index
    %c0_57 = arith.constant 0 : index
    %58 = vector.load %arg10[%c0_56, %c0_57] : memref<1x128xf32, #tpu.memory_space<vmem>>, vector<1x128xf32>
    %59 = vector.broadcast %58 : vector<1x128xf32> to vector<64x128xf32>
    %60 = arith.addf %57, %59 : vector<64x128xf32>
    %cst_58 = arith.constant 0.000000e+00 : f32
    %61 = vector.broadcast %cst_58 : f32 to vector<64x128xf32>
    %62 = arith.maximumf %60, %61 : vector<64x128xf32>
    %63 = arith.truncf %62 : vector<64x128xf32> to vector<64x128xbf16>
    %c0_59 = arith.constant 0 : index
    %c0_60 = arith.constant 0 : index
    %c0_61 = arith.constant 0 : index
    %64 = vector.load %arg11[%c0_59, %c0_60, %c0_61] : memref<1x64x128xbf16, #tpu.memory_space<vmem>>, vector<1x64x128xbf16>
    %65 = vector.shape_cast %64 : vector<1x64x128xbf16> to vector<64x128xbf16>
    %66 = vector.shape_cast %63 : vector<64x128xbf16> to vector<1x64x128xbf16>
    tpu.vector_store %arg11[%c0_59, %c0_60, %c0_61], %66 {strides = array<i32>} : memref<1x64x128xbf16, #tpu.memory_space<vmem>>, vector<1x64x128xbf16>,
    return
  }
  func.func @transform_0(%arg0: i32, %arg1: i32) -> (i32, i32, i32) {
    %c0_i32 = arith.constant 0 : i32
    %c0_i32_0 = arith.constant 0 : i32
    %c0_i32_1 = arith.constant 0 : i32
    return %arg0, %c0_i32, %c0_i32_0 : i32, i32, i32
  }
  func.func @transform_1(%arg0: i32, %arg1: i32) -> (i32, i32, i32) {
    %c0_i32 = arith.constant 0 : i32
    %c0_i32_0 = arith.constant 0 : i32
    %c0_i32_1 = arith.constant 0 : i32
    return %arg0, %c0_i32, %c0_i32_0 : i32, i32, i32
  }
  func.func @transform_2(%arg0: i32, %arg1: i32) -> (i32, i32, i32) {
    %c0_i32 = arith.constant 0 : i32
    %c0_i32_0 = arith.constant 0 : i32
    %c0_i32_1 = arith.constant 0 : i32
    return %arg0, %c0_i32, %c0_i32_0 : i32, i32, i32
  }
  func.func @transform_3(%arg0: i32, %arg1: i32) -> (i32, i32, i32) {
    %c0_i32 = arith.constant 0 : i32
    %c0_i32_0 = arith.constant 0 : i32
    %c0_i32_1 = arith.constant 0 : i32
    return %arg0, %c0_i32, %c0_i32_0 : i32, i32, i32
  }
  func.func @transform_4(%arg0: i32, %arg1: i32) -> (i32, i32, i32) {
    %c0_i32 = arith.constant 0 : i32
    %c0_i32_0 = arith.constant 0 : i32
    %c0_i32_1 = arith.constant 0 : i32
    return %arg0, %c0_i32, %c0_i32_0 : i32, i32, i32
  }
  func.func @transform_5(%arg0: i32, %arg1: i32) -> (i32, i32, i32) {
    %c0_i32 = arith.constant 0 : i32
    %c0_i32_0 = arith.constant 0 : i32
    %c0_i32_1 = arith.constant 0 : i32
    return %arg0, %c0_i32, %c0_i32_0 : i32, i32, i32
  }
  func.func @transform_6(%arg0: i32, %arg1: i32) -> (i32, i32, i32) {
    %c0_i32 = arith.constant 0 : i32
    %c0_i32_0 = arith.constant 0 : i32
    %c0_i32_1 = arith.constant 0 : i32
    return %c0_i32, %c0_i32_0, %arg1 : i32, i32, i32
  }
  func.func @transform_7(%arg0: i32, %arg1: i32) -> (i32, i32) {
    %c0_i32 = arith.constant 0 : i32
    %c0_i32_0 = arith.constant 0 : i32
    return %c0_i32, %arg1 : i32, i32
  }
  func.func @transform_8(%arg0: i32, %arg1: i32) -> (i32, i32) {
    %c0_i32 = arith.constant 0 : i32
    %c0_i32_0 = arith.constant 0 : i32
    return %c0_i32, %arg1 : i32, i32
  }
  func.func @transform_9(%arg0: i32, %arg1: i32) -> (i32, i32, i32) {
    %c0_i32 = arith.constant 0 : i32
    %c0_i32_0 = arith.constant 0 : i32
    return %arg0, %c0_i32, %arg1 : i32, i32, i32
  }
}

module attributes {stable_mosaic.version = 11 : i64} {
  func.func @kernel(%arg0: i32, %arg1: i32, %arg2: memref<1x80x128xbf16, #tpu.memory_space<vmem>>, %arg3: memref<1x80x128xbf16, #tpu.memory_space<vmem>>, %arg4: memref<1x80x128xbf16, #tpu.memory_space<vmem>>, %arg5: memref<9x128x128xbf16, #tpu.memory_space<vmem>>, %arg6: memref<1x128xf32, #tpu.memory_space<vmem>>, %arg7: memref<1x128xf32, #tpu.memory_space<vmem>>, %arg8: memref<1x64x128xbf16, #tpu.memory_space<vmem>>) attributes {dimension_semantics = [#tpu.dimension_semantics<parallel>, #tpu.dimension_semantics<parallel>], iteration_bounds = array<i64: 2, 1>, scalar_prefetch = 0 : i64, scratch_operands = 0 : i64, tpu.core_type = #tpu.core_type<tc>, window_params = [{transform_indices = @transform_0, window_bounds = array<i64: 1, 80, 128>}, {transform_indices = @transform_1, window_bounds = array<i64: 1, 80, 128>}, {transform_indices = @transform_2, window_bounds = array<i64: 1, 80, 128>}, {transform_indices = @transform_3, window_bounds = array<i64: 9, 128, 128>}, {transform_indices = @transform_4, window_bounds = array<i64: 1, 128>}, {transform_indices = @transform_5, window_bounds = array<i64: 1, 128>}, {transform_indices = @transform_6, window_bounds = array<i64: 1, 64, 128>}]} {
    %cst = arith.constant 0.000000e+00 : f32
    %0 = vector.broadcast %cst : f32 to vector<64x128xf32>
    %c0 = arith.constant 0 : index
    %c0_0 = arith.constant 0 : index
    %c0_1 = arith.constant 0 : index
    %1 = vector.load %arg2[%c0, %c0_0, %c0_1] : memref<1x80x128xbf16, #tpu.memory_space<vmem>>, vector<1x64x128xbf16>
    %2 = vector.shape_cast %1 : vector<1x64x128xbf16> to vector<64x128xbf16>
    %c0_2 = arith.constant 0 : index
    %c0_3 = arith.constant 0 : index
    %c0_4 = arith.constant 0 : index
    %3 = vector.load %arg5[%c0_2, %c0_3, %c0_4] : memref<9x128x128xbf16, #tpu.memory_space<vmem>>, vector<1x128x128xbf16>
    %4 = vector.shape_cast %3 : vector<1x128x128xbf16> to vector<128x128xbf16>
    %cst_5 = arith.constant dense<0.000000e+00> : vector<64x128xf32>
    %5 = tpu.matmul %2, %4, %cst_5 {dimension_numbers = #tpu.dot_dimension_numbers<[1], [0], [0], [1], [0, 0, 1, 1], [], []>} : vector<64x128xbf16>, vector<128x128xbf16>, vector<64x128xf32> -> vector<64x128xf32>
    %6 = arith.addf %0, %5 : vector<64x128xf32>
    %c0_6 = arith.constant 0 : index
    %c0_7 = arith.constant 0 : index
    %c0_8 = arith.constant 0 : index
    %7 = vector.load %arg3[%c0_6, %c0_7, %c0_8] : memref<1x80x128xbf16, #tpu.memory_space<vmem>>, vector<1x64x128xbf16>
    %8 = vector.shape_cast %7 : vector<1x64x128xbf16> to vector<64x128xbf16>
    %c1 = arith.constant 1 : index
    %c0_9 = arith.constant 0 : index
    %c0_10 = arith.constant 0 : index
    %9 = vector.load %arg5[%c1, %c0_9, %c0_10] : memref<9x128x128xbf16, #tpu.memory_space<vmem>>, vector<1x128x128xbf16>
    %10 = vector.shape_cast %9 : vector<1x128x128xbf16> to vector<128x128xbf16>
    %cst_11 = arith.constant dense<0.000000e+00> : vector<64x128xf32>
    %11 = tpu.matmul %8, %10, %cst_11 {dimension_numbers = #tpu.dot_dimension_numbers<[1], [0], [0], [1], [0, 0, 1, 1], [], []>} : vector<64x128xbf16>, vector<128x128xbf16>, vector<64x128xf32> -> vector<64x128xf32>
    %12 = arith.addf %6, %11 : vector<64x128xf32>
    %c0_12 = arith.constant 0 : index
    %c0_13 = arith.constant 0 : index
    %c0_14 = arith.constant 0 : index
    %13 = vector.load %arg4[%c0_12, %c0_13, %c0_14] : memref<1x80x128xbf16, #tpu.memory_space<vmem>>, vector<1x64x128xbf16>
    %14 = vector.shape_cast %13 : vector<1x64x128xbf16> to vector<64x128xbf16>
    %c2 = arith.constant 2 : index
    %c0_15 = arith.constant 0 : index
    %c0_16 = arith.constant 0 : index
    %15 = vector.load %arg5[%c2, %c0_15, %c0_16] : memref<9x128x128xbf16, #tpu.memory_space<vmem>>, vector<1x128x128xbf16>
    %16 = vector.shape_cast %15 : vector<1x128x128xbf16> to vector<128x128xbf16>
    %cst_17 = arith.constant dense<0.000000e+00> : vector<64x128xf32>
    %17 = tpu.matmul %14, %16, %cst_17 {dimension_numbers = #tpu.dot_dimension_numbers<[1], [0], [0], [1], [0, 0, 1, 1], [], []>} : vector<64x128xbf16>, vector<128x128xbf16>, vector<64x128xf32> -> vector<64x128xf32>
    %18 = arith.addf %12, %17 : vector<64x128xf32>
    %c0_18 = arith.constant 0 : index
    %c8 = arith.constant 8 : index
    %c0_19 = arith.constant 0 : index
    %19 = vector.load %arg2[%c0_18, %c8, %c0_19] : memref<1x80x128xbf16, #tpu.memory_space<vmem>>, vector<1x64x128xbf16>
    %20 = vector.shape_cast %19 : vector<1x64x128xbf16> to vector<64x128xbf16>
    %c3 = arith.constant 3 : index
    %c0_20 = arith.constant 0 : index
    %c0_21 = arith.constant 0 : index
    %21 = vector.load %arg5[%c3, %c0_20, %c0_21] : memref<9x128x128xbf16, #tpu.memory_space<vmem>>, vector<1x128x128xbf16>
    %22 = vector.shape_cast %21 : vector<1x128x128xbf16> to vector<128x128xbf16>
    %cst_22 = arith.constant dense<0.000000e+00> : vector<64x128xf32>
    %23 = tpu.matmul %20, %22, %cst_22 {dimension_numbers = #tpu.dot_dimension_numbers<[1], [0], [0], [1], [0, 0, 1, 1], [], []>} : vector<64x128xbf16>, vector<128x128xbf16>, vector<64x128xf32> -> vector<64x128xf32>
    %24 = arith.addf %18, %23 : vector<64x128xf32>
    %c0_23 = arith.constant 0 : index
    %c8_24 = arith.constant 8 : index
    %c0_25 = arith.constant 0 : index
    %25 = vector.load %arg3[%c0_23, %c8_24, %c0_25] : memref<1x80x128xbf16, #tpu.memory_space<vmem>>, vector<1x64x128xbf16>
    %26 = vector.shape_cast %25 : vector<1x64x128xbf16> to vector<64x128xbf16>
    %c4 = arith.constant 4 : index
    %c0_26 = arith.constant 0 : index
    %c0_27 = arith.constant 0 : index
    %27 = vector.load %arg5[%c4, %c0_26, %c0_27] : memref<9x128x128xbf16, #tpu.memory_space<vmem>>, vector<1x128x128xbf16>
    %28 = vector.shape_cast %27 : vector<1x128x128xbf16> to vector<128x128xbf16>
    %cst_28 = arith.constant dense<0.000000e+00> : vector<64x128xf32>
    %29 = tpu.matmul %26, %28, %cst_28 {dimension_numbers = #tpu.dot_dimension_numbers<[1], [0], [0], [1], [0, 0, 1, 1], [], []>} : vector<64x128xbf16>, vector<128x128xbf16>, vector<64x128xf32> -> vector<64x128xf32>
    %30 = arith.addf %24, %29 : vector<64x128xf32>
    %c0_29 = arith.constant 0 : index
    %c8_30 = arith.constant 8 : index
    %c0_31 = arith.constant 0 : index
    %31 = vector.load %arg4[%c0_29, %c8_30, %c0_31] : memref<1x80x128xbf16, #tpu.memory_space<vmem>>, vector<1x64x128xbf16>
    %32 = vector.shape_cast %31 : vector<1x64x128xbf16> to vector<64x128xbf16>
    %c5 = arith.constant 5 : index
    %c0_32 = arith.constant 0 : index
    %c0_33 = arith.constant 0 : index
    %33 = vector.load %arg5[%c5, %c0_32, %c0_33] : memref<9x128x128xbf16, #tpu.memory_space<vmem>>, vector<1x128x128xbf16>
    %34 = vector.shape_cast %33 : vector<1x128x128xbf16> to vector<128x128xbf16>
    %cst_34 = arith.constant dense<0.000000e+00> : vector<64x128xf32>
    %35 = tpu.matmul %32, %34, %cst_34 {dimension_numbers = #tpu.dot_dimension_numbers<[1], [0], [0], [1], [0, 0, 1, 1], [], []>} : vector<64x128xbf16>, vector<128x128xbf16>, vector<64x128xf32> -> vector<64x128xf32>
    %36 = arith.addf %30, %35 : vector<64x128xf32>
    %c0_35 = arith.constant 0 : index
    %c16 = arith.constant 16 : index
    %c0_36 = arith.constant 0 : index
    %37 = vector.load %arg2[%c0_35, %c16, %c0_36] : memref<1x80x128xbf16, #tpu.memory_space<vmem>>, vector<1x64x128xbf16>
    %38 = vector.shape_cast %37 : vector<1x64x128xbf16> to vector<64x128xbf16>
    %c6 = arith.constant 6 : index
    %c0_37 = arith.constant 0 : index
    %c0_38 = arith.constant 0 : index
    %39 = vector.load %arg5[%c6, %c0_37, %c0_38] : memref<9x128x128xbf16, #tpu.memory_space<vmem>>, vector<1x128x128xbf16>
    %40 = vector.shape_cast %39 : vector<1x128x128xbf16> to vector<128x128xbf16>
    %cst_39 = arith.constant dense<0.000000e+00> : vector<64x128xf32>
    %41 = tpu.matmul %38, %40, %cst_39 {dimension_numbers = #tpu.dot_dimension_numbers<[1], [0], [0], [1], [0, 0, 1, 1], [], []>} : vector<64x128xbf16>, vector<128x128xbf16>, vector<64x128xf32> -> vector<64x128xf32>
    %42 = arith.addf %36, %41 : vector<64x128xf32>
    %c0_40 = arith.constant 0 : index
    %c16_41 = arith.constant 16 : index
    %c0_42 = arith.constant 0 : index
    %43 = vector.load %arg3[%c0_40, %c16_41, %c0_42] : memref<1x80x128xbf16, #tpu.memory_space<vmem>>, vector<1x64x128xbf16>
    %44 = vector.shape_cast %43 : vector<1x64x128xbf16> to vector<64x128xbf16>
    %c7 = arith.constant 7 : index
    %c0_43 = arith.constant 0 : index
    %c0_44 = arith.constant 0 : index
    %45 = vector.load %arg5[%c7, %c0_43, %c0_44] : memref<9x128x128xbf16, #tpu.memory_space<vmem>>, vector<1x128x128xbf16>
    %46 = vector.shape_cast %45 : vector<1x128x128xbf16> to vector<128x128xbf16>
    %cst_45 = arith.constant dense<0.000000e+00> : vector<64x128xf32>
    %47 = tpu.matmul %44, %46, %cst_45 {dimension_numbers = #tpu.dot_dimension_numbers<[1], [0], [0], [1], [0, 0, 1, 1], [], []>} : vector<64x128xbf16>, vector<128x128xbf16>, vector<64x128xf32> -> vector<64x128xf32>
    %48 = arith.addf %42, %47 : vector<64x128xf32>
    %c0_46 = arith.constant 0 : index
    %c16_47 = arith.constant 16 : index
    %c0_48 = arith.constant 0 : index
    %49 = vector.load %arg4[%c0_46, %c16_47, %c0_48] : memref<1x80x128xbf16, #tpu.memory_space<vmem>>, vector<1x64x128xbf16>
    %50 = vector.shape_cast %49 : vector<1x64x128xbf16> to vector<64x128xbf16>
    %c8_49 = arith.constant 8 : index
    %c0_50 = arith.constant 0 : index
    %c0_51 = arith.constant 0 : index
    %51 = vector.load %arg5[%c8_49, %c0_50, %c0_51] : memref<9x128x128xbf16, #tpu.memory_space<vmem>>, vector<1x128x128xbf16>
    %52 = vector.shape_cast %51 : vector<1x128x128xbf16> to vector<128x128xbf16>
    %cst_52 = arith.constant dense<0.000000e+00> : vector<64x128xf32>
    %53 = tpu.matmul %50, %52, %cst_52 {dimension_numbers = #tpu.dot_dimension_numbers<[1], [0], [0], [1], [0, 0, 1, 1], [], []>} : vector<64x128xbf16>, vector<128x128xbf16>, vector<64x128xf32> -> vector<64x128xf32>
    %54 = arith.addf %48, %53 : vector<64x128xf32>
    %c0_53 = arith.constant 0 : index
    %c0_54 = arith.constant 0 : index
    %55 = vector.load %arg6[%c0_53, %c0_54] : memref<1x128xf32, #tpu.memory_space<vmem>>, vector<1x128xf32>
    %56 = vector.broadcast %55 : vector<1x128xf32> to vector<64x128xf32>
    %57 = arith.mulf %54, %56 : vector<64x128xf32>
    %c0_55 = arith.constant 0 : index
    %c0_56 = arith.constant 0 : index
    %58 = vector.load %arg7[%c0_55, %c0_56] : memref<1x128xf32, #tpu.memory_space<vmem>>, vector<1x128xf32>
    %59 = vector.broadcast %58 : vector<1x128xf32> to vector<64x128xf32>
    %60 = arith.addf %57, %59 : vector<64x128xf32>
    %cst_57 = arith.constant 0.000000e+00 : f32
    %61 = vector.broadcast %cst_57 : f32 to vector<64x128xf32>
    %62 = arith.maximumf %60, %61 : vector<64x128xf32>
    %63 = arith.truncf %62 : vector<64x128xf32> to vector<64x128xbf16>
    %c0_58 = arith.constant 0 : index
    %c0_59 = arith.constant 0 : index
    %c0_60 = arith.constant 0 : index
    %64 = vector.load %arg8[%c0_58, %c0_59, %c0_60] : memref<1x64x128xbf16, #tpu.memory_space<vmem>>, vector<1x64x128xbf16>
    %65 = vector.shape_cast %64 : vector<1x64x128xbf16> to vector<64x128xbf16>
    %66 = vector.shape_cast %63 : vector<64x128xbf16> to vector<1x64x128xbf16>
    tpu.vector_store %arg8[%c0_58, %c0_59, %c0_60], %66 {strides = array<i32>} : memref<1x64x128xbf16, #tpu.memory_space<vmem>>, vector<1x64x128xbf16>,
    return
  }
  func.func @transform_0(%arg0: i32, %arg1: i32) -> (i32, i32, i32) {
    %c0_i32 = arith.constant 0 : i32
    %c0_i32_0 = arith.constant 0 : i32
    %c0_i32_1 = arith.constant 0 : i32
    return %arg0, %c0_i32, %c0_i32_0 : i32, i32, i32
  }
  func.func @transform_1(%arg0: i32, %arg1: i32) -> (i32, i32, i32) {
    %c0_i32 = arith.constant 0 : i32
    %c0_i32_0 = arith.constant 0 : i32
    %c0_i32_1 = arith.constant 0 : i32
    return %arg0, %c0_i32, %c0_i32_0 : i32, i32, i32
  }
  func.func @transform_2(%arg0: i32, %arg1: i32) -> (i32, i32, i32) {
    %c0_i32 = arith.constant 0 : i32
    %c0_i32_0 = arith.constant 0 : i32
    %c0_i32_1 = arith.constant 0 : i32
    return %arg0, %c0_i32, %c0_i32_0 : i32, i32, i32
  }
  func.func @transform_3(%arg0: i32, %arg1: i32) -> (i32, i32, i32) {
    %c0_i32 = arith.constant 0 : i32
    %c0_i32_0 = arith.constant 0 : i32
    %c0_i32_1 = arith.constant 0 : i32
    return %c0_i32, %c0_i32_0, %arg1 : i32, i32, i32
  }
  func.func @transform_4(%arg0: i32, %arg1: i32) -> (i32, i32) {
    %c0_i32 = arith.constant 0 : i32
    %c0_i32_0 = arith.constant 0 : i32
    return %c0_i32, %arg1 : i32, i32
  }
  func.func @transform_5(%arg0: i32, %arg1: i32) -> (i32, i32) {
    %c0_i32 = arith.constant 0 : i32
    %c0_i32_0 = arith.constant 0 : i32
    return %c0_i32, %arg1 : i32, i32
  }
  func.func @transform_6(%arg0: i32, %arg1: i32) -> (i32, i32, i32) {
    %c0_i32 = arith.constant 0 : i32
    %c0_i32_0 = arith.constant 0 : i32
    return %arg0, %c0_i32, %arg1 : i32, i32, i32
  }
}

module attributes {stable_mosaic.version = 11 : i64} {
  func.func @_bn_relu_kernel(%arg0: i32, %arg1: memref<128x128xbf16, #tpu.memory_space<vmem>>, %arg2: memref<1x128xf32, #tpu.memory_space<vmem>>, %arg3: memref<1x128xf32, #tpu.memory_space<vmem>>, %arg4: memref<128x128xbf16, #tpu.memory_space<vmem>>) attributes {dimension_semantics = [#tpu.dimension_semantics<parallel>], iteration_bounds = array<i64: 1>, scalar_prefetch = 0 : i64, scratch_operands = 0 : i64, tpu.core_type = #tpu.core_type<tc>, window_params = [{transform_indices = @transform_0, window_bounds = array<i64: 128, 128>}, {pipeline_mode = #tpu.pipeline_mode<synchronous>, transform_indices = @transform_1, window_bounds = array<i64: 1, 128>}, {pipeline_mode = #tpu.pipeline_mode<synchronous>, transform_indices = @transform_2, window_bounds = array<i64: 1, 128>}, {transform_indices = @transform_3, window_bounds = array<i64: 128, 128>}]} {
    %c0 = arith.constant 0 : index
    %c0_0 = arith.constant 0 : index
    %0 = vector.load %arg1[%c0, %c0_0] : memref<128x128xbf16, #tpu.memory_space<vmem>>, vector<128x128xbf16>
    %1 = arith.extf %0 : vector<128x128xbf16> to vector<128x128xf32>
    %c0_1 = arith.constant 0 : index
    %c0_2 = arith.constant 0 : index
    %2 = vector.load %arg2[%c0_1, %c0_2] : memref<1x128xf32, #tpu.memory_space<vmem>>, vector<1x128xf32>
    %3 = vector.broadcast %2 : vector<1x128xf32> to vector<128x128xf32>
    %4 = arith.mulf %1, %3 : vector<128x128xf32>
    %c0_3 = arith.constant 0 : index
    %c0_4 = arith.constant 0 : index
    %5 = vector.load %arg3[%c0_3, %c0_4] : memref<1x128xf32, #tpu.memory_space<vmem>>, vector<1x128xf32>
    %6 = vector.broadcast %5 : vector<1x128xf32> to vector<128x128xf32>
    %7 = arith.addf %4, %6 : vector<128x128xf32>
    %cst = arith.constant 0.000000e+00 : f32
    %8 = vector.broadcast %cst : f32 to vector<128x128xf32>
    %9 = arith.maximumf %7, %8 : vector<128x128xf32>
    %10 = arith.truncf %9 : vector<128x128xf32> to vector<128x128xbf16>
    %c0_5 = arith.constant 0 : index
    %c0_6 = arith.constant 0 : index
    %11 = vector.load %arg4[%c0_5, %c0_6] : memref<128x128xbf16, #tpu.memory_space<vmem>>, vector<128x128xbf16>
    tpu.vector_store %arg4[%c0_5, %c0_6], %10 {strides = array<i32>} : memref<128x128xbf16, #tpu.memory_space<vmem>>, vector<128x128xbf16>,
    return
  }
  func.func @transform_0(%arg0: i32) -> (i32, i32) {
    %c0_i32 = arith.constant 0 : i32
    %c0_i32_0 = arith.constant 0 : i32
    return %arg0, %c0_i32 : i32, i32
  }
  func.func @transform_1(%arg0: i32) -> (i32, i32) {
    %c0_i32 = arith.constant 0 : i32
    %c0_i32_0 = arith.constant 0 : i32
    %c0_i32_1 = arith.constant 0 : i32
    return %c0_i32, %c0_i32_0 : i32, i32
  }
  func.func @transform_2(%arg0: i32) -> (i32, i32) {
    %c0_i32 = arith.constant 0 : i32
    %c0_i32_0 = arith.constant 0 : i32
    %c0_i32_1 = arith.constant 0 : i32
    return %c0_i32, %c0_i32_0 : i32, i32
  }
  func.func @transform_3(%arg0: i32) -> (i32, i32) {
    %c0_i32 = arith.constant 0 : i32
    %c0_i32_0 = arith.constant 0 : i32
    return %arg0, %c0_i32 : i32, i32
  }
}

</mosaic_0001>

<bundles_post_ra>
// kernel: network_block_forward.9
= control target key start
LH: loop header
LB: loop body
LE: loop exit
PB: predicated region body
PF: predicated region fallthrough
CT: control target
= control target key end

     0   :  { %s599_s9 = smov 0   ;;  %s601_s10 = smov 0   ;;  %s663_s0 = inlined_call_operand.vmem [shape: bf16[2,64,128], index: 0, kind: input, shape index: {}]   ;;  %s664_s1 = inlined_call_operand.vmem [shape: bf16[1,128,128], index: 1, kind: input, shape index: {}]   ;;  %s665_s2 = inlined_call_operand.vmem [shape: bf16[2,64,128], index: 2, kind: output, shape index: {}]  }
   0x1   :  { %s603_s11 = smov 0  }
   0x2 LB: > { %s24_s12 = sadd.s32 1, %s578_s10  ;;  %p420_p0 = scmp.ge.s32.totalorder %s582_s11, 1  ;;  %s582_s11 = sphi %s603_s11, %s12_s11   ;;  %s578_s10 = sphi %s601_s10, %s667_s10   ;;  %s574_s9 = sphi %s599_s9, %s666_s9  }
   0x3   : > { %p26_p1 = scmp.ge.s32.totalorder %s24_s12, 2  ;;  %p135_p2 = scmp.lt.s32.totalorder %s582_s11, 3 }
   0x5   : > { %s669_s12 = smov (%p26_p1, %s24_s12), 0  ;;  %p136_p3 = pnand %p420_p0, %p135_p2 }
   0x6   : > { %p164_p4 = scmp.lt.s32.totalorder (!%p136_p3), %s574_s9, 1 }
   0x7   : > { %139 = sbr.rel (%p136_p3) target bundleno = 189 (0xbd), region = 28 }
   0xc   : > { %v488_v0 = vld [vmem:[%s664_s1 + $0x38] sm:$0xff]  ;;  %v487_v1 = vld [vmem:[%s664_s1 + $0x30] sm:$0xff]  ;;  %v486_v2 = vld [vmem:[%s664_s1 + $0x28] sm:$0xff]  ;;  %s671_s9 = smov (!%p164_p4, %s574_s9), 1 }
   0xd   : > { %277 = vmatpush.bf16.msra.mxu0 %v488_v0  ;;  %512 = vmatpush.bf16.msra.mxu1 %v488_v0  ;;  %v485_v3 = vld [vmem:[%s664_s1 + $0x20] sm:$0xff]  ;;  %v484_v4 = vld [vmem:[%s664_s1 + $0x18] sm:$0xff]  ;;  %v483_v5 = vld [vmem:[%s664_s1 + $0x10] sm:$0xff]  ;;  %s475_s27 = sshll.u32 %s671_s9, 5 }
   0xe   : > { %513 = vmatpush.bf16.msra.mxu2 %v488_v0  ;;  %514 = vmatpush.bf16.msra.mxu3 %v488_v0  ;;  %v482_v6 = vld [vmem:[%s664_s1 + $0x8] sm:$0xff]  ;;  %v481_v7 = vld [vmem:[%s664_s1] sm:$0xff]  ;;  %s168_s4 = scalar_lea.vmem %s663_s0, %s475_s27  ;;  %s180_s7 = scalar_lea.vmem %s665_s2, %s475_s27 }
   0xf   : > { %v477_v8 = vld [vmem:[%s168_s4] sm:$0xff]  ;;  %v478_v9 = vld [vmem:[%s168_s4 + $0x8] sm:$0xff]  ;;  %v479_v10 = vld [vmem:[%s168_s4 + $0x10] sm:$0xff] }
  0x10   : > { %v480_v11 = vld [vmem:[%s168_s4 + $0x18] sm:$0xff] }
  0x11   : > { %278 = vmatpush.bf16.msra.mxu0 %v487_v1  ;;  %515 = vmatpush.bf16.msra.mxu1 %v487_v1 }
  0x12   : > { %516 = vmatpush.bf16.msra.mxu2 %v487_v1  ;;  %517 = vmatpush.bf16.msra.mxu3 %v487_v1 }
  0x15   : > { %279 = vmatpush.bf16.msra.mxu0 %v486_v2  ;;  %518 = vmatpush.bf16.msra.mxu1 %v486_v2 }
  0x16   : > { %519 = vmatpush.bf16.msra.mxu2 %v486_v2  ;;  %520 = vmatpush.bf16.msra.mxu3 %v486_v2 }
  0x19   : > { %280 = vmatpush.bf16.msra.mxu0 %v485_v3  ;;  %521 = vmatpush.bf16.msra.mxu1 %v485_v3 }
  0x1a   : > { %522 = vmatpush.bf16.msra.mxu2 %v485_v3  ;;  %523 = vmatpush.bf16.msra.mxu3 %v485_v3 }
  0x1d   : > { %281 = vmatpush.bf16.msra.mxu0 %v484_v4  ;;  %524 = vmatpush.bf16.msra.mxu1 %v484_v4 }
  0x1e   : > { %525 = vmatpush.bf16.msra.mxu2 %v484_v4  ;;  %526 = vmatpush.bf16.msra.mxu3 %v484_v4 }
  0x21   : > { %282 = vmatpush.bf16.msra.mxu0 %v483_v5  ;;  %527 = vmatpush.bf16.msra.mxu1 %v483_v5 }
  0x22   : > { %528 = vmatpush.bf16.msra.mxu2 %v483_v5  ;;  %529 = vmatpush.bf16.msra.mxu3 %v483_v5 }
  0x25   : > { %283 = vmatpush.bf16.msra.mxu0 %v482_v6  ;;  %530 = vmatpush.bf16.msra.mxu1 %v482_v6 }
  0x26   : > { %531 = vmatpush.bf16.msra.mxu2 %v482_v6  ;;  %532 = vmatpush.bf16.msra.mxu3 %v482_v6 }
  0x29   : > { %284 = vmatpush.bf16.msra.mxu0 %v481_v7  ;;  %533 = vmatpush.bf16.msra.mxu1 %v481_v7 }
  0x2a   : > { %534 = vmatpush.bf16.msra.mxu2 %v481_v7  ;;  %535 = vmatpush.bf16.msra.mxu3 %v481_v7 }
  0x2c   : > { %285 = vmatmul.bf16.vlgmr.msra.gmra.mxu0 %v477_v8  ;;  %290 = vmatmul.bf16.vlgmr.msra.gmra.mxu1 %v478_v9 }
  0x2d   : > { %295 = vmatmul.bf16.vlgmr.msra.gmra.mxu2 %v479_v10  ;;  %300 = vmatmul.bf16.vlgmr.msra.gmra.mxu3 %v480_v11 }
  0xa9   : > { %v286_v12 = vpop.f32.mrf.mxu0  ;;  %v291_v13 = vpop.f32.mrf.mxu1 }
  0xb0   : > { %v296_v14 = vpop.f32.mrf.mxu2  ;;  %v301_v15 = vpop.f32.mrf.mxu3 }
  0xb1   : > { %v288_v16 = vpop.f32.mrf.mxu0  ;;  %v293_v17 = vpop.f32.mrf.mxu1 }
  0xb2   : > { %v492_v18 = vpack.c.bf16 %v288_v16, %v286_v12  ;;  %v497_v19 = vpack.c.bf16 %v293_v17, %v291_v13 }
  0xb4   : > { %493 = vst [vmem:[%s180_s7] sm:$0xff] %v492_v18  }
  0xb5   : > { %509 = vst [vmem:[%s180_s7 + $0x8] sm:$0xff] %v497_v19  }
  0xb8   : > { %v298_v20 = vpop.f32.mrf.mxu2  ;;  %v303_v21 = vpop.f32.mrf.mxu3 }
  0xb9   : > { %v502_v22 = vpack.c.bf16 %v298_v20, %v296_v14  ;;  %v507_v23 = vpack.c.bf16 %v303_v21, %v301_v15 }
  0xbb   : > { %510 = vst [vmem:[%s180_s7 + $0x10] sm:$0xff] %v502_v22  }
  0xbc   : > { %511 = vst [vmem:[%s180_s7 + $0x18] sm:$0xff] %v507_v23  }
  0xbd PF: > { %s12_s11 = sadd.s32 1, %s582_s11   ;;  %s666_s9 = smov %s578_s10 }
  0xbe   : > { %p9_p5 = scmp.ge.s32.totalorder %s12_s11, 4   ;;  %s667_s10 = smov %s669_s12 }
  0xc0   :  { %11 = sbr.rel (!%p9_p5) target bundleno = 2 (0x2), region = 61 }

// kernel: network_block_forward.7
= control target key start
LH: loop header
LB: loop body
LE: loop exit
PB: predicated region body
PF: predicated region fallthrough
CT: control target
= control target key end

     0   :  { %s1176_s0 = inlined_call_operand.vmem [shape: bf16[512,128], index: 0, kind: input, shape index: {}]   ;;  %s1177_s1 = inlined_call_operand.vmem [shape: f32[1,128], index: 1, kind: input, shape index: {}]   ;;  %s1178_s2 = inlined_call_operand.vmem [shape: f32[1,128], index: 2, kind: input, shape index: {}]   ;;  %s1179_s3 = inlined_call_operand.vmem [shape: bf16[512,128], index: 3, kind: output, shape index: {}]  }
   0x1   :  { %v475_v0 = vld [vmem:[%s1176_s0] sm:$0xff]   ;;  %v762_v5 = vld [vmem:[%s1176_s0 + $0x8] sm:$0xff]   ;;  %v763_v8 = vld [vmem:[%s1176_s0 + $0x10] sm:$0xff]  }
   0x2   :  { %v852_v1 = vld [vmem:[%s1177_s1] ss:$0 sm:$0xff]  ;;  %v476_v2 = vunpack.c.l.bf16 %v475_v0  ;;  %v477_v3 = vunpack.c.h.bf16 %v475_v0  ;;  %v480_v6 = vunpack.c.l.bf16 %v762_v5  ;;  %v481_v7 = vunpack.c.h.bf16 %v762_v5  ;;  %v764_v9 = vld [vmem:[%s1176_s0 + $0x18] sm:$0xff]   ;;  %v766_v35 = vld [vmem:[%s1176_s0 + $0x28] sm:$0xff]  }
   0x3   :  { %v857_v4 = vld [vmem:[%s1178_s2] ss:$0 sm:$0xff]  ;;  %v484_v12 = vunpack.c.l.bf16 %v763_v8  ;;  %v485_v13 = vunpack.c.h.bf16 %v763_v8  ;;  %v488_v16 = vunpack.c.l.bf16 %v764_v9  ;;  %v489_v17 = vunpack.c.h.bf16 %v764_v9  ;;  %v767_v40 = vld [vmem:[%s1176_s0 + $0x30] sm:$0xff]   ;;  %v768_v45 = vld [vmem:[%s1176_s0 + $0x38] sm:$0xff]  }
   0x4   :  { %v146_v10 = vmul.f32 %v852_v1, %v476_v2  ;;  %v147_v11 = vmul.f32 %v852_v1, %v477_v3  ;;  %v148_v14 = vmul.f32 %v852_v1, %v480_v6  ;;  %v149_v15 = vmul.f32 %v852_v1, %v481_v7  ;;  %v765_v26 = vld [vmem:[%s1176_s0 + $0x20] sm:$0xff]  }
   0x5   :  { %v150_v20 = vmul.f32 %v852_v1, %v484_v12  ;;  %v151_v21 = vmul.f32 %v852_v1, %v485_v13  ;;  %v152_v24 = vmul.f32 %v852_v1, %v488_v16  ;;  %v153_v25 = vmul.f32 %v852_v1, %v489_v17  ;;  %v769_v62 = vld [vmem:[%s1176_s0 + $0x40] sm:$0xff]   ;;  %v770_v13 = vld [vmem:[%s1176_s0 + $0x48] sm:$0xff]  }
   0x6   :  { %v214_v18 = vadd.f32 %v857_v4, %v146_v10  ;;  %v215_v19 = vadd.f32 %v857_v4, %v147_v11  ;;  %v216_v22 = vadd.f32 %v857_v4, %v148_v14  ;;  %v217_v23 = vadd.f32 %v857_v4, %v149_v15 }
   0x7   :  { %v218_v29 = vadd.f32 %v857_v4, %v150_v20  ;;  %v219_v30 = vadd.f32 %v857_v4, %v151_v21  ;;  %v220_v33 = vadd.f32 %v857_v4, %v152_v24  ;;  %v221_v34 = vadd.f32 %v857_v4, %v153_v25 }
   0x8   :  { %v278_v27 = vmax.f32 %v214_v18, 0.0  ;;  %v279_v28 = vmax.f32 %v215_v19, 0.0  ;;  %v280_v31 = vmax.f32 %v216_v22, 0.0  ;;  %v281_v32 = vmax.f32 %v217_v23, 0.0  ;;  %v771_v18 = vld [vmem:[%s1176_s0 + $0x50] sm:$0xff]   ;;  %v772_v23 = vld [vmem:[%s1176_s0 + $0x58] sm:$0xff]  }
   0x9   :  { %v282_v37 = vmax.f32 %v218_v29, 0.0  ;;  %v283_v38 = vmax.f32 %v219_v30, 0.0  ;;  %v492_v39 = vunpack.c.l.bf16 %v765_v26  ;;  %v284_v42 = vmax.f32 %v220_v33, 0.0 }
   0xa   :  { %v605_v36 = vpack.c.bf16 %v279_v28, %v278_v27  ;;  %v610_v41 = vpack.c.bf16 %v281_v32, %v280_v31  ;;  %v285_v43 = vmax.f32 %v221_v34, 0.0  ;;  %v493_v44 = vunpack.c.h.bf16 %v765_v26 }
   0xb   :  { %v615_v46 = vpack.c.bf16 %v283_v38, %v282_v37  ;;  %v154_v47 = vmul.f32 %v852_v1, %v492_v39  ;;  %v496_v48 = vunpack.c.l.bf16 %v766_v35  ;;  %v497_v49 = vunpack.c.h.bf16 %v766_v35 }
   0xc   :  { %606 = vst [vmem:[%s1179_s3] sm:$0xff] %v605_v36   ;;  %v620_v50 = vpack.c.bf16 %v285_v43, %v284_v42  ;;  %v155_v51 = vmul.f32 %v852_v1, %v493_v44  ;;  %v500_v52 = vunpack.c.l.bf16 %v767_v40  ;;  %v501_v53 = vunpack.c.h.bf16 %v767_v40  ;;  %v773_v36 = vld [vmem:[%s1176_s0 + $0x60] sm:$0xff]  }
   0xd   :  { %793 = vst [vmem:[%s1179_s3 + $0x8] sm:$0xff] %v610_v41   ;;  %v222_v54 = vadd.f32 %v857_v4, %v154_v47  ;;  %v156_v55 = vmul.f32 %v852_v1, %v496_v48  ;;  %v157_v56 = vmul.f32 %v852_v1, %v497_v49  ;;  %v504_v57 = vunpack.c.l.bf16 %v768_v45 }
   0xe   :  { %794 = vst [vmem:[%s1179_s3 + $0x10] sm:$0xff] %v615_v46   ;;  %v223_v58 = vadd.f32 %v857_v4, %v155_v51  ;;  %v158_v59 = vmul.f32 %v852_v1, %v500_v52  ;;  %v159_v60 = vmul.f32 %v852_v1, %v501_v53  ;;  %v505_v61 = vunpack.c.h.bf16 %v768_v45  ;;  %v774_v53 = vld [vmem:[%s1176_s0 + $0x68] sm:$0xff]  }
   0xf   :  { %795 = vst [vmem:[%s1179_s3 + $0x18] sm:$0xff] %v620_v50   ;;  %v286_v63 = vmax.f32 %v222_v54, 0.0  ;;  %v224_v0 = vadd.f32 %v857_v4, %v156_v55  ;;  %v225_v2 = vadd.f32 %v857_v4, %v157_v56  ;;  %v160_v3 = vmul.f32 %v852_v1, %v504_v57 }
  0x10   :  { %v287_v5 = vmax.f32 %v223_v58, 0.0  ;;  %v226_v6 = vadd.f32 %v857_v4, %v158_v59  ;;  %v227_v7 = vadd.f32 %v857_v4, %v159_v60  ;;  %v161_v8 = vmul.f32 %v852_v1, %v505_v61  ;;  %v775_v58 = vld [vmem:[%s1176_s0 + $0x70] sm:$0xff]  }
  0x11   :  { %v288_v9 = vmax.f32 %v224_v0, 0.0  ;;  %v289_v10 = vmax.f32 %v225_v2, 0.0  ;;  %v228_v11 = vadd.f32 %v857_v4, %v160_v3  ;;  %v508_v12 = vunpack.c.l.bf16 %v769_v62 }
  0x12   :  { %v625_v14 = vpack.c.bf16 %v287_v5, %v286_v63  ;;  %v290_v15 = vmax.f32 %v226_v6, 0.0  ;;  %v291_v16 = vmax.f32 %v227_v7, 0.0  ;;  %v229_v17 = vadd.f32 %v857_v4, %v161_v8  ;;  %v776_v63 = vld [vmem:[%s1176_s0 + $0x78] sm:$0xff]  }
  0x13   :  { %v630_v19 = vpack.c.bf16 %v289_v10, %v288_v9  ;;  %v292_v20 = vmax.f32 %v228_v11, 0.0  ;;  %v509_v21 = vunpack.c.h.bf16 %v769_v62  ;;  %v162_v22 = vmul.f32 %v852_v1, %v508_v12 }
  0x14   :  { %796 = vst [vmem:[%s1179_s3 + $0x20] sm:$0xff] %v625_v14   ;;  %v635_v24 = vpack.c.bf16 %v291_v16, %v290_v15  ;;  %v293_v25 = vmax.f32 %v229_v17, 0.0  ;;  %v512_v26 = vunpack.c.l.bf16 %v770_v13  ;;  %v513_v27 = vunpack.c.h.bf16 %v770_v13  ;;  %v777_v14 = vld [vmem:[%s1176_s0 + $0x80] sm:$0xff]  }
  0x15   :  { %797 = vst [vmem:[%s1179_s3 + $0x28] sm:$0xff] %v630_v19   ;;  %v163_v28 = vmul.f32 %v852_v1, %v509_v21  ;;  %v230_v29 = vadd.f32 %v857_v4, %v162_v22  ;;  %v516_v30 = vunpack.c.l.bf16 %v771_v18  ;;  %v517_v31 = vunpack.c.h.bf16 %v771_v18 }
  0x16   :  { %798 = vst [vmem:[%s1179_s3 + $0x30] sm:$0xff] %v635_v24   ;;  %v640_v32 = vpack.c.bf16 %v293_v25, %v292_v20  ;;  %v164_v33 = vmul.f32 %v852_v1, %v512_v26  ;;  %v165_v34 = vmul.f32 %v852_v1, %v513_v27  ;;  %v520_v35 = vunpack.c.l.bf16 %v772_v23  ;;  %v778_v27 = vld [vmem:[%s1176_s0 + $0x88] sm:$0xff]  }
  0x17   :  { %v231_v37 = vadd.f32 %v857_v4, %v163_v28  ;;  %v294_v38 = vmax.f32 %v230_v29, 0.0  ;;  %v166_v39 = vmul.f32 %v852_v1, %v516_v30  ;;  %v167_v40 = vmul.f32 %v852_v1, %v517_v31 }
  0x18   :  { %799 = vst [vmem:[%s1179_s3 + $0x38] sm:$0xff] %v640_v32   ;;  %v232_v41 = vadd.f32 %v857_v4, %v164_v33  ;;  %v233_v42 = vadd.f32 %v857_v4, %v165_v34  ;;  %v521_v43 = vunpack.c.h.bf16 %v772_v23  ;;  %v168_v44 = vmul.f32 %v852_v1, %v520_v35 }
  0x19   :  { %v295_v45 = vmax.f32 %v231_v37, 0.0  ;;  %v234_v46 = vadd.f32 %v857_v4, %v166_v39  ;;  %v235_v47 = vadd.f32 %v857_v4, %v167_v40  ;;  %v524_v48 = vunpack.c.l.bf16 %v773_v36 }
  0x1a   :  { %v296_v49 = vmax.f32 %v232_v41, 0.0  ;;  %v297_v50 = vmax.f32 %v233_v42, 0.0  ;;  %v169_v51 = vmul.f32 %v852_v1, %v521_v43  ;;  %v236_v52 = vadd.f32 %v857_v4, %v168_v44  ;;  %v780_v41 = vld [vmem:[%s1176_s0 + $0x98] sm:$0xff]  }
  0x1b   :  { %v645_v54 = vpack.c.bf16 %v295_v45, %v294_v38  ;;  %v298_v55 = vmax.f32 %v234_v46, 0.0  ;;  %v299_v56 = vmax.f32 %v235_v47, 0.0  ;;  %v525_v57 = vunpack.c.h.bf16 %v773_v36  ;;  %v779_v36 = vld [vmem:[%s1176_s0 + $0x90] sm:$0xff]  }
  0x1c   :  { %v650_v59 = vpack.c.bf16 %v297_v50, %v296_v49  ;;  %v237_v60 = vadd.f32 %v857_v4, %v169_v51  ;;  %v300_v61 = vmax.f32 %v236_v52, 0.0  ;;  %v170_v62 = vmul.f32 %v852_v1, %v524_v48 }
  0x1d   :  { %800 = vst [vmem:[%s1179_s3 + $0x40] sm:$0xff] %v645_v54   ;;  %v655_v0 = vpack.c.bf16 %v299_v56, %v298_v55  ;;  %v171_v2 = vmul.f32 %v852_v1, %v525_v57  ;;  %v528_v3 = vunpack.c.l.bf16 %v774_v53  ;;  %v529_v5 = vunpack.c.h.bf16 %v774_v53  ;;  %v781_v54 = vld [vmem:[%s1176_s0 + $0xa0] sm:$0xff]  }
  0x1e   :  { %801 = vst [vmem:[%s1179_s3 + $0x48] sm:$0xff] %v650_v59   ;;  %v301_v6 = vmax.f32 %v237_v60, 0.0  ;;  %v238_v7 = vadd.f32 %v857_v4, %v170_v62  ;;  %v532_v8 = vunpack.c.l.bf16 %v775_v58  ;;  %v533_v9 = vunpack.c.h.bf16 %v775_v58 }
  0x1f   :  { %802 = vst [vmem:[%s1179_s3 + $0x50] sm:$0xff] %v655_v0   ;;  %v239_v10 = vadd.f32 %v857_v4, %v171_v2  ;;  %v172_v11 = vmul.f32 %v852_v1, %v528_v3  ;;  %v173_v12 = vmul.f32 %v852_v1, %v529_v5  ;;  %v536_v13 = vunpack.c.l.bf16 %v776_v63  ;;  %v782_v5 = vld [vmem:[%s1176_s0 + $0xa8] sm:$0xff]  }
  0x20   :  { %v660_v15 = vpack.c.bf16 %v301_v6, %v300_v61  ;;  %v302_v16 = vmax.f32 %v238_v7, 0.0  ;;  %v174_v17 = vmul.f32 %v852_v1, %v532_v8  ;;  %v175_v18 = vmul.f32 %v852_v1, %v533_v9 }
  0x21   :  { %v303_v19 = vmax.f32 %v239_v10, 0.0  ;;  %v240_v20 = vadd.f32 %v857_v4, %v172_v11  ;;  %v241_v21 = vadd.f32 %v857_v4, %v173_v12  ;;  %v537_v22 = vunpack.c.h.bf16 %v776_v63 }
  0x22   :  { %803 = vst [vmem:[%s1179_s3 + $0x58] sm:$0xff] %v660_v15   ;;  %v242_v23 = vadd.f32 %v857_v4, %v174_v17  ;;  %v243_v24 = vadd.f32 %v857_v4, %v175_v18  ;;  %v176_v25 = vmul.f32 %v852_v1, %v536_v13  ;;  %v540_v26 = vunpack.c.l.bf16 %v777_v14 }
  0x23   :  { %v665_v28 = vpack.c.bf16 %v303_v19, %v302_v16  ;;  %v304_v29 = vmax.f32 %v240_v20, 0.0  ;;  %v305_v30 = vmax.f32 %v241_v21, 0.0  ;;  %v177_v31 = vmul.f32 %v852_v1, %v537_v22 }
  0x24   :  { %v306_v32 = vmax.f32 %v242_v23, 0.0  ;;  %v307_v33 = vmax.f32 %v243_v24, 0.0  ;;  %v244_v34 = vadd.f32 %v857_v4, %v176_v25  ;;  %v541_v35 = vunpack.c.h.bf16 %v777_v14  ;;  %v783_v14 = vld [vmem:[%s1176_s0 + $0xb0] sm:$0xff]   ;;  %v784_v23 = vld [vmem:[%s1176_s0 + $0xb8] sm:$0xff]  }
  0x25   :  { %804 = vst [vmem:[%s1179_s3 + $0x60] sm:$0xff] %v665_v28   ;;  %v670_v37 = vpack.c.bf16 %v305_v30, %v304_v29  ;;  %v245_v38 = vadd.f32 %v857_v4, %v177_v31  ;;  %v178_v39 = vmul.f32 %v852_v1, %v540_v26  ;;  %v544_v40 = vunpack.c.l.bf16 %v778_v27 }
  0x26   :  { %v675_v42 = vpack.c.bf16 %v307_v33, %v306_v32  ;;  %v308_v43 = vmax.f32 %v244_v34, 0.0  ;;  %v179_v44 = vmul.f32 %v852_v1, %v541_v35  ;;  %v545_v45 = vunpack.c.h.bf16 %v778_v27  ;;  %v785_v32 = vld [vmem:[%s1176_s0 + $0xc0] sm:$0xff]  }
  0x27   :  { %805 = vst [vmem:[%s1179_s3 + $0x68] sm:$0xff] %v670_v37   ;;  %v309_v46 = vmax.f32 %v245_v38, 0.0  ;;  %v246_v47 = vadd.f32 %v857_v4, %v178_v39  ;;  %v180_v48 = vmul.f32 %v852_v1, %v544_v40  ;;  %v548_v49 = vunpack.c.l.bf16 %v779_v36 }
  0x28   :  { %806 = vst [vmem:[%s1179_s3 + $0x70] sm:$0xff] %v675_v42   ;;  %v247_v50 = vadd.f32 %v857_v4, %v179_v44  ;;  %v181_v51 = vmul.f32 %v852_v1, %v545_v45  ;;  %v549_v52 = vunpack.c.h.bf16 %v779_v36  ;;  %v552_v53 = vunpack.c.l.bf16 %v780_v41  ;;  %v786_v45 = vld [vmem:[%s1176_s0 + $0xc8] sm:$0xff]  }
  0x29   :  { %v680_v55 = vpack.c.bf16 %v309_v46, %v308_v43  ;;  %v310_v56 = vmax.f32 %v246_v47, 0.0  ;;  %v248_v57 = vadd.f32 %v857_v4, %v180_v48  ;;  %v182_v58 = vmul.f32 %v852_v1, %v548_v49 }
  0x2a   :  { %v311_v59 = vmax.f32 %v247_v50, 0.0  ;;  %v249_v60 = vadd.f32 %v857_v4, %v181_v51  ;;  %v183_v61 = vmul.f32 %v852_v1, %v549_v52  ;;  %v553_v62 = vunpack.c.h.bf16 %v780_v41 }
  0x2b   :  { %807 = vst [vmem:[%s1179_s3 + $0x78] sm:$0xff] %v680_v55   ;;  %v312_v63 = vmax.f32 %v248_v57, 0.0  ;;  %v250_v0 = vadd.f32 %v857_v4, %v182_v58  ;;  %v184_v2 = vmul.f32 %v852_v1, %v552_v53  ;;  %v556_v3 = vunpack.c.l.bf16 %v781_v54 }
  0x2c   :  { %v685_v6 = vpack.c.bf16 %v311_v59, %v310_v56  ;;  %v313_v7 = vmax.f32 %v249_v60, 0.0  ;;  %v251_v8 = vadd.f32 %v857_v4, %v183_v61  ;;  %v185_v9 = vmul.f32 %v852_v1, %v553_v62 }
  0x2d   :  { %v314_v10 = vmax.f32 %v250_v0, 0.0  ;;  %v252_v11 = vadd.f32 %v857_v4, %v184_v2  ;;  %v557_v12 = vunpack.c.h.bf16 %v781_v54  ;;  %v186_v13 = vmul.f32 %v852_v1, %v556_v3  ;;  %v787_v54 = vld [vmem:[%s1176_s0 + $0xd0] sm:$0xff]  }
  0x2e   :  { %808 = vst [vmem:[%s1179_s3 + $0x80] sm:$0xff] %v685_v6   ;;  %v690_v15 = vpack.c.bf16 %v313_v7, %v312_v63  ;;  %v315_v16 = vmax.f32 %v251_v8, 0.0  ;;  %v253_v17 = vadd.f32 %v857_v4, %v185_v9  ;;  %v560_v18 = vunpack.c.l.bf16 %v782_v5  ;;  %v788_v63 = vld [vmem:[%s1176_s0 + $0xd8] sm:$0xff]  }
  0x2f   :  { %v316_v19 = vmax.f32 %v252_v11, 0.0  ;;  %v187_v20 = vmul.f32 %v852_v1, %v557_v12  ;;  %v254_v21 = vadd.f32 %v857_v4, %v186_v13  ;;  %v561_v22 = vunpack.c.h.bf16 %v782_v5 }
  0x30   :  { %809 = vst [vmem:[%s1179_s3 + $0x88] sm:$0xff] %v690_v15   ;;  %v695_v24 = vpack.c.bf16 %v315_v16, %v314_v10  ;;  %v317_v25 = vmax.f32 %v253_v17, 0.0  ;;  %v188_v26 = vmul.f32 %v852_v1, %v560_v18  ;;  %v564_v27 = vunpack.c.l.bf16 %v783_v14  ;;  %v789_v10 = vld [vmem:[%s1176_s0 + $0xe0] sm:$0xff]  }
  0x31   :  { %v255_v28 = vadd.f32 %v857_v4, %v187_v20  ;;  %v318_v29 = vmax.f32 %v254_v21, 0.0  ;;  %v189_v30 = vmul.f32 %v852_v1, %v561_v22  ;;  %v565_v31 = vunpack.c.h.bf16 %v783_v14 }
  0x32   :  { %810 = vst [vmem:[%s1179_s3 + $0x90] sm:$0xff] %v695_v24   ;;  %v700_v33 = vpack.c.bf16 %v317_v25, %v316_v19  ;;  %v256_v34 = vadd.f32 %v857_v4, %v188_v26  ;;  %v190_v35 = vmul.f32 %v852_v1, %v564_v27  ;;  %v568_v36 = vunpack.c.l.bf16 %v784_v23 }
  0x33   :  { %v319_v37 = vmax.f32 %v255_v28, 0.0  ;;  %v257_v38 = vadd.f32 %v857_v4, %v189_v30  ;;  %v191_v39 = vmul.f32 %v852_v1, %v565_v31  ;;  %v569_v40 = vunpack.c.h.bf16 %v784_v23  ;;  %v790_v23 = vld [vmem:[%s1176_s0 + $0xe8] sm:$0xff]  }
  0x34   :  { %811 = vst [vmem:[%s1179_s3 + $0x98] sm:$0xff] %v700_v33   ;;  %v320_v41 = vmax.f32 %v256_v34, 0.0  ;;  %v258_v42 = vadd.f32 %v857_v4, %v190_v35  ;;  %v192_v43 = vmul.f32 %v852_v1, %v568_v36  ;;  %v572_v44 = vunpack.c.l.bf16 %v785_v32 }
  0x35   :  { %v705_v46 = vpack.c.bf16 %v319_v37, %v318_v29  ;;  %v321_v47 = vmax.f32 %v257_v38, 0.0  ;;  %v259_v48 = vadd.f32 %v857_v4, %v191_v39  ;;  %v193_v49 = vmul.f32 %v852_v1, %v569_v40 }
  0x36   :  { %v322_v50 = vmax.f32 %v258_v42, 0.0  ;;  %v260_v51 = vadd.f32 %v857_v4, %v192_v43  ;;  %v573_v52 = vunpack.c.h.bf16 %v785_v32  ;;  %v194_v53 = vmul.f32 %v852_v1, %v572_v44  ;;  %v791_v32 = vld [vmem:[%s1176_s0 + $0xf0] sm:$0xff]  }
  0x37   :  { %812 = vst [vmem:[%s1179_s3 + $0xa0] sm:$0xff] %v705_v46   ;;  %v710_v55 = vpack.c.bf16 %v321_v47, %v320_v41  ;;  %v323_v56 = vmax.f32 %v259_v48, 0.0  ;;  %v261_v57 = vadd.f32 %v857_v4, %v193_v49  ;;  %v576_v58 = vunpack.c.l.bf16 %v786_v45  ;;  %v792_v41 = vld [vmem:[%s1176_s0 + $0xf8] sm:$0xff]  }
  0x38   :  { %v324_v59 = vmax.f32 %v260_v51, 0.0  ;;  %v195_v60 = vmul.f32 %v852_v1, %v573_v52  ;;  %v262_v61 = vadd.f32 %v857_v4, %v194_v53  ;;  %v577_v62 = vunpack.c.h.bf16 %v786_v45 }
  0x39   :  { %813 = vst [vmem:[%s1179_s3 + $0xa8] sm:$0xff] %v710_v55   ;;  %v715_v0 = vpack.c.bf16 %v323_v56, %v322_v50  ;;  %v325_v2 = vmax.f32 %v261_v57, 0.0  ;;  %v196_v3 = vmul.f32 %v852_v1, %v576_v58  ;;  %v580_v5 = vunpack.c.l.bf16 %v787_v54 }
  0x3a   :  { %v263_v6 = vadd.f32 %v857_v4, %v195_v60  ;;  %v326_v7 = vmax.f32 %v262_v61, 0.0  ;;  %v197_v8 = vmul.f32 %v852_v1, %v577_v62  ;;  %v581_v9 = vunpack.c.h.bf16 %v787_v54 }
  0x3b   :  { %814 = vst [vmem:[%s1179_s3 + $0xb0] sm:$0xff] %v715_v0   ;;  %v720_v11 = vpack.c.bf16 %v325_v2, %v324_v59  ;;  %v264_v12 = vadd.f32 %v857_v4, %v196_v3  ;;  %v198_v13 = vmul.f32 %v852_v1, %v580_v5  ;;  %v584_v14 = vunpack.c.l.bf16 %v788_v63 }
  0x3c   :  { %v327_v15 = vmax.f32 %v263_v6, 0.0  ;;  %v265_v16 = vadd.f32 %v857_v4, %v197_v8  ;;  %v199_v17 = vmul.f32 %v852_v1, %v581_v9  ;;  %v585_v18 = vunpack.c.h.bf16 %v788_v63 }
  0x3d   :  { %815 = vst [vmem:[%s1179_s3 + $0xb8] sm:$0xff] %v720_v11   ;;  %v328_v19 = vmax.f32 %v264_v12, 0.0  ;;  %v266_v20 = vadd.f32 %v857_v4, %v198_v13  ;;  %v200_v21 = vmul.f32 %v852_v1, %v584_v14  ;;  %v588_v22 = vunpack.c.l.bf16 %v789_v10 }
  0x3e   :  { %v725_v24 = vpack.c.bf16 %v327_v15, %v326_v7  ;;  %v329_v25 = vmax.f32 %v265_v16, 0.0  ;;  %v267_v26 = vadd.f32 %v857_v4, %v199_v17  ;;  %v201_v27 = vmul.f32 %v852_v1, %v585_v18 }
  0x3f   :  { %v330_v28 = vmax.f32 %v266_v20, 0.0  ;;  %v268_v29 = vadd.f32 %v857_v4, %v200_v21  ;;  %v589_v30 = vunpack.c.h.bf16 %v789_v10  ;;  %v202_v31 = vmul.f32 %v852_v1, %v588_v22 }
  0x40   :  { %816 = vst [vmem:[%s1179_s3 + $0xc0] sm:$0xff] %v725_v24   ;;  %v730_v33 = vpack.c.bf16 %v329_v25, %v328_v19  ;;  %v331_v34 = vmax.f32 %v267_v26, 0.0  ;;  %v269_v35 = vadd.f32 %v857_v4, %v201_v27  ;;  %v592_v36 = vunpack.c.l.bf16 %v790_v23 }
  0x41   :  { %v332_v37 = vmax.f32 %v268_v29, 0.0  ;;  %v203_v38 = vmul.f32 %v852_v1, %v589_v30  ;;  %v270_v39 = vadd.f32 %v857_v4, %v202_v31  ;;  %v593_v40 = vunpack.c.h.bf16 %v790_v23 }
  0x42   :  { %817 = vst [vmem:[%s1179_s3 + $0xc8] sm:$0xff] %v730_v33   ;;  %v735_v42 = vpack.c.bf16 %v331_v34, %v330_v28  ;;  %v333_v43 = vmax.f32 %v269_v35, 0.0  ;;  %v204_v44 = vmul.f32 %v852_v1, %v592_v36  ;;  %v596_v45 = vunpack.c.l.bf16 %v791_v32 }
  0x43   :  { %v271_v46 = vadd.f32 %v857_v4, %v203_v38  ;;  %v334_v47 = vmax.f32 %v270_v39, 0.0  ;;  %v205_v48 = vmul.f32 %v852_v1, %v593_v40  ;;  %v597_v49 = vunpack.c.h.bf16 %v791_v32 }
  0x44   :  { %818 = vst [vmem:[%s1179_s3 + $0xd0] sm:$0xff] %v735_v42   ;;  %v740_v50 = vpack.c.bf16 %v333_v43, %v332_v37  ;;  %v272_v51 = vadd.f32 %v857_v4, %v204_v44  ;;  %v206_v52 = vmul.f32 %v852_v1, %v596_v45  ;;  %v600_v53 = vunpack.c.l.bf16 %v792_v41 }
  0x45   :  { %v335_v54 = vmax.f32 %v271_v46, 0.0  ;;  %v273_v55 = vadd.f32 %v857_v4, %v205_v48  ;;  %v207_v56 = vmul.f32 %v852_v1, %v597_v49  ;;  %v601_v57 = vunpack.c.h.bf16 %v792_v41 }
  0x46   :  { %819 = vst [vmem:[%s1179_s3 + $0xd8] sm:$0xff] %v740_v50   ;;  %v336_v58 = vmax.f32 %v272_v51, 0.0  ;;  %v274_v59 = vadd.f32 %v857_v4, %v206_v52  ;;  %v208_v60 = vmul.f32 %v852_v1, %v600_v53 }
  0x47   :  { %v745_v61 = vpack.c.bf16 %v335_v54, %v334_v47  ;;  %v337_v62 = vmax.f32 %v273_v55, 0.0  ;;  %v275_v63 = vadd.f32 %v857_v4, %v207_v56  ;;  %v209_v0 = vmul.f32 %v852_v1, %v601_v57 }
  0x48   :  { %v338_v2 = vmax.f32 %v274_v59, 0.0  ;;  %v276_v3 = vadd.f32 %v857_v4, %v208_v60 }
  0x49   :  { %820 = vst [vmem:[%s1179_s3 + $0xe0] sm:$0xff] %v745_v61   ;;  %v750_v5 = vpack.c.bf16 %v337_v62, %v336_v58  ;;  %v339_v6 = vmax.f32 %v275_v63, 0.0  ;;  %v277_v7 = vadd.f32 %v857_v4, %v209_v0 }
  0x4a   :  { %v340_v8 = vmax.f32 %v276_v3, 0.0 }
  0x4b   :  { %821 = vst [vmem:[%s1179_s3 + $0xe8] sm:$0xff] %v750_v5   ;;  %v755_v9 = vpack.c.bf16 %v339_v6, %v338_v2  ;;  %v341_v10 = vmax.f32 %v277_v7, 0.0 }
  0x4d   :  { %822 = vst [vmem:[%s1179_s3 + $0xf0] sm:$0xff] %v755_v9   ;;  %v760_v1 = vpack.c.bf16 %v341_v10, %v340_v8 }
  0x4f   :  { %823 = vst [vmem:[%s1179_s3 + $0xf8] sm:$0xff] %v760_v1  }

// kernel: network_block_forward.11
= control target key start
LH: loop header
LB: loop body
LE: loop exit
PB: predicated region body
PF: predicated region fallthrough
CT: control target
= control target key end

     0   :  { %s336_s0 = inlined_call_operand.vmem [shape: bf16[128,128], index: 0, kind: input, shape index: {}]   ;;  %s337_s1 = inlined_call_operand.vmem [shape: f32[1,128], index: 1, kind: input, shape index: {}]   ;;  %s338_s2 = inlined_call_operand.vmem [shape: f32[1,128], index: 2, kind: input, shape index: {}]   ;;  %s339_s3 = inlined_call_operand.vmem [shape: bf16[128,128], index: 3, kind: output, shape index: {}]  }
   0x1   :  { %v139_v0 = vld [vmem:[%s336_s0] sm:$0xff]   ;;  %v210_v5 = vld [vmem:[%s336_s0 + $0x8] sm:$0xff]   ;;  %v211_v8 = vld [vmem:[%s336_s0 + $0x10] sm:$0xff]  }
   0x2   :  { %v252_v1 = vld [vmem:[%s337_s1] ss:$0 sm:$0xff]  ;;  %v140_v2 = vunpack.c.l.bf16 %v139_v0  ;;  %v141_v3 = vunpack.c.h.bf16 %v139_v0  ;;  %v144_v6 = vunpack.c.l.bf16 %v210_v5  ;;  %v145_v7 = vunpack.c.h.bf16 %v210_v5  ;;  %v212_v9 = vld [vmem:[%s336_s0 + $0x18] sm:$0xff]   ;;  %v214_v35 = vld [vmem:[%s336_s0 + $0x28] sm:$0xff]  }
   0x3   :  { %v257_v4 = vld [vmem:[%s338_s2] ss:$0 sm:$0xff]  ;;  %v148_v12 = vunpack.c.l.bf16 %v211_v8  ;;  %v149_v13 = vunpack.c.h.bf16 %v211_v8  ;;  %v152_v16 = vunpack.c.l.bf16 %v212_v9  ;;  %v153_v17 = vunpack.c.h.bf16 %v212_v9  ;;  %v215_v40 = vld [vmem:[%s336_s0 + $0x30] sm:$0xff]   ;;  %v216_v45 = vld [vmem:[%s336_s0 + $0x38] sm:$0xff]  }
   0x4   :  { %v50_v10 = vmul.f32 %v252_v1, %v140_v2  ;;  %v51_v11 = vmul.f32 %v252_v1, %v141_v3  ;;  %v52_v14 = vmul.f32 %v252_v1, %v144_v6  ;;  %v53_v15 = vmul.f32 %v252_v1, %v145_v7  ;;  %v213_v26 = vld [vmem:[%s336_s0 + $0x20] sm:$0xff]  }
   0x5   :  { %v54_v20 = vmul.f32 %v252_v1, %v148_v12  ;;  %v55_v21 = vmul.f32 %v252_v1, %v149_v13  ;;  %v56_v24 = vmul.f32 %v252_v1, %v152_v16  ;;  %v57_v25 = vmul.f32 %v252_v1, %v153_v17 }
   0x6   :  { %v70_v18 = vadd.f32 %v257_v4, %v50_v10  ;;  %v71_v19 = vadd.f32 %v257_v4, %v51_v11  ;;  %v72_v22 = vadd.f32 %v257_v4, %v52_v14  ;;  %v73_v23 = vadd.f32 %v257_v4, %v53_v15 }
   0x7   :  { %v74_v29 = vadd.f32 %v257_v4, %v54_v20  ;;  %v75_v30 = vadd.f32 %v257_v4, %v55_v21  ;;  %v76_v33 = vadd.f32 %v257_v4, %v56_v24  ;;  %v77_v34 = vadd.f32 %v257_v4, %v57_v25 }
   0x8   :  { %v86_v27 = vmax.f32 %v70_v18, 0.0  ;;  %v87_v28 = vmax.f32 %v71_v19, 0.0  ;;  %v88_v31 = vmax.f32 %v72_v22, 0.0  ;;  %v89_v32 = vmax.f32 %v73_v23, 0.0 }
   0x9   :  { %v90_v37 = vmax.f32 %v74_v29, 0.0  ;;  %v91_v38 = vmax.f32 %v75_v30, 0.0  ;;  %v156_v39 = vunpack.c.l.bf16 %v213_v26  ;;  %v92_v42 = vmax.f32 %v76_v33, 0.0 }
   0xa   :  { %v173_v36 = vpack.c.bf16 %v87_v28, %v86_v27  ;;  %v178_v41 = vpack.c.bf16 %v89_v32, %v88_v31  ;;  %v93_v43 = vmax.f32 %v77_v34, 0.0  ;;  %v157_v44 = vunpack.c.h.bf16 %v213_v26 }
   0xb   :  { %v183_v46 = vpack.c.bf16 %v91_v38, %v90_v37  ;;  %v58_v47 = vmul.f32 %v252_v1, %v156_v39  ;;  %v160_v48 = vunpack.c.l.bf16 %v214_v35  ;;  %v161_v49 = vunpack.c.h.bf16 %v214_v35 }
   0xc   :  { %174 = vst [vmem:[%s339_s3] sm:$0xff] %v173_v36   ;;  %v188_v50 = vpack.c.bf16 %v93_v43, %v92_v42  ;;  %v59_v51 = vmul.f32 %v252_v1, %v157_v44  ;;  %v164_v52 = vunpack.c.l.bf16 %v215_v40  ;;  %v165_v53 = vunpack.c.h.bf16 %v215_v40 }
   0xd   :  { %217 = vst [vmem:[%s339_s3 + $0x8] sm:$0xff] %v178_v41   ;;  %v78_v54 = vadd.f32 %v257_v4, %v58_v47  ;;  %v60_v55 = vmul.f32 %v252_v1, %v160_v48  ;;  %v61_v56 = vmul.f32 %v252_v1, %v161_v49  ;;  %v168_v57 = vunpack.c.l.bf16 %v216_v45 }
   0xe   :  { %218 = vst [vmem:[%s339_s3 + $0x10] sm:$0xff] %v183_v46   ;;  %v79_v58 = vadd.f32 %v257_v4, %v59_v51  ;;  %v62_v59 = vmul.f32 %v252_v1, %v164_v52  ;;  %v63_v60 = vmul.f32 %v252_v1, %v165_v53  ;;  %v169_v61 = vunpack.c.h.bf16 %v216_v45 }
   0xf   :  { %219 = vst [vmem:[%s339_s3 + $0x18] sm:$0xff] %v188_v50   ;;  %v94_v62 = vmax.f32 %v78_v54, 0.0  ;;  %v80_v63 = vadd.f32 %v257_v4, %v60_v55  ;;  %v81_v0 = vadd.f32 %v257_v4, %v61_v56  ;;  %v64_v2 = vmul.f32 %v252_v1, %v168_v57 }
  0x10   :  { %v95_v3 = vmax.f32 %v79_v58, 0.0  ;;  %v82_v5 = vadd.f32 %v257_v4, %v62_v59  ;;  %v83_v6 = vadd.f32 %v257_v4, %v63_v60  ;;  %v65_v7 = vmul.f32 %v252_v1, %v169_v61 }
  0x11   :  { %v96_v8 = vmax.f32 %v80_v63, 0.0  ;;  %v97_v9 = vmax.f32 %v81_v0, 0.0  ;;  %v84_v10 = vadd.f32 %v257_v4, %v64_v2 }
  0x12   :  { %v193_v11 = vpack.c.bf16 %v95_v3, %v94_v62  ;;  %v98_v12 = vmax.f32 %v82_v5, 0.0  ;;  %v99_v13 = vmax.f32 %v83_v6, 0.0  ;;  %v85_v14 = vadd.f32 %v257_v4, %v65_v7 }
  0x13   :  { %v198_v15 = vpack.c.bf16 %v97_v9, %v96_v8  ;;  %v100_v16 = vmax.f32 %v84_v10, 0.0 }
  0x14   :  { %220 = vst [vmem:[%s339_s3 + $0x20] sm:$0xff] %v193_v11   ;;  %v203_v17 = vpack.c.bf16 %v99_v13, %v98_v12  ;;  %v101_v18 = vmax.f32 %v85_v14, 0.0 }
  0x15   :  { %221 = vst [vmem:[%s339_s3 + $0x28] sm:$0xff] %v198_v15  }
  0x16   :  { %222 = vst [vmem:[%s339_s3 + $0x30] sm:$0xff] %v203_v17   ;;  %v208_v1 = vpack.c.bf16 %v101_v18, %v100_v16 }
  0x18   :  { %223 = vst [vmem:[%s339_s3 + $0x38] sm:$0xff] %v208_v1  }

// kernel: network_block_forward.10
= control target key start
LH: loop header
LB: loop body
LE: loop exit
PB: predicated region body
PF: predicated region fallthrough
CT: control target
= control target key end

     0   :  { %s2519_s18 = smov 0   ;;  %s2521_s19 = smov 0   ;;  %s2872_s0 = inlined_call_operand.vmem [shape: bf16[2,80,128], index: 0, kind: input, shape index: {}]   ;;  %s2873_s1 = inlined_call_operand.vmem [shape: bf16[2,80,128], index: 1, kind: input, shape index: {}]   ;;  %s2874_s2 = inlined_call_operand.vmem [shape: bf16[2,80,128], index: 2, kind: input, shape index: {}]   ;;  %s2875_s3 = inlined_call_operand.vmem [shape: bf16[9,128,128], index: 3, kind: input, shape index: {}]   ;;  %s2876_s4 = inlined_call_operand.vmem [shape: bf16[2,64,128], index: 4, kind: input, shape index: {}]   ;;  %s2877_s5 = inlined_call_operand.vmem [shape: bf16[2,64,128], index: 5, kind: output, shape index: {}]  }
   0x1   :  { %s2523_s20 = smov 0  }
   0x2 LB: > { %s27_s21 = sadd.s32 1, %s2483_s19  ;;  %p1702_p0 = scmp.ge.s32.totalorder %s2487_s20, 1  ;;  %s2487_s20 = sphi %s2523_s20, %s15_s20   ;;  %s2483_s19 = sphi %s2521_s19, %s2879_s19   ;;  %s2479_s18 = sphi %s2519_s18, %s2878_s18  }
   0x3   : > { %p29_p1 = scmp.ge.s32.totalorder %s27_s21, 2  ;;  %p245_p2 = scmp.lt.s32.totalorder %s2487_s20, 3 }
   0x5   : > { %s2881_s21 = smov (%p29_p1, %s27_s21), 0  ;;  %p246_p3 = pnand %p1702_p0, %p245_p2 }
   0x6   : > { %p298_p4 = scmp.lt.s32.totalorder (!%p246_p3), %s2479_s18, 1 }
   0x7   : > { %249 = sbr.rel (%p246_p3) target bundleno = 335 (0x14f), region = 40 }
   0xc   : > { %v2297_v0 = vld [vmem:[%s2875_s3 + $0x78] sm:$0xff]  ;;  %v2296_v2 = vld [vmem:[%s2875_s3 + $0x70] sm:$0xff]  ;;  %v2295_v6 = vld [vmem:[%s2875_s3 + $0x68] sm:$0xff]  ;;  %s2883_s18 = smov (!%p298_p4, %s2479_s18), 1 }
   0xd   : > { %v2309_v1 = vld [vmem:[%s2875_s3 + $0xb8] sm:$0xff]  ;;  %2424 = vmatpush.bf16.msra.mxu1 %v2297_v0  ;;  %454 = vmatpush.bf16.msra.mxu0 %v2297_v0  ;;  %v2308_v3 = vld [vmem:[%s2875_s3 + $0xb0] sm:$0xff]  ;;  %v2307_v7 = vld [vmem:[%s2875_s3 + $0xa8] sm:$0xff]  ;;  %s2440_s14 = smul.u32 40, %s2883_s18 }
   0xe   : > { %681 = vmatpush.bf16.msra.mxu2 %v2309_v1  ;;  %v2321_v4 = vld [vmem:[%s2875_s3 + $0xf8] sm:$0xff]  ;;  %v2320_v5 = vld [vmem:[%s2875_s3 + $0xf0] sm:$0xff]  ;;  %v2319_v8 = vld [vmem:[%s2875_s3 + $0xe8] sm:$0xff] }
   0xf   : > { %815 = vmatpush.bf16.msra.mxu3 %v2321_v4  ;;  %v2294_v9 = vld [vmem:[%s2875_s3 + $0x60] sm:$0xff]  ;;  %v2293_v12 = vld [vmem:[%s2875_s3 + $0x58] sm:$0xff]  ;;  %v2292_v15 = vld [vmem:[%s2875_s3 + $0x50] sm:$0xff]  ;;  %s2613_s27 = scalar_lea.vmem %s2873_s1, %s2440_s14  ;;  %s2624_s9 = scalar_lea.vmem %s2874_s2, %s2440_s14 }
  0x10   : > { %v2306_v10 = vld [vmem:[%s2875_s3 + $0xa0] sm:$0xff]  ;;  %v2305_v13 = vld [vmem:[%s2875_s3 + $0x98] sm:$0xff]  ;;  %v2304_v16 = vld [vmem:[%s2875_s3 + $0x90] sm:$0xff]  ;;  %s2641_s23 = scalar_lea.vmem %s2872_s0, %s2440_s14 }
  0x11   : > { %2425 = vmatpush.bf16.msra.mxu1 %v2296_v2  ;;  %455 = vmatpush.bf16.msra.mxu0 %v2296_v2  ;;  %v2318_v11 = vld [vmem:[%s2875_s3 + $0xe0] sm:$0xff]  ;;  %v2317_v14 = vld [vmem:[%s2875_s3 + $0xd8] sm:$0xff]  ;;  %v2316_v17 = vld [vmem:[%s2875_s3 + $0xd0] sm:$0xff] }
  0x12   : > { %682 = vmatpush.bf16.msra.mxu2 %v2308_v3  ;;  %v2291_v18 = vld [vmem:[%s2875_s3 + $0x48] sm:$0xff]  ;;  %v2290_v21 = vld [vmem:[%s2875_s3 + $0x40] sm:$0xff]  ;;  %v2285_v22 = vld [vmem:[%s2875_s3 + $0x38] sm:$0xff] }
  0x13   : > { %816 = vmatpush.bf16.msra.mxu3 %v2320_v5  ;;  %v2303_v19 = vld [vmem:[%s2875_s3 + $0x88] sm:$0xff]  ;;  %v2302_v23 = vld [vmem:[%s2875_s3 + $0x80] sm:$0xff]  ;;  %v2333_v24 = vld [vmem:[%s2875_s3 + $0x138] sm:$0xff] }
  0x14   : > { %v2315_v20 = vld [vmem:[%s2875_s3 + $0xc8] sm:$0xff]  ;;  %v2357_v25 = vld [vmem:[%s2875_s3 + $0x1b8] sm:$0xff]  ;;  %v2288_v26 = vld [vmem:[%s2613_s27 + $0x10] sm:$0xff] }
  0x15   : > { %2426 = vmatpush.bf16.msra.mxu1 %v2295_v6  ;;  %456 = vmatpush.bf16.msra.mxu0 %v2295_v6  ;;  %v2286_v27 = vld [vmem:[%s2613_s27] sm:$0xff]  ;;  %v2284_v30 = vld [vmem:[%s2875_s3 + $0x30] sm:$0xff]  ;;  %v2369_v31 = vld [vmem:[%s2875_s3 + $0x1f8] sm:$0xff] }
  0x16   : > { %683 = vmatpush.bf16.msra.mxu2 %v2307_v7  ;;  %v2298_v28 = vld [vmem:[%s2624_s9] sm:$0xff]  ;;  %v2332_v32 = vld [vmem:[%s2875_s3 + $0x130] sm:$0xff]  ;;  %v2283_v35 = vld [vmem:[%s2875_s3 + $0x28] sm:$0xff] }
  0x17   : > { %817 = vmatpush.bf16.msra.mxu3 %v2319_v8  ;;  %v2314_v29 = vld [vmem:[%s2875_s3 + $0xc0] sm:$0xff]  ;;  %v2356_v33 = vld [vmem:[%s2875_s3 + $0x1b0] sm:$0xff]  ;;  %v2331_v37 = vld [vmem:[%s2875_s3 + $0x128] sm:$0xff] }
  0x18   : > { %v2310_v34 = vld [vmem:[%s2641_s23 + $0x4] sm:$0xff]  ;;  %v2368_v36 = vld [vmem:[%s2875_s3 + $0x1f0] sm:$0xff]  ;;  %v2281_v43 = vld [vmem:[%s2875_s3 + $0x18] sm:$0xff] }
  0x19   : > { %2427 = vmatpush.bf16.msra.mxu1 %v2294_v9  ;;  %457 = vmatpush.bf16.msra.mxu0 %v2294_v9  ;;  %v2355_v38 = vld [vmem:[%s2875_s3 + $0x1a8] sm:$0xff]  ;;  %v2282_v39 = vld [vmem:[%s2875_s3 + $0x20] sm:$0xff]  ;;  %v2329_v44 = vld [vmem:[%s2875_s3 + $0x118] sm:$0xff] }
  0x1a   : > { %684 = vmatpush.bf16.msra.mxu2 %v2306_v10  ;;  %v2367_v40 = vld [vmem:[%s2875_s3 + $0x1e8] sm:$0xff]  ;;  %v2330_v41 = vld [vmem:[%s2875_s3 + $0x120] sm:$0xff]  ;;  %v2289_v45 = vld [vmem:[%s2613_s27 + $0x18] sm:$0xff] }
  0x1b   : > { %818 = vmatpush.bf16.msra.mxu3 %v2318_v11  ;;  %v2354_v42 = vld [vmem:[%s2875_s3 + $0x1a0] sm:$0xff]  ;;  %v2287_v46 = vld [vmem:[%s2613_s27 + $0x8] sm:$0xff]  ;;  %v2280_v48 = vld [vmem:[%s2875_s3 + $0x10] sm:$0xff] }
  0x1c   : > { %v2299_v47 = vld [vmem:[%s2624_s9 + $0x8] sm:$0xff]  ;;  %v2328_v49 = vld [vmem:[%s2875_s3 + $0x110] sm:$0xff]  ;;  %v2353_v51 = vld [vmem:[%s2875_s3 + $0x198] sm:$0xff] }
  0x1d   : > { %2428 = vmatpush.bf16.msra.mxu1 %v2293_v12  ;;  %458 = vmatpush.bf16.msra.mxu0 %v2293_v12  ;;  %v2311_v50 = vld [vmem:[%s2641_s23 + $0xc] sm:$0xff]  ;;  %v2366_v52 = vld [vmem:[%s2875_s3 + $0x1e0] sm:$0xff]  ;;  %v2365_v56 = vld [vmem:[%s2875_s3 + $0x1d8] sm:$0xff] }
  0x1e   : > { %685 = vmatpush.bf16.msra.mxu2 %v2305_v13  ;;  %v2279_v53 = vld [vmem:[%s2875_s3 + $0x8] sm:$0xff]  ;;  %v2352_v54 = vld [vmem:[%s2875_s3 + $0x190] sm:$0xff]  ;;  %v2278_v57 = vld [vmem:[%s2875_s3] sm:$0xff] }
  0x1f   : > { %819 = vmatpush.bf16.msra.mxu3 %v2317_v14  ;;  %v2327_v55 = vld [vmem:[%s2875_s3 + $0x108] sm:$0xff]  ;;  %v2345_v58 = vld [vmem:[%s2875_s3 + $0x178] sm:$0xff]  ;;  %v2326_v59 = vld [vmem:[%s2875_s3 + $0x100] sm:$0xff] }
  0x20   : > { %v2381_v60 = vld [vmem:[%s2875_s3 + $0x238] sm:$0xff]  ;;  %v2344_v61 = vld [vmem:[%s2875_s3 + $0x170] sm:$0xff]  ;;  %v2274_v62 = vld [vmem:[%s2641_s23] sm:$0xff] }
  0x21   : > { %2429 = vmatpush.bf16.msra.mxu1 %v2292_v15  ;;  %459 = vmatpush.bf16.msra.mxu0 %v2292_v15  ;;  %v2322_v63 = vld [vmem:[%s2613_s27 + $0x4] sm:$0xff]  ;;  %v2300_v0 = vld [vmem:[%s2624_s9 + $0x10] sm:$0xff]  ;;  %v2341_v11 = vld [vmem:[%s2875_s3 + $0x158] sm:$0xff] }
  0x22   : > { %686 = vmatpush.bf16.msra.mxu2 %v2304_v16  ;;  %v2380_v1 = vld [vmem:[%s2875_s3 + $0x230] sm:$0xff]  ;;  %v2343_v2 = vld [vmem:[%s2875_s3 + $0x168] sm:$0xff]  ;;  %v2350_v7 = vld [vmem:[%s2875_s3 + $0x180] sm:$0xff] }
  0x23   : > { %820 = vmatpush.bf16.msra.mxu3 %v2316_v17  ;;  %v2351_v3 = vld [vmem:[%s2875_s3 + $0x188] sm:$0xff]  ;;  %v2312_v4 = vld [vmem:[%s2641_s23 + $0x14] sm:$0xff]  ;;  %v2342_v8 = vld [vmem:[%s2875_s3 + $0x160] sm:$0xff] }
  0x24   : > { %v2364_v5 = vld [vmem:[%s2875_s3 + $0x1d0] sm:$0xff]  ;;  %v2379_v6 = vld [vmem:[%s2875_s3 + $0x228] sm:$0xff]  ;;  %v2378_v10 = vld [vmem:[%s2875_s3 + $0x220] sm:$0xff] }
  0x25   : > { %2430 = vmatpush.bf16.msra.mxu1 %v2291_v18  ;;  %460 = vmatpush.bf16.msra.mxu0 %v2291_v18  ;;  %v2363_v9 = vld [vmem:[%s2875_s3 + $0x1c8] sm:$0xff]  ;;  %v2340_v12 = vld [vmem:[%s2875_s3 + $0x150] sm:$0xff]  ;;  %v2301_v15 = vld [vmem:[%s2624_s9 + $0x18] sm:$0xff] }
  0x26   : > { %687 = vmatpush.bf16.msra.mxu2 %v2303_v19  ;;  %v2275_v13 = vld [vmem:[%s2641_s23 + $0x8] sm:$0xff]  ;;  %v2313_v16 = vld [vmem:[%s2641_s23 + $0x1c] sm:$0xff] }
  0x27   : > { %821 = vmatpush.bf16.msra.mxu3 %v2315_v20  ;;  %v2323_v14 = vld [vmem:[%s2613_s27 + $0xc] sm:$0xff]  ;;  %v2362_v18 = vld [vmem:[%s2875_s3 + $0x1c0] sm:$0xff]  ;;  %v2377_v19 = vld [vmem:[%s2875_s3 + $0x218] sm:$0xff] }
  0x28   : > { %v2339_v17 = vld [vmem:[%s2875_s3 + $0x148] sm:$0xff]  ;;  %v2338_v20 = vld [vmem:[%s2875_s3 + $0x140] sm:$0xff] }
  0x29   : > { %2431 = vmatpush.bf16.msra.mxu1 %v2290_v21  ;;  %461 = vmatpush.bf16.msra.mxu0 %v2290_v21  ;;  %v2376_v21 = vld [vmem:[%s2875_s3 + $0x210] sm:$0xff] }
  0x2a   : > { %688 = vmatpush.bf16.msra.mxu2 %v2302_v23  ;;  %v2276_v23 = vld [vmem:[%s2641_s23 + $0x10] sm:$0xff] }
  0x2b   : > { %822 = vmatpush.bf16.msra.mxu3 %v2314_v29  ;;  %v2325_v29 = vld [vmem:[%s2613_s27 + $0x1c] sm:$0xff] }
  0x2c   : > { %472 = vmatmul.bf16.vlgmr.msra.gmra.mxu1 %v2288_v26  ;;  %462 = vmatmul.bf16.vlgmr.msra.gmra.mxu0 %v2286_v27  ;;  %v2358_v26 = vld [vmem:[%s2613_s27 + $0x8] sm:$0xff]  ;;  %v2374_v27 = vld [vmem:[%s2875_s3 + $0x200] sm:$0xff] }
  0x2d   : > { %555 = vmatpush.bf16.msrb.mxu1 %v2285_v22  ;;  %949 = vmatpush.bf16.msrb.mxu0 %v2333_v24  ;;  %v2375_v22 = vld [vmem:[%s2875_s3 + $0x208] sm:$0xff]  ;;  %v2324_v24 = vld [vmem:[%s2613_s27 + $0x14] sm:$0xff] }
  0x2e   : > { %1217 = vmatpush.bf16.msrb.mxu2 %v2357_v25  ;;  %823 = vmatmul.bf16.vlgmr.msra.gmra.mxu3 %v2310_v34  ;;  %v2346_v25 = vld [vmem:[%s2641_s23 + $0x8] sm:$0xff]  ;;  %v2348_v34 = vld [vmem:[%s2641_s23 + $0x18] sm:$0xff] }
  0x2f   : > { %689 = vmatmul.bf16.vlgmr.msra.gmra.mxu2 %v2298_v28  ;;  %1351 = vmatpush.bf16.msrb.mxu3 %v2369_v31  ;;  %v2277_v28 = vld [vmem:[%s2641_s23 + $0x18] sm:$0xff]  ;;  %v2359_v31 = vld [vmem:[%s2613_s27 + $0x10] sm:$0xff] }
  0x31   : > { %556 = vmatpush.bf16.msrb.mxu1 %v2284_v30  ;;  %950 = vmatpush.bf16.msrb.mxu0 %v2332_v32  ;;  %v2347_v30 = vld [vmem:[%s2641_s23 + $0x10] sm:$0xff]  ;;  %v2334_v32 = vld [vmem:[%s2624_s9 + $0x4] sm:$0xff] }
  0x32   : > { %1218 = vmatpush.bf16.msrb.mxu2 %v2356_v33  ;;  %v2370_v33 = vld [vmem:[%s2624_s9 + $0x8] sm:$0xff] }
  0x33   : > { %1352 = vmatpush.bf16.msrb.mxu3 %v2368_v36  ;;  %v2335_v36 = vld [vmem:[%s2624_s9 + $0xc] sm:$0xff] }
  0x35   : > { %557 = vmatpush.bf16.msrb.mxu1 %v2283_v35  ;;  %951 = vmatpush.bf16.msrb.mxu0 %v2331_v37  ;;  %v2360_v35 = vld [vmem:[%s2613_s27 + $0x18] sm:$0xff]  ;;  %v2371_v37 = vld [vmem:[%s2624_s9 + $0x10] sm:$0xff] }
  0x36   : > { %1219 = vmatpush.bf16.msrb.mxu2 %v2355_v38  ;;  %v2349_v38 = vld [vmem:[%s2641_s23 + $0x20] sm:$0xff] }
  0x37   : > { %1353 = vmatpush.bf16.msrb.mxu3 %v2367_v40  ;;  %v2336_v40 = vld [vmem:[%s2624_s9 + $0x14] sm:$0xff] }
  0x39   : > { %558 = vmatpush.bf16.msrb.mxu1 %v2282_v39  ;;  %952 = vmatpush.bf16.msrb.mxu0 %v2330_v41  ;;  %v2361_v39 = vld [vmem:[%s2613_s27 + $0x20] sm:$0xff]  ;;  %v2372_v41 = vld [vmem:[%s2624_s9 + $0x18] sm:$0xff]  ;;  %s2272_s27 = sshll.u32 %s2883_s18, 5 }
  0x3a   : > { %1220 = vmatpush.bf16.msrb.mxu2 %v2354_v42  ;;  %s2838_s24 = scalar_lea.vmem %s2876_s4, %s2272_s27  ;;  %s2844_s26 = scalar_lea.vmem %s2877_s5, %s2272_s27 }
  0x3b   : > { %1354 = vmatpush.bf16.msrb.mxu3 %v2366_v52 }
  0x3c   : > { %477 = vmatmul.bf16.gmra.mxu1 %v2289_v45  ;;  %467 = vmatmul.bf16.gmra.mxu0 %v2287_v46 }
  0x3d   : > { %559 = vmatpush.bf16.msrb.mxu1 %v2281_v43  ;;  %953 = vmatpush.bf16.msrb.mxu0 %v2329_v44  ;;  %v2373_v44 = vld [vmem:[%s2624_s9 + $0x20] sm:$0xff] }
  0x3e   : > { %1221 = vmatpush.bf16.msrb.mxu2 %v2353_v51  ;;  %828 = vmatmul.bf16.gmra.mxu3 %v2311_v50 }
  0x3f   : > { %694 = vmatmul.bf16.gmra.mxu2 %v2299_v47  ;;  %1355 = vmatpush.bf16.msrb.mxu3 %v2365_v56 }
  0x41   : > { %560 = vmatpush.bf16.msrb.mxu1 %v2280_v48  ;;  %954 = vmatpush.bf16.msrb.mxu0 %v2328_v49  ;;  %v2337_v49 = vld [vmem:[%s2624_s9 + $0x1c] sm:$0xff] }
  0x42   : > { %1222 = vmatpush.bf16.msrb.mxu2 %v2352_v54 }
  0x43   : > { %1356 = vmatpush.bf16.msrb.mxu3 %v2364_v5 }
  0x45   : > { %561 = vmatpush.bf16.msrb.mxu1 %v2279_v53  ;;  %955 = vmatpush.bf16.msrb.mxu0 %v2327_v55 }
  0x46   : > { %1223 = vmatpush.bf16.msrb.mxu2 %v2351_v3 }
  0x47   : > { %1357 = vmatpush.bf16.msrb.mxu3 %v2363_v9 }
  0x49   : > { %562 = vmatpush.bf16.msrb.mxu1 %v2278_v57  ;;  %956 = vmatpush.bf16.msrb.mxu0 %v2326_v59 }
  0x4a   : > { %1224 = vmatpush.bf16.msrb.mxu2 %v2350_v7 }
  0x4b   : > { %1358 = vmatpush.bf16.msrb.mxu3 %v2362_v18 }
  0x4c   : > { %563 = vmatmul.bf16.vlgmr.msrb.gmra.mxu1 %v2274_v62  ;;  %957 = vmatmul.bf16.vlgmr.msrb.gmra.mxu0 %v2322_v63 }
  0x4d   : > { %1083 = vmatpush.bf16.msra.mxu1 %v2345_v58  ;;  %1485 = vmatpush.bf16.msra.mxu0 %v2381_v60 }
  0x4e   : > { %833 = vmatmul.bf16.gmra.mxu3 %v2312_v4  ;;  %2432 = vmatpush.bf16.msra.mxu2 %v2381_v60 }
  0x4f   : > { %699 = vmatmul.bf16.gmra.mxu2 %v2300_v0 }
  0x51   : > { %1084 = vmatpush.bf16.msra.mxu1 %v2344_v61  ;;  %1486 = vmatpush.bf16.msra.mxu0 %v2380_v1 }
  0x52   : > { %2433 = vmatpush.bf16.msra.mxu2 %v2380_v1 }
  0x55   : > { %1085 = vmatpush.bf16.msra.mxu1 %v2343_v2  ;;  %1487 = vmatpush.bf16.msra.mxu0 %v2379_v6 }
  0x56   : > { %2434 = vmatpush.bf16.msra.mxu2 %v2379_v6 }
  0x59   : > { %1086 = vmatpush.bf16.msra.mxu1 %v2342_v8  ;;  %1488 = vmatpush.bf16.msra.mxu0 %v2378_v10 }
  0x5a   : > { %2435 = vmatpush.bf16.msra.mxu2 %v2378_v10 }
  0x5c   : > { %568 = vmatmul.bf16.gmra.mxu1 %v2275_v13  ;;  %962 = vmatmul.bf16.gmra.mxu0 %v2323_v14 }
  0x5d   : > { %1087 = vmatpush.bf16.msra.mxu1 %v2341_v11  ;;  %1489 = vmatpush.bf16.msra.mxu0 %v2377_v19 }
  0x5e   : > { %838 = vmatmul.bf16.gmra.mxu3 %v2313_v16  ;;  %2436 = vmatpush.bf16.msra.mxu2 %v2377_v19 }
  0x5f   : > { %704 = vmatmul.bf16.gmra.mxu2 %v2301_v15 }
  0x61   : > { %1088 = vmatpush.bf16.msra.mxu1 %v2340_v12  ;;  %1490 = vmatpush.bf16.msra.mxu0 %v2376_v21 }
  0x62   : > { %2437 = vmatpush.bf16.msra.mxu2 %v2376_v21 }
  0x65   : > { %1089 = vmatpush.bf16.msra.mxu1 %v2339_v17  ;;  %1491 = vmatpush.bf16.msra.mxu0 %v2375_v22 }
  0x66   : > { %2438 = vmatpush.bf16.msra.mxu2 %v2375_v22 }
  0x69   : > { %1090 = vmatpush.bf16.msra.mxu1 %v2338_v20  ;;  %1492 = vmatpush.bf16.msra.mxu0 %v2374_v27 }
  0x6a   : > { %2439 = vmatpush.bf16.msra.mxu2 %v2374_v27 }
  0x6c   : > { %573 = vmatmul.bf16.gmra.mxu1 %v2276_v23  ;;  %967 = vmatmul.bf16.gmra.mxu0 %v2324_v24 }
  0x6e   : > { %1359 = vmatmul.bf16.vlgmr.msrb.gmra.mxu3 %v2358_v26 }
  0x6f   : > { %1225 = vmatmul.bf16.vlgmr.msrb.gmra.mxu2 %v2346_v25 }
  0x7c   : > { %578 = vmatmul.bf16.gmra.mxu1 %v2277_v28  ;;  %972 = vmatmul.bf16.gmra.mxu0 %v2325_v29 }
  0x7e   : > { %1364 = vmatmul.bf16.gmra.mxu3 %v2359_v31 }
  0x7f   : > { %1230 = vmatmul.bf16.gmra.mxu2 %v2347_v30 }
  0x8c   : > { %1091 = vmatmul.bf16.vlgmr.msra.gmra.mxu1 %v2334_v32  ;;  %1493 = vmatmul.bf16.vlgmr.msra.gmra.mxu0 %v2370_v33 }
  0x8e   : > { %1369 = vmatmul.bf16.gmra.mxu3 %v2360_v35 }
  0x8f   : > { %1235 = vmatmul.bf16.gmra.mxu2 %v2348_v34 }
  0x9c   : > { %1096 = vmatmul.bf16.gmra.mxu1 %v2335_v36  ;;  %1498 = vmatmul.bf16.gmra.mxu0 %v2371_v37 }
  0x9e   : > { %1374 = vmatmul.bf16.gmra.mxu3 %v2361_v39 }
  0x9f   : > { %1240 = vmatmul.bf16.gmra.mxu2 %v2349_v38 }
  0xa9   : > { %v473_v42 = vpop.f32.mrf.mxu1  ;;  %v463_v43 = vpop.f32.mrf.mxu0 }
  0xac   : > { %1101 = vmatmul.bf16.gmra.mxu1 %v2336_v40  ;;  %1503 = vmatmul.bf16.gmra.mxu0 %v2372_v41 }
  0xaf   : > { %1508 = vmatmul.bf16.vlgmr.msra.gmra.mxu2 %v2373_v44 }
  0xb1   : > { %v475_v46 = vpop.f32.mrf.mxu1  ;;  %v465_v47 = vpop.f32.mrf.mxu0 }
  0xb2   : > { %v690_v45 = vpop.f32.mrf.mxu2  ;;  %v824_v48 = vpop.f32.mrf.mxu3 }
  0xb9   : > { %v478_v51 = vpop.f32.mrf.mxu1  ;;  %v468_v52 = vpop.f32.mrf.mxu0 }
  0xba   : > { %v692_v50 = vpop.f32.mrf.mxu2  ;;  %v2811_v53 = vpop.f32.mrf.mxu3 }
  0xbc   : > { %1106 = vmatmul.bf16.gmra.mxu1 %v2337_v49 }
  0xc1   : > { %v480_v55 = vpop.f32.mrf.mxu1  ;;  %v470_v56 = vpop.f32.mrf.mxu0 }
  0xc2   : > { %v695_v54 = vpop.f32.mrf.mxu2  ;;  %v829_v57 = vpop.f32.mrf.mxu3 }
  0xc9   : > { %v564_v59 = vpop.f32.mrf.mxu1  ;;  %v958_v60 = vpop.f32.mrf.mxu0 }
  0xca   : > { %v697_v58 = vpop.f32.mrf.mxu2  ;;  %v565_v61 = vadd.f32 %v564_v59, %v463_v43  ;;  %v2813_v63 = vpop.f32.mrf.mxu3 }
  0xcc   : > { %v710_v62 = vadd.f32 %v690_v45, %v565_v61  ;;  %v2383_v61 = vld [vmem:[%s2838_s24] sm:$0xff]  }
  0xce   : > { %v844_v0 = vadd.f32 %v824_v48, %v710_v62 }
  0xd0   : > { %v978_v1 = vadd.f32 %v958_v60, %v844_v0 }
  0xd1   : > { %v566_v3 = vpop.f32.mrf.mxu1  ;;  %v960_v4 = vpop.f32.mrf.mxu0 }
  0xd2   : > { %v700_v2 = vpop.f32.mrf.mxu2  ;;  %v567_v5 = vadd.f32 %v566_v3, %v465_v47  ;;  %v834_v7 = vpop.f32.mrf.mxu3  ;;  %v2384_v3 = vunpack.c.l.bf16 %v2383_v61 }
  0xd4   : > { %v711_v6 = vadd.f32 %v692_v50, %v567_v5  ;;  %v2385_v5 = vunpack.c.h.bf16 %v2383_v61 }
  0xd9   : > { %v569_v9 = vpop.f32.mrf.mxu1  ;;  %v963_v10 = vpop.f32.mrf.mxu0 }
  0xda   : > { %v702_v8 = vpop.f32.mrf.mxu2  ;;  %v570_v11 = vadd.f32 %v569_v9, %v468_v52  ;;  %v2815_v16 = vpop.f32.mrf.mxu3 }
  0xdc   : > { %v712_v12 = vadd.f32 %v695_v54, %v570_v11 }
  0xde   : > { %v846_v13 = vadd.f32 %v829_v57, %v712_v12 }
  0xe0   : > { %v980_v14 = vadd.f32 %v963_v10, %v846_v13 }
  0xe1   : > { %v571_v17 = vpop.f32.mrf.mxu1  ;;  %v2817_v18 = vpop.f32.mrf.mxu0 }
  0xe2   : > { %v705_v15 = vpop.f32.mrf.mxu2  ;;  %v572_v19 = vadd.f32 %v571_v17, %v470_v56  ;;  %v839_v25 = vpop.f32.mrf.mxu3 }
  0xe4   : > { %v713_v20 = vadd.f32 %v697_v58, %v572_v19 }
  0xe6   : > { %v847_v11 = vadd.f32 %v2813_v63, %v713_v20 }
  0xe8   : > { %v981_v19 = vadd.f32 %v2817_v18, %v847_v11 }
  0xe9   : > { %v574_v22 = vpop.f32.mrf.mxu1  ;;  %v968_v23 = vpop.f32.mrf.mxu0 }
  0xea   : > { %v707_v21 = vpop.f32.mrf.mxu2  ;;  %v575_v24 = vadd.f32 %v574_v22, %v473_v42  ;;  %v2825_v34 = vpop.f32.mrf.mxu3 }
  0xec   : > { %v714_v26 = vadd.f32 %v700_v2, %v575_v24 }
  0xee   : > { %v848_v27 = vadd.f32 %v834_v7, %v714_v26 }
  0xf0   : > { %v2819_v28 = vadd.f32 %v968_v23, %v848_v27 }
  0xf1   : > { %v576_v30 = vpop.f32.mrf.mxu1  ;;  %v2821_v31 = vpop.f32.mrf.mxu0 }
  0xf2   : > { %v1226_v29 = vpop.f32.mrf.mxu2  ;;  %v577_v32 = vadd.f32 %v576_v30, %v475_v46  ;;  %v1360_v41 = vpop.f32.mrf.mxu3 }
  0xf4   : > { %v2823_v33 = vadd.f32 %v702_v8, %v577_v32 }
  0xf9   : > { %v579_v36 = vpop.f32.mrf.mxu1  ;;  %v973_v37 = vpop.f32.mrf.mxu0 }
  0xfa   : > { %v1228_v35 = vpop.f32.mrf.mxu2  ;;  %v580_v38 = vadd.f32 %v579_v36, %v478_v51  ;;  %v1362_v48 = vpop.f32.mrf.mxu3  ;;  %v845_v51 = vadd.f32 %v2811_v53, %v711_v6 }
  0xfc   : > { %v716_v39 = vadd.f32 %v705_v15, %v580_v38  ;;  %v979_v57 = vadd.f32 %v960_v4, %v845_v51 }
  0xfe   : > { %v850_v40 = vadd.f32 %v839_v25, %v716_v39  ;;  %v849_v39 = vadd.f32 %v2815_v16, %v2823_v33 }
 0x100   : > { %v2827_v42 = vadd.f32 %v973_v37, %v850_v40 }
 0x101   : > { %v581_v44 = vpop.f32.mrf.mxu1  ;;  %v2829_v45 = vpop.f32.mrf.mxu0 }
 0x102   : > { %v1231_v43 = vpop.f32.mrf.mxu2  ;;  %v582_v47 = vadd.f32 %v581_v44, %v480_v55  ;;  %v1365_v62 = vpop.f32.mrf.mxu3 }
 0x104   : > { %v2831_v46 = vadd.f32 %v707_v21, %v582_v47 }
 0x106   : > { %v851_v61 = vadd.f32 %v2825_v34, %v2831_v46 }
 0x109   : > { %v1092_v49 = vpop.f32.mrf.mxu1  ;;  %v1494_v50 = vpop.f32.mrf.mxu0 }
 0x10a   : > { %v1112_v52 = vadd.f32 %v1092_v49, %v978_v1  ;;  %v1233_v54 = vpop.f32.mrf.mxu2  ;;  %v1367_v13 = vpop.f32.mrf.mxu3 }
 0x10c   : > { %v1246_v56 = vadd.f32 %v1226_v29, %v1112_v52  ;;  %v2419_v52 = vld [vmem:[%s2838_s24 + $0x10] sm:$0xff]  }
 0x10e   : > { %v1380_v59 = vadd.f32 %v1360_v41, %v1246_v56 }
 0x110   : > { %v1514_v2 = vadd.f32 %v1494_v50, %v1380_v59 }
 0x111   : > { %v1094_v58 = vpop.f32.mrf.mxu1  ;;  %v1496_v55 = vpop.f32.mrf.mxu0 }
 0x112   : > { %v1113_v60 = vadd.f32 %v1094_v58, %v979_v57  ;;  %v1236_v1 = vpop.f32.mrf.mxu2  ;;  %v1538_v8 = vadd.f32 %v2384_v3, %v1514_v2  ;;  %v1370_v32 = vpop.f32.mrf.mxu3  ;;  %v2393_v58 = vunpack.c.h.bf16 %v2419_v52  ;;  %v985_v2 = vadd.f32 %v2829_v45, %v851_v61 }
 0x114   : > { %v1247_v0 = vadd.f32 %v1228_v35, %v1113_v60 }
 0x116   : > { %v1381_v53 = vadd.f32 %v1362_v48, %v1247_v0 }
 0x118   : > { %v1515_v6 = vadd.f32 %v1496_v55, %v1381_v53 }
 0x119   : > { %v1097_v4 = vpop.f32.mrf.mxu1  ;;  %v1499_v7 = vpop.f32.mrf.mxu0 }
 0x11a   : > { %v1539_v9 = vadd.f32 %v2385_v5, %v1515_v6  ;;  %v1114_v10 = vadd.f32 %v1097_v4, %v980_v14  ;;  %v1238_v17 = vpop.f32.mrf.mxu2  ;;  %v2418_v14 = vld [vmem:[%s2838_s24 + $0x8] sm:$0xff]   ;;  %v1372_v44 = vpop.f32.mrf.mxu3  ;;  %v2420_v6 = vld [vmem:[%s2838_s24 + $0x18] sm:$0xff]  }
 0x11b   : > { %v2388_v27 = vunpack.c.l.bf16 %v2418_v14  ;;  %v2389_v30 = vunpack.c.h.bf16 %v2418_v14 }
 0x11c   : > { %v2401_v12 = vpack.c.bf16 %v1539_v9, %v1538_v8  ;;  %v1248_v15 = vadd.f32 %v1231_v43, %v1114_v10  ;;  %v983_v43 = vadd.f32 %v2821_v31, %v849_v39  ;;  %v2396_v9 = vunpack.c.l.bf16 %v2420_v6 }
 0x11d   : > { %v2397_v10 = vunpack.c.h.bf16 %v2420_v6 }
 0x11e   : > { %2402 = vst [vmem:[%s2844_s26] sm:$0xff] %v2401_v12   ;;  %v1382_v23 = vadd.f32 %v1365_v62, %v1248_v15 }
 0x120   : > { %v1516_v26 = vadd.f32 %v1499_v7, %v1382_v23 }
 0x121   : > { %v1099_v21 = vpop.f32.mrf.mxu1  ;;  %v1501_v22 = vpop.f32.mrf.mxu0 }
 0x122   : > { %v1115_v24 = vadd.f32 %v1099_v21, %v981_v19  ;;  %v1241_v20 = vpop.f32.mrf.mxu2  ;;  %v1540_v36 = vadd.f32 %v2388_v27, %v1516_v26  ;;  %v1375_v60 = vpop.f32.mrf.mxu3 }
 0x124   : > { %v1249_v25 = vadd.f32 %v1233_v54, %v1115_v24 }
 0x126   : > { %v1383_v29 = vadd.f32 %v1367_v13, %v1249_v25 }
 0x128   : > { %v1517_v63 = vadd.f32 %v1501_v22, %v1383_v29 }
 0x129   : > { %v1102_v35 = vpop.f32.mrf.mxu1  ;;  %v1504_v38 = vpop.f32.mrf.mxu0 }
 0x12a   : > { %v1541_v37 = vadd.f32 %v2389_v30, %v1517_v63  ;;  %v1116_v18 = vadd.f32 %v1102_v35, %v2819_v28  ;;  %v1243_v50 = vpop.f32.mrf.mxu2  ;;  %v2392_v28 = vunpack.c.l.bf16 %v2419_v52  ;;  %v1377_v7 = vpop.f32.mrf.mxu3 }
 0x12c   : > { %v2406_v40 = vpack.c.bf16 %v1541_v37, %v1540_v36  ;;  %v1250_v41 = vadd.f32 %v1236_v1, %v1116_v18 }
 0x12e   : > { %2421 = vst [vmem:[%s2844_s26 + $0x8] sm:$0xff] %v2406_v40   ;;  %v1384_v48 = vadd.f32 %v1370_v32, %v1250_v41 }
 0x130   : > { %v1518_v56 = vadd.f32 %v1504_v38, %v1384_v48 }
 0x131   : > { %v1104_v47 = vpop.f32.mrf.mxu1  ;;  %v1506_v51 = vpop.f32.mrf.mxu0 }
 0x132   : > { %v1117_v49 = vadd.f32 %v1104_v47, %v983_v43  ;;  %v1542_v55 = vadd.f32 %v2392_v28, %v1518_v56  ;;  %v1509_v0 = vpop.f32.mrf.mxu2 }
 0x134   : > { %v1251_v54 = vadd.f32 %v1238_v17, %v1117_v49 }
 0x136   : > { %v1385_v57 = vadd.f32 %v1372_v44, %v1251_v54 }
 0x138   : > { %v1519_v16 = vadd.f32 %v1506_v51, %v1385_v57 }
 0x139   : > { %v1107_v33 = vpop.f32.mrf.mxu1 }
 0x13a   : > { %v1543_v59 = vadd.f32 %v2393_v58, %v1519_v16  ;;  %v1118_v31 = vadd.f32 %v1107_v33, %v2827_v42  ;;  %v1511_v11 = vpop.f32.mrf.mxu2 }
 0x13c   : > { %v2411_v62 = vpack.c.bf16 %v1543_v59, %v1542_v55  ;;  %v1252_v1 = vadd.f32 %v1241_v20, %v1118_v31 }
 0x13e   : > { %2422 = vst [vmem:[%s2844_s26 + $0x10] sm:$0xff] %v2411_v62   ;;  %v1386_v53 = vadd.f32 %v1375_v60, %v1252_v1 }
 0x140   : > { %v1520_v8 = vadd.f32 %v1509_v0, %v1386_v53 }
 0x141   : > { %v1109_v3 = vpop.f32.mrf.mxu1 }
 0x142   : > { %v1119_v5 = vadd.f32 %v1109_v3, %v985_v2  ;;  %v1544_v34 = vadd.f32 %v2396_v9, %v1520_v8 }
 0x144   : > { %v1253_v4 = vadd.f32 %v1243_v50, %v1119_v5 }
 0x146   : > { %v1387_v42 = vadd.f32 %v1377_v7, %v1253_v4 }
 0x148   : > { %v1521_v12 = vadd.f32 %v1511_v11, %v1387_v42 }
 0x14a   : > { %v1545_v46 = vadd.f32 %v2397_v10, %v1521_v12 }
 0x14c   : > { %v2416_v13 = vpack.c.bf16 %v1545_v46, %v1544_v34 }
 0x14e   : > { %2423 = vst [vmem:[%s2844_s26 + $0x18] sm:$0xff] %v2416_v13  }
 0x14f PF: > { %s15_s20 = sadd.s32 1, %s2487_s20   ;;  %s2878_s18 = smov %s2483_s19 }
 0x150   : > { %p12_p5 = scmp.ge.s32.totalorder %s15_s20, 4   ;;  %s2879_s19 = smov %s2881_s21 }
 0x152   :  { %14 = sbr.rel (!%p12_p5) target bundleno = 2 (0x2), region = 90 }

// kernel: network_block_forward.8
= control target key start
LH: loop header
LB: loop body
LE: loop exit
PB: predicated region body
PF: predicated region fallthrough
CT: control target
= control target key end

     0   :  { %s2739_s30 = smov 0   ;;  %s2741_s10 = smov 0   ;;  %s3126_s0 = inlined_call_operand.vmem [shape: bf16[2,72,128], index: 0, kind: input, shape index: {}]   ;;  %s3127_s1 = inlined_call_operand.vmem [shape: bf16[2,72,128], index: 1, kind: input, shape index: {}]   ;;  %s3128_s2 = inlined_call_operand.vmem [shape: bf16[2,72,128], index: 2, kind: input, shape index: {}]   ;;  %s3129_s3 = inlined_call_operand.vmem [shape: bf16[2,72,128], index: 3, kind: input, shape index: {}]   ;;  %s3130_s4 = inlined_call_operand.vmem [shape: bf16[2,72,128], index: 4, kind: input, shape index: {}]   ;;  %s3131_s5 = inlined_call_operand.vmem [shape: bf16[2,72,128], index: 5, kind: input, shape index: {}]   ;;  %s3132_s6 = inlined_call_operand.vmem [shape: bf16[9,128,128], index: 6, kind: input, shape index: {}]   ;;  %s3133_s7 = inlined_call_operand.vmem [shape: f32[1,128], index: 7, kind: input, shape index: {}]   ;;  %s3134_s8 = inlined_call_operand.vmem [shape: f32[1,128], index: 8, kind: input, shape index: {}]   ;;  %s3135_s9 = inlined_call_operand.vmem [shape: bf16[2,64,128], index: 9, kind: output, shape index: {}]  }
   0x1   :  { %s2743_s11 = smov 0  }
   0x2 LB: > { %s31_s12 = sadd.s32 1, %s2683_s10  ;;  %p1919_p0 = scmp.ge.s32.totalorder %s2687_s11, 1  ;;  %s2687_s11 = sphi %s2743_s11, %s19_s11   ;;  %s2683_s10 = sphi %s2741_s10, %s3137_s10   ;;  %s2679_s30 = sphi %s2739_s30, %s3136_s30  }
   0x3   : > { %p33_p1 = scmp.ge.s32.totalorder %s31_s12, 2  ;;  %p376_p2 = scmp.lt.s32.totalorder %s2687_s11, 3 }
   0x5   : > { %s3139_s12 = smov (%p33_p1, %s31_s12), 0  ;;  %p377_p3 = pnand %p1919_p0, %p376_p2 }
   0x6   : > { %p450_p4 = scmp.lt.s32.totalorder (!%p377_p3), %s2679_s30, 1 }
   0x7   : > { %380 = sbr.rel (%p377_p3) target bundleno = 339 (0x153), region = 56 }
   0xc   : > { %v2514_v0 = vld [vmem:[%s3132_s6 + $0x78] sm:$0xff]  ;;  %v2513_v2 = vld [vmem:[%s3132_s6 + $0x70] sm:$0xff]  ;;  %v2512_v6 = vld [vmem:[%s3132_s6 + $0x68] sm:$0xff]  ;;  %s3141_s30 = smov (!%p450_p4, %s2679_s30), 1 }
   0xd   : > { %v2526_v1 = vld [vmem:[%s3132_s6 + $0xb8] sm:$0xff]  ;;  %2622 = vmatpush.bf16.msra.mxu1 %v2514_v0  ;;  %619 = vmatpush.bf16.msra.mxu0 %v2514_v0  ;;  %v2525_v3 = vld [vmem:[%s3132_s6 + $0xb0] sm:$0xff]  ;;  %v2524_v7 = vld [vmem:[%s3132_s6 + $0xa8] sm:$0xff]  ;;  %s2821_s17 = smul.u32 36, %s3141_s30 }
   0xe   : > { %846 = vmatpush.bf16.msra.mxu2 %v2526_v1  ;;  %v2538_v4 = vld [vmem:[%s3132_s6 + $0xf8] sm:$0xff]  ;;  %v2537_v5 = vld [vmem:[%s3132_s6 + $0xf0] sm:$0xff]  ;;  %v2536_v8 = vld [vmem:[%s3132_s6 + $0xe8] sm:$0xff] }
   0xf   : > { %980 = vmatpush.bf16.msra.mxu3 %v2538_v4  ;;  %v2511_v9 = vld [vmem:[%s3132_s6 + $0x60] sm:$0xff]  ;;  %v2510_v12 = vld [vmem:[%s3132_s6 + $0x58] sm:$0xff]  ;;  %v2509_v15 = vld [vmem:[%s3132_s6 + $0x50] sm:$0xff]  ;;  %s2836_s26 = scalar_lea.vmem %s3127_s1, %s2821_s17  ;;  %s2848_s16 = scalar_lea.vmem %s3128_s2, %s2821_s17 }
  0x10   : > { %v2523_v10 = vld [vmem:[%s3132_s6 + $0xa0] sm:$0xff]  ;;  %v2522_v13 = vld [vmem:[%s3132_s6 + $0x98] sm:$0xff]  ;;  %v2521_v16 = vld [vmem:[%s3132_s6 + $0x90] sm:$0xff]  ;;  %s2866_s27 = scalar_lea.vmem %s3129_s3, %s2821_s17  ;;  %s2955_s13 = scalar_lea.vmem %s3126_s0, %s2821_s17 }
  0x11   : > { %2623 = vmatpush.bf16.msra.mxu1 %v2513_v2  ;;  %620 = vmatpush.bf16.msra.mxu0 %v2513_v2  ;;  %v2535_v11 = vld [vmem:[%s3132_s6 + $0xe0] sm:$0xff]  ;;  %v2534_v14 = vld [vmem:[%s3132_s6 + $0xd8] sm:$0xff]  ;;  %v2533_v17 = vld [vmem:[%s3132_s6 + $0xd0] sm:$0xff]  ;;  %s2961_s18 = scalar_lea.vmem %s3130_s4, %s2821_s17  ;;  %s479_s25 = scalar_lea.vmem %s3131_s5, %s2821_s17 }
  0x12   : > { %847 = vmatpush.bf16.msra.mxu2 %v2525_v3  ;;  %v2508_v18 = vld [vmem:[%s3132_s6 + $0x48] sm:$0xff]  ;;  %v2507_v21 = vld [vmem:[%s3132_s6 + $0x40] sm:$0xff]  ;;  %v2502_v22 = vld [vmem:[%s3132_s6 + $0x38] sm:$0xff] }
  0x13   : > { %981 = vmatpush.bf16.msra.mxu3 %v2537_v5  ;;  %v2520_v19 = vld [vmem:[%s3132_s6 + $0x88] sm:$0xff]  ;;  %v2519_v23 = vld [vmem:[%s3132_s6 + $0x80] sm:$0xff]  ;;  %v2550_v24 = vld [vmem:[%s3132_s6 + $0x138] sm:$0xff] }
  0x14   : > { %v2532_v20 = vld [vmem:[%s3132_s6 + $0xc8] sm:$0xff]  ;;  %v2574_v25 = vld [vmem:[%s3132_s6 + $0x1b8] sm:$0xff]  ;;  %v2505_v26 = vld [vmem:[%s2836_s26 + $0x10] sm:$0xff] }
  0x15   : > { %2624 = vmatpush.bf16.msra.mxu1 %v2512_v6  ;;  %621 = vmatpush.bf16.msra.mxu0 %v2512_v6  ;;  %v2503_v27 = vld [vmem:[%s2836_s26] sm:$0xff]  ;;  %v2501_v30 = vld [vmem:[%s3132_s6 + $0x30] sm:$0xff]  ;;  %v2586_v31 = vld [vmem:[%s3132_s6 + $0x1f8] sm:$0xff] }
  0x16   : > { %848 = vmatpush.bf16.msra.mxu2 %v2524_v7  ;;  %v2515_v28 = vld [vmem:[%s2848_s16] sm:$0xff]  ;;  %v2549_v32 = vld [vmem:[%s3132_s6 + $0x130] sm:$0xff]  ;;  %v2500_v35 = vld [vmem:[%s3132_s6 + $0x28] sm:$0xff] }
  0x17   : > { %982 = vmatpush.bf16.msra.mxu3 %v2536_v8  ;;  %v2531_v29 = vld [vmem:[%s3132_s6 + $0xc0] sm:$0xff]  ;;  %v2573_v33 = vld [vmem:[%s3132_s6 + $0x1b0] sm:$0xff]  ;;  %v2548_v37 = vld [vmem:[%s3132_s6 + $0x128] sm:$0xff] }
  0x18   : > { %v2527_v34 = vld [vmem:[%s2866_s27] sm:$0xff]  ;;  %v2585_v36 = vld [vmem:[%s3132_s6 + $0x1f0] sm:$0xff]  ;;  %v2572_v38 = vld [vmem:[%s3132_s6 + $0x1a8] sm:$0xff] }
  0x19   : > { %2625 = vmatpush.bf16.msra.mxu1 %v2511_v9  ;;  %622 = vmatpush.bf16.msra.mxu0 %v2511_v9  ;;  %v2499_v39 = vld [vmem:[%s3132_s6 + $0x20] sm:$0xff]  ;;  %v2584_v40 = vld [vmem:[%s3132_s6 + $0x1e8] sm:$0xff]  ;;  %v2498_v43 = vld [vmem:[%s3132_s6 + $0x18] sm:$0xff] }
  0x1a   : > { %849 = vmatpush.bf16.msra.mxu2 %v2523_v10  ;;  %v2547_v41 = vld [vmem:[%s3132_s6 + $0x120] sm:$0xff]  ;;  %v2546_v44 = vld [vmem:[%s3132_s6 + $0x118] sm:$0xff]  ;;  %v2504_v46 = vld [vmem:[%s2836_s26 + $0x8] sm:$0xff] }
  0x1b   : > { %983 = vmatpush.bf16.msra.mxu3 %v2535_v11  ;;  %v2571_v42 = vld [vmem:[%s3132_s6 + $0x1a0] sm:$0xff]  ;;  %v2506_v45 = vld [vmem:[%s2836_s26 + $0x18] sm:$0xff]  ;;  %v2516_v47 = vld [vmem:[%s2848_s16 + $0x8] sm:$0xff] }
  0x1c   : > { %v2497_v48 = vld [vmem:[%s3132_s6 + $0x10] sm:$0xff]  ;;  %v2528_v50 = vld [vmem:[%s2866_s27 + $0x8] sm:$0xff]  ;;  %v2570_v51 = vld [vmem:[%s3132_s6 + $0x198] sm:$0xff] }
  0x1d   : > { %2626 = vmatpush.bf16.msra.mxu1 %v2510_v12  ;;  %623 = vmatpush.bf16.msra.mxu0 %v2510_v12  ;;  %v2545_v49 = vld [vmem:[%s3132_s6 + $0x110] sm:$0xff]  ;;  %v2583_v52 = vld [vmem:[%s3132_s6 + $0x1e0] sm:$0xff]  ;;  %v2496_v53 = vld [vmem:[%s3132_s6 + $0x8] sm:$0xff] }
  0x1e   : > { %850 = vmatpush.bf16.msra.mxu2 %v2522_v13  ;;  %v2569_v54 = vld [vmem:[%s3132_s6 + $0x190] sm:$0xff]  ;;  %v2544_v55 = vld [vmem:[%s3132_s6 + $0x108] sm:$0xff]  ;;  %v2582_v56 = vld [vmem:[%s3132_s6 + $0x1d8] sm:$0xff] }
  0x1f   : > { %984 = vmatpush.bf16.msra.mxu3 %v2534_v14  ;;  %v2495_v57 = vld [vmem:[%s3132_s6] sm:$0xff]  ;;  %v2562_v58 = vld [vmem:[%s3132_s6 + $0x178] sm:$0xff]  ;;  %v2561_v61 = vld [vmem:[%s3132_s6 + $0x170] sm:$0xff] }
  0x20   : > { %v2543_v59 = vld [vmem:[%s3132_s6 + $0x100] sm:$0xff]  ;;  %v2598_v60 = vld [vmem:[%s3132_s6 + $0x238] sm:$0xff]  ;;  %v2517_v0 = vld [vmem:[%s2848_s16 + $0x10] sm:$0xff] }
  0x21   : > { %2627 = vmatpush.bf16.msra.mxu1 %v2509_v15  ;;  %624 = vmatpush.bf16.msra.mxu0 %v2509_v15  ;;  %v2491_v62 = vld [vmem:[%s2955_s13] sm:$0xff]  ;;  %v2597_v1 = vld [vmem:[%s3132_s6 + $0x230] sm:$0xff]  ;;  %v2560_v2 = vld [vmem:[%s3132_s6 + $0x168] sm:$0xff] }
  0x22   : > { %851 = vmatpush.bf16.msra.mxu2 %v2521_v16  ;;  %v2539_v63 = vld [vmem:[%s2961_s18] sm:$0xff]  ;;  %v2568_v3 = vld [vmem:[%s3132_s6 + $0x188] sm:$0xff]  ;;  %v2529_v4 = vld [vmem:[%s2866_s27 + $0x10] sm:$0xff] }
  0x23   : > { %985 = vmatpush.bf16.msra.mxu3 %v2533_v17  ;;  %v2581_v5 = vld [vmem:[%s3132_s6 + $0x1d0] sm:$0xff]  ;;  %v2596_v6 = vld [vmem:[%s3132_s6 + $0x228] sm:$0xff]  ;;  %v2567_v7 = vld [vmem:[%s3132_s6 + $0x180] sm:$0xff] }
  0x24   : > { %v2559_v8 = vld [vmem:[%s3132_s6 + $0x160] sm:$0xff]  ;;  %v2580_v9 = vld [vmem:[%s3132_s6 + $0x1c8] sm:$0xff]  ;;  %v2558_v11 = vld [vmem:[%s3132_s6 + $0x158] sm:$0xff] }
  0x25   : > { %2628 = vmatpush.bf16.msra.mxu1 %v2508_v18  ;;  %625 = vmatpush.bf16.msra.mxu0 %v2508_v18  ;;  %v2595_v10 = vld [vmem:[%s3132_s6 + $0x220] sm:$0xff]  ;;  %v2557_v12 = vld [vmem:[%s3132_s6 + $0x150] sm:$0xff]  ;;  %v2492_v13 = vld [vmem:[%s2955_s13 + $0x8] sm:$0xff] }
  0x26   : > { %852 = vmatpush.bf16.msra.mxu2 %v2520_v19  ;;  %v2540_v14 = vld [vmem:[%s2961_s18 + $0x8] sm:$0xff]  ;;  %v2518_v15 = vld [vmem:[%s2848_s16 + $0x18] sm:$0xff]  ;;  %v2579_v18 = vld [vmem:[%s3132_s6 + $0x1c0] sm:$0xff] }
  0x27   : > { %986 = vmatpush.bf16.msra.mxu3 %v2532_v20  ;;  %v2530_v16 = vld [vmem:[%s2866_s27 + $0x18] sm:$0xff]  ;;  %v2556_v17 = vld [vmem:[%s3132_s6 + $0x148] sm:$0xff]  ;;  %v2555_v20 = vld [vmem:[%s3132_s6 + $0x140] sm:$0xff] }
  0x28   : > { %v2594_v19 = vld [vmem:[%s3132_s6 + $0x218] sm:$0xff] }
  0x29   : > { %2629 = vmatpush.bf16.msra.mxu1 %v2507_v21  ;;  %626 = vmatpush.bf16.msra.mxu0 %v2507_v21  ;;  %v2593_v21 = vld [vmem:[%s3132_s6 + $0x210] sm:$0xff] }
  0x2a   : > { %853 = vmatpush.bf16.msra.mxu2 %v2519_v23  ;;  %v2493_v23 = vld [vmem:[%s2955_s13 + $0x10] sm:$0xff] }
  0x2b   : > { %987 = vmatpush.bf16.msra.mxu3 %v2531_v29  ;;  %v2542_v29 = vld [vmem:[%s2961_s18 + $0x18] sm:$0xff] }
  0x2c   : > { %637 = vmatmul.bf16.vlgmr.msra.gmra.mxu1 %v2505_v26  ;;  %627 = vmatmul.bf16.vlgmr.msra.gmra.mxu0 %v2503_v27  ;;  %v2575_v26 = vld [vmem:[%s2836_s26 + $0x4] sm:$0xff] }
  0x2d   : > { %720 = vmatpush.bf16.msrb.mxu1 %v2502_v22  ;;  %1114 = vmatpush.bf16.msrb.mxu0 %v2550_v24  ;;  %v2592_v22 = vld [vmem:[%s3132_s6 + $0x208] sm:$0xff]  ;;  %v2541_v24 = vld [vmem:[%s2961_s18 + $0x10] sm:$0xff]  ;;  %v2591_v27 = vld [vmem:[%s3132_s6 + $0x200] sm:$0xff]  ;;  %s2490_s18 = sshll.u32 %s3141_s30, 5 }
  0x2e   : > { %1382 = vmatpush.bf16.msrb.mxu2 %v2574_v25  ;;  %988 = vmatmul.bf16.vlgmr.msra.gmra.mxu3 %v2527_v34  ;;  %v2563_v25 = vld [vmem:[%s2955_s13 + $0x4] sm:$0xff]  ;;  %v2565_v34 = vld [vmem:[%s2955_s13 + $0x14] sm:$0xff]  ;;  %s3090_s29 = scalar_lea.vmem %s3135_s9, %s2490_s18 }
  0x2f   : > { %854 = vmatmul.bf16.vlgmr.msra.gmra.mxu2 %v2515_v28  ;;  %1516 = vmatpush.bf16.msrb.mxu3 %v2586_v31  ;;  %v2494_v28 = vld [vmem:[%s2955_s13 + $0x18] sm:$0xff]  ;;  %v2576_v31 = vld [vmem:[%s2836_s26 + $0xc] sm:$0xff] }
  0x31   : > { %721 = vmatpush.bf16.msrb.mxu1 %v2501_v30  ;;  %1115 = vmatpush.bf16.msrb.mxu0 %v2549_v32  ;;  %v2564_v30 = vld [vmem:[%s2955_s13 + $0xc] sm:$0xff]  ;;  %v2551_v32 = vld [vmem:[%s479_s25] sm:$0xff] }
  0x32   : > { %1383 = vmatpush.bf16.msrb.mxu2 %v2573_v33  ;;  %v2587_v33 = vld [vmem:[%s2848_s16 + $0x4] sm:$0xff] }
  0x33   : > { %1517 = vmatpush.bf16.msrb.mxu3 %v2585_v36  ;;  %v2552_v36 = vld [vmem:[%s479_s25 + $0x8] sm:$0xff] }
  0x35   : > { %722 = vmatpush.bf16.msrb.mxu1 %v2500_v35  ;;  %1116 = vmatpush.bf16.msrb.mxu0 %v2548_v37  ;;  %v2577_v35 = vld [vmem:[%s2836_s26 + $0x14] sm:$0xff]  ;;  %v2588_v37 = vld [vmem:[%s2848_s16 + $0xc] sm:$0xff] }
  0x36   : > { %1384 = vmatpush.bf16.msrb.mxu2 %v2572_v38  ;;  %v2566_v38 = vld [vmem:[%s2955_s13 + $0x1c] sm:$0xff] }
  0x37   : > { %1518 = vmatpush.bf16.msrb.mxu3 %v2584_v40  ;;  %v2553_v40 = vld [vmem:[%s479_s25 + $0x10] sm:$0xff] }
  0x39   : > { %723 = vmatpush.bf16.msrb.mxu1 %v2499_v39  ;;  %1117 = vmatpush.bf16.msrb.mxu0 %v2547_v41  ;;  %v2578_v39 = vld [vmem:[%s2836_s26 + $0x1c] sm:$0xff]  ;;  %v2589_v41 = vld [vmem:[%s2848_s16 + $0x14] sm:$0xff] }
  0x3a   : > { %1385 = vmatpush.bf16.msrb.mxu2 %v2571_v42 }
  0x3b   : > { %1519 = vmatpush.bf16.msrb.mxu3 %v2583_v52 }
  0x3c   : > { %642 = vmatmul.bf16.gmra.mxu1 %v2506_v45  ;;  %632 = vmatmul.bf16.gmra.mxu0 %v2504_v46 }
  0x3d   : > { %724 = vmatpush.bf16.msrb.mxu1 %v2498_v43  ;;  %1118 = vmatpush.bf16.msrb.mxu0 %v2546_v44  ;;  %v2590_v44 = vld [vmem:[%s2848_s16 + $0x1c] sm:$0xff] }
  0x3e   : > { %1386 = vmatpush.bf16.msrb.mxu2 %v2570_v51  ;;  %993 = vmatmul.bf16.gmra.mxu3 %v2528_v50 }
  0x3f   : > { %859 = vmatmul.bf16.gmra.mxu2 %v2516_v47  ;;  %1520 = vmatpush.bf16.msrb.mxu3 %v2582_v56 }
  0x41   : > { %725 = vmatpush.bf16.msrb.mxu1 %v2497_v48  ;;  %1119 = vmatpush.bf16.msrb.mxu0 %v2545_v49  ;;  %v2554_v49 = vld [vmem:[%s479_s25 + $0x18] sm:$0xff] }
  0x42   : > { %1387 = vmatpush.bf16.msrb.mxu2 %v2569_v54 }
  0x43   : > { %1521 = vmatpush.bf16.msrb.mxu3 %v2581_v5 }
  0x45   : > { %726 = vmatpush.bf16.msrb.mxu1 %v2496_v53  ;;  %1120 = vmatpush.bf16.msrb.mxu0 %v2544_v55 }
  0x46   : > { %1388 = vmatpush.bf16.msrb.mxu2 %v2568_v3 }
  0x47   : > { %1522 = vmatpush.bf16.msrb.mxu3 %v2580_v9 }
  0x49   : > { %727 = vmatpush.bf16.msrb.mxu1 %v2495_v57  ;;  %1121 = vmatpush.bf16.msrb.mxu0 %v2543_v59 }
  0x4a   : > { %1389 = vmatpush.bf16.msrb.mxu2 %v2567_v7 }
  0x4b   : > { %1523 = vmatpush.bf16.msrb.mxu3 %v2579_v18 }
  0x4c   : > { %728 = vmatmul.bf16.vlgmr.msrb.gmra.mxu1 %v2491_v62  ;;  %1122 = vmatmul.bf16.vlgmr.msrb.gmra.mxu0 %v2539_v63 }
  0x4d   : > { %1248 = vmatpush.bf16.msra.mxu1 %v2562_v58  ;;  %1650 = vmatpush.bf16.msra.mxu0 %v2598_v60 }
  0x4e   : > { %998 = vmatmul.bf16.gmra.mxu3 %v2529_v4  ;;  %2630 = vmatpush.bf16.msra.mxu2 %v2598_v60 }
  0x4f   : > { %864 = vmatmul.bf16.gmra.mxu2 %v2517_v0 }
  0x51   : > { %1249 = vmatpush.bf16.msra.mxu1 %v2561_v61  ;;  %1651 = vmatpush.bf16.msra.mxu0 %v2597_v1 }
  0x52   : > { %2631 = vmatpush.bf16.msra.mxu2 %v2597_v1 }
  0x55   : > { %1250 = vmatpush.bf16.msra.mxu1 %v2560_v2  ;;  %1652 = vmatpush.bf16.msra.mxu0 %v2596_v6 }
  0x56   : > { %2632 = vmatpush.bf16.msra.mxu2 %v2596_v6 }
  0x59   : > { %1251 = vmatpush.bf16.msra.mxu1 %v2559_v8  ;;  %1653 = vmatpush.bf16.msra.mxu0 %v2595_v10 }
  0x5a   : > { %2633 = vmatpush.bf16.msra.mxu2 %v2595_v10 }
  0x5c   : > { %733 = vmatmul.bf16.gmra.mxu1 %v2492_v13  ;;  %1127 = vmatmul.bf16.gmra.mxu0 %v2540_v14 }
  0x5d   : > { %1252 = vmatpush.bf16.msra.mxu1 %v2558_v11  ;;  %1654 = vmatpush.bf16.msra.mxu0 %v2594_v19 }
  0x5e   : > { %1003 = vmatmul.bf16.gmra.mxu3 %v2530_v16  ;;  %2634 = vmatpush.bf16.msra.mxu2 %v2594_v19 }
  0x5f   : > { %869 = vmatmul.bf16.gmra.mxu2 %v2518_v15 }
  0x61   : > { %1253 = vmatpush.bf16.msra.mxu1 %v2557_v12  ;;  %1655 = vmatpush.bf16.msra.mxu0 %v2593_v21 }
  0x62   : > { %2635 = vmatpush.bf16.msra.mxu2 %v2593_v21 }
  0x65   : > { %1254 = vmatpush.bf16.msra.mxu1 %v2556_v17  ;;  %1656 = vmatpush.bf16.msra.mxu0 %v2592_v22 }
  0x66   : > { %2636 = vmatpush.bf16.msra.mxu2 %v2592_v22 }
  0x69   : > { %1255 = vmatpush.bf16.msra.mxu1 %v2555_v20  ;;  %1657 = vmatpush.bf16.msra.mxu0 %v2591_v27 }
  0x6a   : > { %2637 = vmatpush.bf16.msra.mxu2 %v2591_v27 }
  0x6c   : > { %738 = vmatmul.bf16.gmra.mxu1 %v2493_v23  ;;  %1132 = vmatmul.bf16.gmra.mxu0 %v2541_v24 }
  0x6e   : > { %1524 = vmatmul.bf16.vlgmr.msrb.gmra.mxu3 %v2575_v26 }
  0x6f   : > { %1390 = vmatmul.bf16.vlgmr.msrb.gmra.mxu2 %v2563_v25 }
  0x7c   : > { %743 = vmatmul.bf16.gmra.mxu1 %v2494_v28  ;;  %1137 = vmatmul.bf16.gmra.mxu0 %v2542_v29 }
  0x7e   : > { %1529 = vmatmul.bf16.gmra.mxu3 %v2576_v31 }
  0x7f   : > { %1395 = vmatmul.bf16.gmra.mxu2 %v2564_v30 }
  0x8c   : > { %1256 = vmatmul.bf16.vlgmr.msra.gmra.mxu1 %v2551_v32  ;;  %1658 = vmatmul.bf16.vlgmr.msra.gmra.mxu0 %v2587_v33 }
  0x8e   : > { %1534 = vmatmul.bf16.gmra.mxu3 %v2577_v35 }
  0x8f   : > { %1400 = vmatmul.bf16.gmra.mxu2 %v2565_v34 }
  0x9c   : > { %1261 = vmatmul.bf16.gmra.mxu1 %v2552_v36  ;;  %1663 = vmatmul.bf16.gmra.mxu0 %v2588_v37 }
  0x9e   : > { %1539 = vmatmul.bf16.gmra.mxu3 %v2578_v39 }
  0x9f   : > { %1405 = vmatmul.bf16.gmra.mxu2 %v2566_v38 }
  0xa9   : > { %v638_v42 = vpop.f32.mrf.mxu1  ;;  %v628_v43 = vpop.f32.mrf.mxu0 }
  0xac   : > { %1266 = vmatmul.bf16.gmra.mxu1 %v2553_v40  ;;  %1668 = vmatmul.bf16.gmra.mxu0 %v2589_v41 }
  0xaf   : > { %1673 = vmatmul.bf16.vlgmr.msra.gmra.mxu2 %v2590_v44 }
  0xb1   : > { %v640_v46 = vpop.f32.mrf.mxu1  ;;  %v630_v47 = vpop.f32.mrf.mxu0 }
  0xb2   : > { %v855_v45 = vpop.f32.mrf.mxu2  ;;  %v989_v48 = vpop.f32.mrf.mxu3 }
  0xb9   : > { %v643_v51 = vpop.f32.mrf.mxu1  ;;  %v633_v52 = vpop.f32.mrf.mxu0 }
  0xba   : > { %v857_v50 = vpop.f32.mrf.mxu2  ;;  %v3048_v53 = vpop.f32.mrf.mxu3 }
  0xbc   : > { %1271 = vmatmul.bf16.gmra.mxu1 %v2554_v49 }
  0xc1   : > { %v645_v55 = vpop.f32.mrf.mxu1  ;;  %v635_v56 = vpop.f32.mrf.mxu0 }
  0xc2   : > { %v860_v54 = vpop.f32.mrf.mxu2  ;;  %v994_v57 = vpop.f32.mrf.mxu3 }
  0xc9   : > { %v729_v59 = vpop.f32.mrf.mxu1  ;;  %v1123_v60 = vpop.f32.mrf.mxu0 }
  0xca   : > { %v862_v58 = vpop.f32.mrf.mxu2  ;;  %v730_v61 = vadd.f32 %v729_v59, %v628_v43  ;;  %v3050_v63 = vpop.f32.mrf.mxu3 }
  0xcc   : > { %v875_v62 = vadd.f32 %v855_v45, %v730_v61 }
  0xce   : > { %v1009_v0 = vadd.f32 %v989_v48, %v875_v62 }
  0xd0   : > { %v1143_v1 = vadd.f32 %v1123_v60, %v1009_v0 }
  0xd1   : > { %v731_v3 = vpop.f32.mrf.mxu1  ;;  %v1125_v4 = vpop.f32.mrf.mxu0 }
  0xd2   : > { %v865_v2 = vpop.f32.mrf.mxu2  ;;  %v732_v5 = vadd.f32 %v731_v3, %v630_v47  ;;  %v999_v7 = vpop.f32.mrf.mxu3 }
  0xd4   : > { %v876_v6 = vadd.f32 %v857_v50, %v732_v5 }
  0xd9   : > { %v734_v9 = vpop.f32.mrf.mxu1  ;;  %v1128_v10 = vpop.f32.mrf.mxu0 }
  0xda   : > { %v867_v8 = vpop.f32.mrf.mxu2  ;;  %v735_v11 = vadd.f32 %v734_v9, %v633_v52  ;;  %v3052_v16 = vpop.f32.mrf.mxu3 }
  0xdc   : > { %v877_v12 = vadd.f32 %v860_v54, %v735_v11 }
  0xde   : > { %v1011_v13 = vadd.f32 %v994_v57, %v877_v12 }
  0xe0   : > { %v1145_v14 = vadd.f32 %v1128_v10, %v1011_v13 }
  0xe1   : > { %v736_v17 = vpop.f32.mrf.mxu1  ;;  %v3054_v18 = vpop.f32.mrf.mxu0 }
  0xe2   : > { %v870_v15 = vpop.f32.mrf.mxu2  ;;  %v737_v19 = vadd.f32 %v736_v17, %v635_v56  ;;  %v1004_v25 = vpop.f32.mrf.mxu3  ;;  %v1010_v56 = vadd.f32 %v3048_v53, %v876_v6  ;;  %v3080_v53 = vld [vmem:[%s3134_s8] ss:$0 sm:$0xff] }
  0xe4   : > { %v878_v20 = vadd.f32 %v862_v58, %v737_v19  ;;  %v1144_v58 = vadd.f32 %v1125_v4, %v1010_v56 }
  0xe6   : > { %v1012_v11 = vadd.f32 %v3050_v63, %v878_v20 }
  0xe9   : > { %v739_v22 = vpop.f32.mrf.mxu1  ;;  %v1133_v23 = vpop.f32.mrf.mxu0 }
  0xea   : > { %v872_v21 = vpop.f32.mrf.mxu2  ;;  %v740_v24 = vadd.f32 %v739_v22, %v638_v42  ;;  %v3062_v34 = vpop.f32.mrf.mxu3 }
  0xec   : > { %v879_v26 = vadd.f32 %v865_v2, %v740_v24 }
  0xee   : > { %v1013_v27 = vadd.f32 %v999_v7, %v879_v26 }
  0xf0   : > { %v3056_v28 = vadd.f32 %v1133_v23, %v1013_v27  ;;  %v1146_v23 = vadd.f32 %v3054_v18, %v1012_v11 }
  0xf1   : > { %v741_v30 = vpop.f32.mrf.mxu1  ;;  %v3058_v31 = vpop.f32.mrf.mxu0 }
  0xf2   : > { %v1391_v29 = vpop.f32.mrf.mxu2  ;;  %v742_v32 = vadd.f32 %v741_v30, %v640_v46  ;;  %v1525_v41 = vpop.f32.mrf.mxu3 }
  0xf4   : > { %v3060_v33 = vadd.f32 %v867_v8, %v742_v32 }
  0xf9   : > { %v744_v36 = vpop.f32.mrf.mxu1  ;;  %v1138_v37 = vpop.f32.mrf.mxu0 }
  0xfa   : > { %v1393_v35 = vpop.f32.mrf.mxu2  ;;  %v745_v38 = vadd.f32 %v744_v36, %v643_v51  ;;  %v1527_v46 = vpop.f32.mrf.mxu3 }
  0xfc   : > { %v881_v39 = vadd.f32 %v870_v15, %v745_v38 }
  0xfe   : > { %v1015_v40 = vadd.f32 %v1004_v25, %v881_v39 }
 0x100   : > { %v3064_v42 = vadd.f32 %v1138_v37, %v1015_v40  ;;  %v1014_v40 = vadd.f32 %v3052_v16, %v3060_v33 }
 0x101   : > { %v746_v44 = vpop.f32.mrf.mxu1  ;;  %v3066_v45 = vpop.f32.mrf.mxu0 }
 0x102   : > { %v1396_v43 = vpop.f32.mrf.mxu2  ;;  %v747_v47 = vadd.f32 %v746_v44, %v645_v55  ;;  %v3074_v55 = vld [vmem:[%s3133_s7] ss:$0 sm:$0xff]  ;;  %v1530_v0 = vpop.f32.mrf.mxu3 }
 0x104   : > { %v3068_v48 = vadd.f32 %v872_v21, %v747_v47 }
 0x109   : > { %v1257_v49 = vpop.f32.mrf.mxu1  ;;  %v1659_v50 = vpop.f32.mrf.mxu0 }
 0x10a   : > { %v1277_v52 = vadd.f32 %v1257_v49, %v1143_v1  ;;  %v1398_v54 = vpop.f32.mrf.mxu2  ;;  %v1532_v15 = vpop.f32.mrf.mxu3  ;;  %v1148_v49 = vadd.f32 %v3058_v31, %v1014_v40 }
 0x10c   : > { %v1411_v51 = vadd.f32 %v1391_v29, %v1277_v52 }
 0x10e   : > { %v1545_v57 = vadd.f32 %v1525_v41, %v1411_v51 }
 0x110   : > { %v1679_v61 = vadd.f32 %v1659_v50, %v1545_v57 }
 0x111   : > { %v1259_v59 = vpop.f32.mrf.mxu1  ;;  %v1661_v60 = vpop.f32.mrf.mxu0 }
 0x112   : > { %v1278_v62 = vadd.f32 %v1259_v59, %v1144_v58  ;;  %v1401_v3 = vpop.f32.mrf.mxu2  ;;  %v1691_v1 = vmul.f32 %v3074_v55, %v1679_v61  ;;  %v1535_v30 = vpop.f32.mrf.mxu3 }
 0x114   : > { %v1412_v2 = vadd.f32 %v1393_v35, %v1278_v62  ;;  %v1703_v8 = vadd.f32 %v3080_v53, %v1691_v1 }
 0x116   : > { %v1546_v4 = vadd.f32 %v1527_v46, %v1412_v2  ;;  %v1711_v17 = vmax.f32 %v1703_v8, 0.0  ;;  %v1016_v2 = vadd.f32 %v3062_v34, %v3068_v48 }
 0x118   : > { %v1680_v5 = vadd.f32 %v1661_v60, %v1546_v4  ;;  %v1150_v8 = vadd.f32 %v3066_v45, %v1016_v2 }
 0x119   : > { %v1262_v6 = vpop.f32.mrf.mxu1  ;;  %v1664_v7 = vpop.f32.mrf.mxu0 }
 0x11a   : > { %v1692_v9 = vmul.f32 %v3074_v55, %v1680_v5  ;;  %v1279_v10 = vadd.f32 %v1262_v6, %v1145_v14  ;;  %v1403_v22 = vpop.f32.mrf.mxu2  ;;  %v1537_v52 = vpop.f32.mrf.mxu3 }
 0x11c   : > { %v1704_v12 = vadd.f32 %v3080_v53, %v1692_v9  ;;  %v1413_v13 = vadd.f32 %v1396_v43, %v1279_v10 }
 0x11e   : > { %v1712_v19 = vmax.f32 %v1704_v12, 0.0  ;;  %v1547_v21 = vadd.f32 %v1530_v0, %v1413_v13 }
 0x120   : > { %v2602_v14 = vpack.c.bf16 %v1712_v19, %v1711_v17  ;;  %v1681_v20 = vadd.f32 %v1664_v7, %v1547_v21 }
 0x121   : > { %v1264_v24 = vpop.f32.mrf.mxu1  ;;  %v1666_v63 = vpop.f32.mrf.mxu0 }
 0x122   : > { %2603 = vst [vmem:[%s3090_s29] sm:$0xff] %v2602_v14   ;;  %v1280_v25 = vadd.f32 %v1264_v24, %v1146_v23  ;;  %v1693_v27 = vmul.f32 %v3074_v55, %v1681_v20  ;;  %v1406_v35 = vpop.f32.mrf.mxu2  ;;  %v1540_v0 = vpop.f32.mrf.mxu3 }
 0x124   : > { %v1414_v26 = vadd.f32 %v1398_v54, %v1280_v25  ;;  %v1705_v37 = vadd.f32 %v3080_v53, %v1693_v27 }
 0x126   : > { %v1548_v29 = vadd.f32 %v1532_v15, %v1414_v26  ;;  %v1713_v44 = vmax.f32 %v1705_v37, 0.0 }
 0x128   : > { %v1682_v32 = vadd.f32 %v1666_v63, %v1548_v29 }
 0x129   : > { %v1267_v36 = vpop.f32.mrf.mxu1  ;;  %v1669_v39 = vpop.f32.mrf.mxu0 }
 0x12a   : > { %v1694_v38 = vmul.f32 %v3074_v55, %v1682_v32  ;;  %v1281_v18 = vadd.f32 %v1267_v36, %v3056_v28  ;;  %v1408_v57 = vpop.f32.mrf.mxu2  ;;  %v1542_v13 = vpop.f32.mrf.mxu3 }
 0x12c   : > { %v1706_v41 = vadd.f32 %v3080_v53, %v1694_v38  ;;  %v1415_v43 = vadd.f32 %v1401_v3, %v1281_v18 }
 0x12e   : > { %v1714_v47 = vmax.f32 %v1706_v41, 0.0  ;;  %v1549_v46 = vadd.f32 %v1535_v30, %v1415_v43 }
 0x130   : > { %v2607_v50 = vpack.c.bf16 %v1714_v47, %v1713_v44  ;;  %v1683_v56 = vadd.f32 %v1669_v39, %v1549_v46 }
 0x131   : > { %v1269_v54 = vpop.f32.mrf.mxu1  ;;  %v1671_v58 = vpop.f32.mrf.mxu0 }
 0x132   : > { %2619 = vst [vmem:[%s3090_s29 + $0x8] sm:$0xff] %v2607_v50   ;;  %v1282_v51 = vadd.f32 %v1269_v54, %v1148_v49  ;;  %v1695_v59 = vmul.f32 %v3074_v55, %v1683_v56  ;;  %v1674_v4 = vpop.f32.mrf.mxu2 }
 0x134   : > { %v1416_v28 = vadd.f32 %v1403_v22, %v1282_v51  ;;  %v1707_v61 = vadd.f32 %v3080_v53, %v1695_v59 }
 0x136   : > { %v1550_v16 = vadd.f32 %v1537_v52, %v1416_v28  ;;  %v1715_v5 = vmax.f32 %v1707_v61, 0.0 }
 0x138   : > { %v1684_v33 = vadd.f32 %v1671_v58, %v1550_v16 }
 0x139   : > { %v1272_v60 = vpop.f32.mrf.mxu1 }
 0x13a   : > { %v1696_v62 = vmul.f32 %v3074_v55, %v1684_v33  ;;  %v1283_v31 = vadd.f32 %v1272_v60, %v3064_v42  ;;  %v1676_v48 = vpop.f32.mrf.mxu2 }
 0x13c   : > { %v1708_v3 = vadd.f32 %v3080_v53, %v1696_v62  ;;  %v1417_v1 = vadd.f32 %v1406_v35, %v1283_v31 }
 0x13e   : > { %v1716_v6 = vmax.f32 %v1708_v3, 0.0  ;;  %v1551_v7 = vadd.f32 %v1540_v0, %v1417_v1 }
 0x140   : > { %v2612_v9 = vpack.c.bf16 %v1716_v6, %v1715_v5  ;;  %v1685_v11 = vadd.f32 %v1674_v4, %v1551_v7 }
 0x141   : > { %v1274_v10 = vpop.f32.mrf.mxu1 }
 0x142   : > { %2620 = vst [vmem:[%s3090_s29 + $0x10] sm:$0xff] %v2612_v9   ;;  %v1284_v12 = vadd.f32 %v1274_v10, %v1150_v8  ;;  %v1697_v15 = vmul.f32 %v3074_v55, %v1685_v11 }
 0x144   : > { %v1418_v42 = vadd.f32 %v1408_v57, %v1284_v12  ;;  %v1709_v19 = vadd.f32 %v3080_v53, %v1697_v15 }
 0x146   : > { %v1552_v34 = vadd.f32 %v1542_v13, %v1418_v42  ;;  %v1717_v45 = vmax.f32 %v1709_v19, 0.0 }
 0x148   : > { %v1686_v17 = vadd.f32 %v1676_v48, %v1552_v34 }
 0x14a   : > { %v1698_v21 = vmul.f32 %v3074_v55, %v1686_v17 }
 0x14c   : > { %v1710_v22 = vadd.f32 %v3080_v53, %v1698_v21 }
 0x14e   : > { %v1718_v23 = vmax.f32 %v1710_v22, 0.0 }
 0x150   : > { %v2617_v14 = vpack.c.bf16 %v1718_v23, %v1717_v45 }
 0x152   : > { %2621 = vst [vmem:[%s3090_s29 + $0x18] sm:$0xff] %v2617_v14  }
 0x153 PF: > { %s19_s11 = sadd.s32 1, %s2687_s11   ;;  %s3136_s30 = smov %s2683_s10 }
 0x154   : > { %p16_p5 = scmp.ge.s32.totalorder %s19_s11, 4   ;;  %s3137_s10 = smov %s3139_s12 }
 0x156   :  { %18 = sbr.rel (!%p16_p5) target bundleno = 2 (0x2), region = 118 }

// kernel: network_block_forward.12
= control target key start
LH: loop header
LB: loop body
LE: loop exit
PB: predicated region body
PF: predicated region fallthrough
CT: control target
= control target key end

     0   :  { %s2544_s21 = smov 0   ;;  %s2546_s22 = smov 0   ;;  %s2914_s0 = inlined_call_operand.vmem [shape: bf16[2,80,128], index: 0, kind: input, shape index: {}]   ;;  %s2915_s1 = inlined_call_operand.vmem [shape: bf16[2,80,128], index: 1, kind: input, shape index: {}]   ;;  %s2916_s2 = inlined_call_operand.vmem [shape: bf16[2,80,128], index: 2, kind: input, shape index: {}]   ;;  %s2917_s3 = inlined_call_operand.vmem [shape: bf16[9,128,128], index: 3, kind: input, shape index: {}]   ;;  %s2918_s4 = inlined_call_operand.vmem [shape: f32[1,128], index: 4, kind: input, shape index: {}]   ;;  %s2919_s5 = inlined_call_operand.vmem [shape: f32[1,128], index: 5, kind: input, shape index: {}]   ;;  %s2920_s6 = inlined_call_operand.vmem [shape: bf16[2,64,128], index: 6, kind: output, shape index: {}]  }
   0x1   :  { %s2548_s23 = smov 0  }
   0x2 LB: > { %s28_s24 = sadd.s32 1, %s2503_s22  ;;  %p1742_p0 = scmp.ge.s32.totalorder %s2507_s23, 1  ;;  %s2507_s23 = sphi %s2548_s23, %s16_s23   ;;  %s2503_s22 = sphi %s2546_s22, %s2922_s22   ;;  %s2499_s21 = sphi %s2544_s21, %s2921_s21  }
   0x3   : > { %p30_p1 = scmp.ge.s32.totalorder %s28_s24, 2  ;;  %p271_p2 = scmp.lt.s32.totalorder %s2507_s23, 3 }
   0x5   : > { %s2924_s24 = smov (%p30_p1, %s28_s24), 0  ;;  %p272_p3 = pnand %p1742_p0, %p271_p2 }
   0x6   : > { %p324_p4 = scmp.lt.s32.totalorder (!%p272_p3), %s2499_s21, 1 }
   0x7   : > { %275 = sbr.rel (%p272_p3) target bundleno = 339 (0x153), region = 44 }
   0xc   : > { %v2334_v0 = vld [vmem:[%s2917_s3 + $0x78] sm:$0xff]  ;;  %v2333_v2 = vld [vmem:[%s2917_s3 + $0x70] sm:$0xff]  ;;  %v2332_v6 = vld [vmem:[%s2917_s3 + $0x68] sm:$0xff]  ;;  %s2926_s21 = smov (!%p324_p4, %s2499_s21), 1 }
   0xd   : > { %v2346_v1 = vld [vmem:[%s2917_s3 + $0xb8] sm:$0xff]  ;;  %2442 = vmatpush.bf16.msra.mxu1 %v2334_v0  ;;  %478 = vmatpush.bf16.msra.mxu0 %v2334_v0  ;;  %v2345_v3 = vld [vmem:[%s2917_s3 + $0xb0] sm:$0xff]  ;;  %v2344_v7 = vld [vmem:[%s2917_s3 + $0xa8] sm:$0xff]  ;;  %s2458_s19 = smul.u32 40, %s2926_s21  ;;  %s2310_s13 = sshll.u32 %s2926_s21, 5 }
   0xe   : > { %705 = vmatpush.bf16.msra.mxu2 %v2346_v1  ;;  %v2358_v4 = vld [vmem:[%s2917_s3 + $0xf8] sm:$0xff]  ;;  %v2357_v5 = vld [vmem:[%s2917_s3 + $0xf0] sm:$0xff]  ;;  %v2356_v8 = vld [vmem:[%s2917_s3 + $0xe8] sm:$0xff]  ;;  %s2878_s16 = scalar_lea.vmem %s2920_s6, %s2310_s13 }
   0xf   : > { %839 = vmatpush.bf16.msra.mxu3 %v2358_v4  ;;  %v2331_v9 = vld [vmem:[%s2917_s3 + $0x60] sm:$0xff]  ;;  %v2330_v12 = vld [vmem:[%s2917_s3 + $0x58] sm:$0xff]  ;;  %v2329_v15 = vld [vmem:[%s2917_s3 + $0x50] sm:$0xff]  ;;  %s2638_s8 = scalar_lea.vmem %s2915_s1, %s2458_s19  ;;  %s2649_s15 = scalar_lea.vmem %s2916_s2, %s2458_s19 }
  0x10   : > { %v2343_v10 = vld [vmem:[%s2917_s3 + $0xa0] sm:$0xff]  ;;  %v2342_v13 = vld [vmem:[%s2917_s3 + $0x98] sm:$0xff]  ;;  %v2341_v16 = vld [vmem:[%s2917_s3 + $0x90] sm:$0xff]  ;;  %s2666_s29 = scalar_lea.vmem %s2914_s0, %s2458_s19 }
  0x11   : > { %2443 = vmatpush.bf16.msra.mxu1 %v2333_v2  ;;  %479 = vmatpush.bf16.msra.mxu0 %v2333_v2  ;;  %v2355_v11 = vld [vmem:[%s2917_s3 + $0xe0] sm:$0xff]  ;;  %v2354_v14 = vld [vmem:[%s2917_s3 + $0xd8] sm:$0xff]  ;;  %v2353_v17 = vld [vmem:[%s2917_s3 + $0xd0] sm:$0xff] }
  0x12   : > { %706 = vmatpush.bf16.msra.mxu2 %v2345_v3  ;;  %v2328_v18 = vld [vmem:[%s2917_s3 + $0x48] sm:$0xff]  ;;  %v2327_v21 = vld [vmem:[%s2917_s3 + $0x40] sm:$0xff]  ;;  %v2322_v22 = vld [vmem:[%s2917_s3 + $0x38] sm:$0xff] }
  0x13   : > { %840 = vmatpush.bf16.msra.mxu3 %v2357_v5  ;;  %v2340_v19 = vld [vmem:[%s2917_s3 + $0x88] sm:$0xff]  ;;  %v2339_v23 = vld [vmem:[%s2917_s3 + $0x80] sm:$0xff]  ;;  %v2370_v24 = vld [vmem:[%s2917_s3 + $0x138] sm:$0xff] }
  0x14   : > { %v2352_v20 = vld [vmem:[%s2917_s3 + $0xc8] sm:$0xff]  ;;  %v2394_v25 = vld [vmem:[%s2917_s3 + $0x1b8] sm:$0xff]  ;;  %v2325_v26 = vld [vmem:[%s2638_s8 + $0x10] sm:$0xff] }
  0x15   : > { %2444 = vmatpush.bf16.msra.mxu1 %v2332_v6  ;;  %480 = vmatpush.bf16.msra.mxu0 %v2332_v6  ;;  %v2323_v27 = vld [vmem:[%s2638_s8] sm:$0xff]  ;;  %v2321_v30 = vld [vmem:[%s2917_s3 + $0x30] sm:$0xff]  ;;  %v2406_v31 = vld [vmem:[%s2917_s3 + $0x1f8] sm:$0xff] }
  0x16   : > { %707 = vmatpush.bf16.msra.mxu2 %v2344_v7  ;;  %v2335_v28 = vld [vmem:[%s2649_s15] sm:$0xff]  ;;  %v2369_v32 = vld [vmem:[%s2917_s3 + $0x130] sm:$0xff]  ;;  %v2320_v35 = vld [vmem:[%s2917_s3 + $0x28] sm:$0xff] }
  0x17   : > { %841 = vmatpush.bf16.msra.mxu3 %v2356_v8  ;;  %v2351_v29 = vld [vmem:[%s2917_s3 + $0xc0] sm:$0xff]  ;;  %v2393_v33 = vld [vmem:[%s2917_s3 + $0x1b0] sm:$0xff]  ;;  %v2368_v37 = vld [vmem:[%s2917_s3 + $0x128] sm:$0xff] }
  0x18   : > { %v2347_v34 = vld [vmem:[%s2666_s29 + $0x4] sm:$0xff]  ;;  %v2405_v36 = vld [vmem:[%s2917_s3 + $0x1f0] sm:$0xff]  ;;  %v2318_v43 = vld [vmem:[%s2917_s3 + $0x18] sm:$0xff] }
  0x19   : > { %2445 = vmatpush.bf16.msra.mxu1 %v2331_v9  ;;  %481 = vmatpush.bf16.msra.mxu0 %v2331_v9  ;;  %v2392_v38 = vld [vmem:[%s2917_s3 + $0x1a8] sm:$0xff]  ;;  %v2319_v39 = vld [vmem:[%s2917_s3 + $0x20] sm:$0xff]  ;;  %v2366_v44 = vld [vmem:[%s2917_s3 + $0x118] sm:$0xff] }
  0x1a   : > { %708 = vmatpush.bf16.msra.mxu2 %v2343_v10  ;;  %v2404_v40 = vld [vmem:[%s2917_s3 + $0x1e8] sm:$0xff]  ;;  %v2367_v41 = vld [vmem:[%s2917_s3 + $0x120] sm:$0xff]  ;;  %v2326_v45 = vld [vmem:[%s2638_s8 + $0x18] sm:$0xff] }
  0x1b   : > { %842 = vmatpush.bf16.msra.mxu3 %v2355_v11  ;;  %v2391_v42 = vld [vmem:[%s2917_s3 + $0x1a0] sm:$0xff]  ;;  %v2324_v46 = vld [vmem:[%s2638_s8 + $0x8] sm:$0xff]  ;;  %v2317_v48 = vld [vmem:[%s2917_s3 + $0x10] sm:$0xff] }
  0x1c   : > { %v2336_v47 = vld [vmem:[%s2649_s15 + $0x8] sm:$0xff]  ;;  %v2365_v49 = vld [vmem:[%s2917_s3 + $0x110] sm:$0xff]  ;;  %v2390_v51 = vld [vmem:[%s2917_s3 + $0x198] sm:$0xff] }
  0x1d   : > { %2446 = vmatpush.bf16.msra.mxu1 %v2330_v12  ;;  %482 = vmatpush.bf16.msra.mxu0 %v2330_v12  ;;  %v2348_v50 = vld [vmem:[%s2666_s29 + $0xc] sm:$0xff]  ;;  %v2403_v52 = vld [vmem:[%s2917_s3 + $0x1e0] sm:$0xff]  ;;  %v2402_v56 = vld [vmem:[%s2917_s3 + $0x1d8] sm:$0xff] }
  0x1e   : > { %709 = vmatpush.bf16.msra.mxu2 %v2342_v13  ;;  %v2316_v53 = vld [vmem:[%s2917_s3 + $0x8] sm:$0xff]  ;;  %v2389_v54 = vld [vmem:[%s2917_s3 + $0x190] sm:$0xff]  ;;  %v2315_v57 = vld [vmem:[%s2917_s3] sm:$0xff] }
  0x1f   : > { %843 = vmatpush.bf16.msra.mxu3 %v2354_v14  ;;  %v2364_v55 = vld [vmem:[%s2917_s3 + $0x108] sm:$0xff]  ;;  %v2382_v58 = vld [vmem:[%s2917_s3 + $0x178] sm:$0xff]  ;;  %v2363_v59 = vld [vmem:[%s2917_s3 + $0x100] sm:$0xff] }
  0x20   : > { %v2418_v60 = vld [vmem:[%s2917_s3 + $0x238] sm:$0xff]  ;;  %v2381_v61 = vld [vmem:[%s2917_s3 + $0x170] sm:$0xff]  ;;  %v2311_v62 = vld [vmem:[%s2666_s29] sm:$0xff] }
  0x21   : > { %2447 = vmatpush.bf16.msra.mxu1 %v2329_v15  ;;  %483 = vmatpush.bf16.msra.mxu0 %v2329_v15  ;;  %v2359_v63 = vld [vmem:[%s2638_s8 + $0x4] sm:$0xff]  ;;  %v2337_v0 = vld [vmem:[%s2649_s15 + $0x10] sm:$0xff]  ;;  %v2378_v11 = vld [vmem:[%s2917_s3 + $0x158] sm:$0xff] }
  0x22   : > { %710 = vmatpush.bf16.msra.mxu2 %v2341_v16  ;;  %v2417_v1 = vld [vmem:[%s2917_s3 + $0x230] sm:$0xff]  ;;  %v2380_v2 = vld [vmem:[%s2917_s3 + $0x168] sm:$0xff]  ;;  %v2387_v7 = vld [vmem:[%s2917_s3 + $0x180] sm:$0xff] }
  0x23   : > { %844 = vmatpush.bf16.msra.mxu3 %v2353_v17  ;;  %v2388_v3 = vld [vmem:[%s2917_s3 + $0x188] sm:$0xff]  ;;  %v2349_v4 = vld [vmem:[%s2666_s29 + $0x14] sm:$0xff]  ;;  %v2379_v8 = vld [vmem:[%s2917_s3 + $0x160] sm:$0xff] }
  0x24   : > { %v2401_v5 = vld [vmem:[%s2917_s3 + $0x1d0] sm:$0xff]  ;;  %v2416_v6 = vld [vmem:[%s2917_s3 + $0x228] sm:$0xff]  ;;  %v2415_v10 = vld [vmem:[%s2917_s3 + $0x220] sm:$0xff] }
  0x25   : > { %2448 = vmatpush.bf16.msra.mxu1 %v2328_v18  ;;  %484 = vmatpush.bf16.msra.mxu0 %v2328_v18  ;;  %v2400_v9 = vld [vmem:[%s2917_s3 + $0x1c8] sm:$0xff]  ;;  %v2377_v12 = vld [vmem:[%s2917_s3 + $0x150] sm:$0xff]  ;;  %v2338_v15 = vld [vmem:[%s2649_s15 + $0x18] sm:$0xff] }
  0x26   : > { %711 = vmatpush.bf16.msra.mxu2 %v2340_v19  ;;  %v2312_v13 = vld [vmem:[%s2666_s29 + $0x8] sm:$0xff]  ;;  %v2350_v16 = vld [vmem:[%s2666_s29 + $0x1c] sm:$0xff] }
  0x27   : > { %845 = vmatpush.bf16.msra.mxu3 %v2352_v20  ;;  %v2360_v14 = vld [vmem:[%s2638_s8 + $0xc] sm:$0xff]  ;;  %v2399_v18 = vld [vmem:[%s2917_s3 + $0x1c0] sm:$0xff]  ;;  %v2414_v19 = vld [vmem:[%s2917_s3 + $0x218] sm:$0xff] }
  0x28   : > { %v2376_v17 = vld [vmem:[%s2917_s3 + $0x148] sm:$0xff]  ;;  %v2375_v20 = vld [vmem:[%s2917_s3 + $0x140] sm:$0xff] }
  0x29   : > { %2449 = vmatpush.bf16.msra.mxu1 %v2327_v21  ;;  %485 = vmatpush.bf16.msra.mxu0 %v2327_v21  ;;  %v2413_v21 = vld [vmem:[%s2917_s3 + $0x210] sm:$0xff] }
  0x2a   : > { %712 = vmatpush.bf16.msra.mxu2 %v2339_v23  ;;  %v2313_v23 = vld [vmem:[%s2666_s29 + $0x10] sm:$0xff] }
  0x2b   : > { %846 = vmatpush.bf16.msra.mxu3 %v2351_v29  ;;  %v2362_v29 = vld [vmem:[%s2638_s8 + $0x1c] sm:$0xff] }
  0x2c   : > { %496 = vmatmul.bf16.vlgmr.msra.gmra.mxu1 %v2325_v26  ;;  %486 = vmatmul.bf16.vlgmr.msra.gmra.mxu0 %v2323_v27  ;;  %v2395_v26 = vld [vmem:[%s2638_s8 + $0x8] sm:$0xff]  ;;  %v2411_v27 = vld [vmem:[%s2917_s3 + $0x200] sm:$0xff] }
  0x2d   : > { %579 = vmatpush.bf16.msrb.mxu1 %v2322_v22  ;;  %973 = vmatpush.bf16.msrb.mxu0 %v2370_v24  ;;  %v2412_v22 = vld [vmem:[%s2917_s3 + $0x208] sm:$0xff]  ;;  %v2361_v24 = vld [vmem:[%s2638_s8 + $0x14] sm:$0xff] }
  0x2e   : > { %1241 = vmatpush.bf16.msrb.mxu2 %v2394_v25  ;;  %847 = vmatmul.bf16.vlgmr.msra.gmra.mxu3 %v2347_v34  ;;  %v2383_v25 = vld [vmem:[%s2666_s29 + $0x8] sm:$0xff]  ;;  %v2385_v34 = vld [vmem:[%s2666_s29 + $0x18] sm:$0xff] }
  0x2f   : > { %713 = vmatmul.bf16.vlgmr.msra.gmra.mxu2 %v2335_v28  ;;  %1375 = vmatpush.bf16.msrb.mxu3 %v2406_v31  ;;  %v2314_v28 = vld [vmem:[%s2666_s29 + $0x18] sm:$0xff]  ;;  %v2396_v31 = vld [vmem:[%s2638_s8 + $0x10] sm:$0xff] }
  0x31   : > { %580 = vmatpush.bf16.msrb.mxu1 %v2321_v30  ;;  %974 = vmatpush.bf16.msrb.mxu0 %v2369_v32  ;;  %v2384_v30 = vld [vmem:[%s2666_s29 + $0x10] sm:$0xff]  ;;  %v2371_v32 = vld [vmem:[%s2649_s15 + $0x4] sm:$0xff] }
  0x32   : > { %1242 = vmatpush.bf16.msrb.mxu2 %v2393_v33  ;;  %v2407_v33 = vld [vmem:[%s2649_s15 + $0x8] sm:$0xff] }
  0x33   : > { %1376 = vmatpush.bf16.msrb.mxu3 %v2405_v36  ;;  %v2372_v36 = vld [vmem:[%s2649_s15 + $0xc] sm:$0xff] }
  0x35   : > { %581 = vmatpush.bf16.msrb.mxu1 %v2320_v35  ;;  %975 = vmatpush.bf16.msrb.mxu0 %v2368_v37  ;;  %v2397_v35 = vld [vmem:[%s2638_s8 + $0x18] sm:$0xff]  ;;  %v2408_v37 = vld [vmem:[%s2649_s15 + $0x10] sm:$0xff] }
  0x36   : > { %1243 = vmatpush.bf16.msrb.mxu2 %v2392_v38  ;;  %v2386_v38 = vld [vmem:[%s2666_s29 + $0x20] sm:$0xff] }
  0x37   : > { %1377 = vmatpush.bf16.msrb.mxu3 %v2404_v40  ;;  %v2373_v40 = vld [vmem:[%s2649_s15 + $0x14] sm:$0xff] }
  0x39   : > { %582 = vmatpush.bf16.msrb.mxu1 %v2319_v39  ;;  %976 = vmatpush.bf16.msrb.mxu0 %v2367_v41  ;;  %v2398_v39 = vld [vmem:[%s2638_s8 + $0x20] sm:$0xff]  ;;  %v2409_v41 = vld [vmem:[%s2649_s15 + $0x18] sm:$0xff] }
  0x3a   : > { %1244 = vmatpush.bf16.msrb.mxu2 %v2391_v42 }
  0x3b   : > { %1378 = vmatpush.bf16.msrb.mxu3 %v2403_v52 }
  0x3c   : > { %501 = vmatmul.bf16.gmra.mxu1 %v2326_v45  ;;  %491 = vmatmul.bf16.gmra.mxu0 %v2324_v46 }
  0x3d   : > { %583 = vmatpush.bf16.msrb.mxu1 %v2318_v43  ;;  %977 = vmatpush.bf16.msrb.mxu0 %v2366_v44  ;;  %v2410_v44 = vld [vmem:[%s2649_s15 + $0x20] sm:$0xff] }
  0x3e   : > { %1245 = vmatpush.bf16.msrb.mxu2 %v2390_v51  ;;  %852 = vmatmul.bf16.gmra.mxu3 %v2348_v50 }
  0x3f   : > { %718 = vmatmul.bf16.gmra.mxu2 %v2336_v47  ;;  %1379 = vmatpush.bf16.msrb.mxu3 %v2402_v56 }
  0x41   : > { %584 = vmatpush.bf16.msrb.mxu1 %v2317_v48  ;;  %978 = vmatpush.bf16.msrb.mxu0 %v2365_v49  ;;  %v2374_v49 = vld [vmem:[%s2649_s15 + $0x1c] sm:$0xff] }
  0x42   : > { %1246 = vmatpush.bf16.msrb.mxu2 %v2389_v54 }
  0x43   : > { %1380 = vmatpush.bf16.msrb.mxu3 %v2401_v5 }
  0x45   : > { %585 = vmatpush.bf16.msrb.mxu1 %v2316_v53  ;;  %979 = vmatpush.bf16.msrb.mxu0 %v2364_v55 }
  0x46   : > { %1247 = vmatpush.bf16.msrb.mxu2 %v2388_v3 }
  0x47   : > { %1381 = vmatpush.bf16.msrb.mxu3 %v2400_v9 }
  0x49   : > { %586 = vmatpush.bf16.msrb.mxu1 %v2315_v57  ;;  %980 = vmatpush.bf16.msrb.mxu0 %v2363_v59 }
  0x4a   : > { %1248 = vmatpush.bf16.msrb.mxu2 %v2387_v7 }
  0x4b   : > { %1382 = vmatpush.bf16.msrb.mxu3 %v2399_v18 }
  0x4c   : > { %587 = vmatmul.bf16.vlgmr.msrb.gmra.mxu1 %v2311_v62  ;;  %981 = vmatmul.bf16.vlgmr.msrb.gmra.mxu0 %v2359_v63 }
  0x4d   : > { %1107 = vmatpush.bf16.msra.mxu1 %v2382_v58  ;;  %1509 = vmatpush.bf16.msra.mxu0 %v2418_v60 }
  0x4e   : > { %857 = vmatmul.bf16.gmra.mxu3 %v2349_v4  ;;  %2450 = vmatpush.bf16.msra.mxu2 %v2418_v60 }
  0x4f   : > { %723 = vmatmul.bf16.gmra.mxu2 %v2337_v0 }
  0x51   : > { %1108 = vmatpush.bf16.msra.mxu1 %v2381_v61  ;;  %1510 = vmatpush.bf16.msra.mxu0 %v2417_v1 }
  0x52   : > { %2451 = vmatpush.bf16.msra.mxu2 %v2417_v1 }
  0x55   : > { %1109 = vmatpush.bf16.msra.mxu1 %v2380_v2  ;;  %1511 = vmatpush.bf16.msra.mxu0 %v2416_v6 }
  0x56   : > { %2452 = vmatpush.bf16.msra.mxu2 %v2416_v6 }
  0x59   : > { %1110 = vmatpush.bf16.msra.mxu1 %v2379_v8  ;;  %1512 = vmatpush.bf16.msra.mxu0 %v2415_v10 }
  0x5a   : > { %2453 = vmatpush.bf16.msra.mxu2 %v2415_v10 }
  0x5c   : > { %592 = vmatmul.bf16.gmra.mxu1 %v2312_v13  ;;  %986 = vmatmul.bf16.gmra.mxu0 %v2360_v14 }
  0x5d   : > { %1111 = vmatpush.bf16.msra.mxu1 %v2378_v11  ;;  %1513 = vmatpush.bf16.msra.mxu0 %v2414_v19 }
  0x5e   : > { %862 = vmatmul.bf16.gmra.mxu3 %v2350_v16  ;;  %2454 = vmatpush.bf16.msra.mxu2 %v2414_v19 }
  0x5f   : > { %728 = vmatmul.bf16.gmra.mxu2 %v2338_v15 }
  0x61   : > { %1112 = vmatpush.bf16.msra.mxu1 %v2377_v12  ;;  %1514 = vmatpush.bf16.msra.mxu0 %v2413_v21 }
  0x62   : > { %2455 = vmatpush.bf16.msra.mxu2 %v2413_v21 }
  0x65   : > { %1113 = vmatpush.bf16.msra.mxu1 %v2376_v17  ;;  %1515 = vmatpush.bf16.msra.mxu0 %v2412_v22 }
  0x66   : > { %2456 = vmatpush.bf16.msra.mxu2 %v2412_v22 }
  0x69   : > { %1114 = vmatpush.bf16.msra.mxu1 %v2375_v20  ;;  %1516 = vmatpush.bf16.msra.mxu0 %v2411_v27 }
  0x6a   : > { %2457 = vmatpush.bf16.msra.mxu2 %v2411_v27 }
  0x6c   : > { %597 = vmatmul.bf16.gmra.mxu1 %v2313_v23  ;;  %991 = vmatmul.bf16.gmra.mxu0 %v2361_v24 }
  0x6e   : > { %1383 = vmatmul.bf16.vlgmr.msrb.gmra.mxu3 %v2395_v26 }
  0x6f   : > { %1249 = vmatmul.bf16.vlgmr.msrb.gmra.mxu2 %v2383_v25 }
  0x7c   : > { %602 = vmatmul.bf16.gmra.mxu1 %v2314_v28  ;;  %996 = vmatmul.bf16.gmra.mxu0 %v2362_v29 }
  0x7e   : > { %1388 = vmatmul.bf16.gmra.mxu3 %v2396_v31 }
  0x7f   : > { %1254 = vmatmul.bf16.gmra.mxu2 %v2384_v30 }
  0x8c   : > { %1115 = vmatmul.bf16.vlgmr.msra.gmra.mxu1 %v2371_v32  ;;  %1517 = vmatmul.bf16.vlgmr.msra.gmra.mxu0 %v2407_v33 }
  0x8e   : > { %1393 = vmatmul.bf16.gmra.mxu3 %v2397_v35 }
  0x8f   : > { %1259 = vmatmul.bf16.gmra.mxu2 %v2385_v34 }
  0x9c   : > { %1120 = vmatmul.bf16.gmra.mxu1 %v2372_v36  ;;  %1522 = vmatmul.bf16.gmra.mxu0 %v2408_v37 }
  0x9e   : > { %1398 = vmatmul.bf16.gmra.mxu3 %v2398_v39 }
  0x9f   : > { %1264 = vmatmul.bf16.gmra.mxu2 %v2386_v38 }
  0xa9   : > { %v497_v42 = vpop.f32.mrf.mxu1  ;;  %v487_v43 = vpop.f32.mrf.mxu0 }
  0xac   : > { %1125 = vmatmul.bf16.gmra.mxu1 %v2373_v40  ;;  %1527 = vmatmul.bf16.gmra.mxu0 %v2409_v41 }
  0xaf   : > { %1532 = vmatmul.bf16.vlgmr.msra.gmra.mxu2 %v2410_v44 }
  0xb1   : > { %v499_v46 = vpop.f32.mrf.mxu1  ;;  %v489_v47 = vpop.f32.mrf.mxu0 }
  0xb2   : > { %v714_v45 = vpop.f32.mrf.mxu2  ;;  %v848_v48 = vpop.f32.mrf.mxu3 }
  0xb9   : > { %v502_v51 = vpop.f32.mrf.mxu1  ;;  %v492_v52 = vpop.f32.mrf.mxu0 }
  0xba   : > { %v716_v50 = vpop.f32.mrf.mxu2  ;;  %v2836_v53 = vpop.f32.mrf.mxu3 }
  0xbc   : > { %1130 = vmatmul.bf16.gmra.mxu1 %v2374_v49 }
  0xc1   : > { %v504_v55 = vpop.f32.mrf.mxu1  ;;  %v494_v56 = vpop.f32.mrf.mxu0 }
  0xc2   : > { %v719_v54 = vpop.f32.mrf.mxu2  ;;  %v853_v57 = vpop.f32.mrf.mxu3 }
  0xc9   : > { %v588_v59 = vpop.f32.mrf.mxu1  ;;  %v982_v60 = vpop.f32.mrf.mxu0 }
  0xca   : > { %v721_v58 = vpop.f32.mrf.mxu2  ;;  %v589_v61 = vadd.f32 %v588_v59, %v487_v43  ;;  %v2838_v63 = vpop.f32.mrf.mxu3 }
  0xcc   : > { %v734_v62 = vadd.f32 %v714_v45, %v589_v61 }
  0xce   : > { %v868_v0 = vadd.f32 %v848_v48, %v734_v62 }
  0xd0   : > { %v1002_v1 = vadd.f32 %v982_v60, %v868_v0 }
  0xd1   : > { %v590_v3 = vpop.f32.mrf.mxu1  ;;  %v984_v4 = vpop.f32.mrf.mxu0 }
  0xd2   : > { %v724_v2 = vpop.f32.mrf.mxu2  ;;  %v591_v5 = vadd.f32 %v590_v3, %v489_v47  ;;  %v858_v7 = vpop.f32.mrf.mxu3 }
  0xd4   : > { %v735_v6 = vadd.f32 %v716_v50, %v591_v5 }
  0xd9   : > { %v593_v9 = vpop.f32.mrf.mxu1  ;;  %v987_v10 = vpop.f32.mrf.mxu0 }
  0xda   : > { %v726_v8 = vpop.f32.mrf.mxu2  ;;  %v594_v11 = vadd.f32 %v593_v9, %v492_v52  ;;  %v2840_v16 = vpop.f32.mrf.mxu3 }
  0xdc   : > { %v736_v12 = vadd.f32 %v719_v54, %v594_v11 }
  0xde   : > { %v870_v13 = vadd.f32 %v853_v57, %v736_v12 }
  0xe0   : > { %v1004_v14 = vadd.f32 %v987_v10, %v870_v13 }
  0xe1   : > { %v595_v17 = vpop.f32.mrf.mxu1  ;;  %v2842_v18 = vpop.f32.mrf.mxu0 }
  0xe2   : > { %v729_v15 = vpop.f32.mrf.mxu2  ;;  %v596_v19 = vadd.f32 %v595_v17, %v494_v56  ;;  %v863_v25 = vpop.f32.mrf.mxu3  ;;  %v869_v56 = vadd.f32 %v2836_v53, %v735_v6  ;;  %v2868_v53 = vld [vmem:[%s2919_s5] ss:$0 sm:$0xff] }
  0xe4   : > { %v737_v20 = vadd.f32 %v721_v58, %v596_v19  ;;  %v1003_v58 = vadd.f32 %v984_v4, %v869_v56 }
  0xe6   : > { %v871_v11 = vadd.f32 %v2838_v63, %v737_v20 }
  0xe9   : > { %v598_v22 = vpop.f32.mrf.mxu1  ;;  %v992_v23 = vpop.f32.mrf.mxu0 }
  0xea   : > { %v731_v21 = vpop.f32.mrf.mxu2  ;;  %v599_v24 = vadd.f32 %v598_v22, %v497_v42  ;;  %v2850_v34 = vpop.f32.mrf.mxu3 }
  0xec   : > { %v738_v26 = vadd.f32 %v724_v2, %v599_v24 }
  0xee   : > { %v872_v27 = vadd.f32 %v858_v7, %v738_v26 }
  0xf0   : > { %v2844_v28 = vadd.f32 %v992_v23, %v872_v27  ;;  %v1005_v23 = vadd.f32 %v2842_v18, %v871_v11 }
  0xf1   : > { %v600_v30 = vpop.f32.mrf.mxu1  ;;  %v2846_v31 = vpop.f32.mrf.mxu0 }
  0xf2   : > { %v1250_v29 = vpop.f32.mrf.mxu2  ;;  %v601_v32 = vadd.f32 %v600_v30, %v499_v46  ;;  %v1384_v41 = vpop.f32.mrf.mxu3 }
  0xf4   : > { %v2848_v33 = vadd.f32 %v726_v8, %v601_v32 }
  0xf9   : > { %v603_v36 = vpop.f32.mrf.mxu1  ;;  %v997_v37 = vpop.f32.mrf.mxu0 }
  0xfa   : > { %v1252_v35 = vpop.f32.mrf.mxu2  ;;  %v604_v38 = vadd.f32 %v603_v36, %v502_v51  ;;  %v1386_v46 = vpop.f32.mrf.mxu3 }
  0xfc   : > { %v740_v39 = vadd.f32 %v729_v15, %v604_v38 }
  0xfe   : > { %v874_v40 = vadd.f32 %v863_v25, %v740_v39 }
 0x100   : > { %v2852_v42 = vadd.f32 %v997_v37, %v874_v40  ;;  %v873_v40 = vadd.f32 %v2840_v16, %v2848_v33 }
 0x101   : > { %v605_v44 = vpop.f32.mrf.mxu1  ;;  %v2854_v45 = vpop.f32.mrf.mxu0 }
 0x102   : > { %v1255_v43 = vpop.f32.mrf.mxu2  ;;  %v606_v47 = vadd.f32 %v605_v44, %v504_v55  ;;  %v2862_v55 = vld [vmem:[%s2918_s4] ss:$0 sm:$0xff]  ;;  %v1389_v0 = vpop.f32.mrf.mxu3 }
 0x104   : > { %v2856_v48 = vadd.f32 %v731_v21, %v606_v47 }
 0x109   : > { %v1116_v49 = vpop.f32.mrf.mxu1  ;;  %v1518_v50 = vpop.f32.mrf.mxu0 }
 0x10a   : > { %v1136_v52 = vadd.f32 %v1116_v49, %v1002_v1  ;;  %v1257_v54 = vpop.f32.mrf.mxu2  ;;  %v1391_v15 = vpop.f32.mrf.mxu3  ;;  %v1007_v49 = vadd.f32 %v2846_v31, %v873_v40 }
 0x10c   : > { %v1270_v51 = vadd.f32 %v1250_v29, %v1136_v52 }
 0x10e   : > { %v1404_v57 = vadd.f32 %v1384_v41, %v1270_v51 }
 0x110   : > { %v1538_v61 = vadd.f32 %v1518_v50, %v1404_v57 }
 0x111   : > { %v1118_v59 = vpop.f32.mrf.mxu1  ;;  %v1520_v60 = vpop.f32.mrf.mxu0 }
 0x112   : > { %v1137_v62 = vadd.f32 %v1118_v59, %v1003_v58  ;;  %v1260_v3 = vpop.f32.mrf.mxu2  ;;  %v1550_v1 = vmul.f32 %v2862_v55, %v1538_v61  ;;  %v1394_v30 = vpop.f32.mrf.mxu3 }
 0x114   : > { %v1271_v2 = vadd.f32 %v1252_v35, %v1137_v62  ;;  %v1562_v8 = vadd.f32 %v2868_v53, %v1550_v1 }
 0x116   : > { %v1405_v4 = vadd.f32 %v1386_v46, %v1271_v2  ;;  %v1570_v17 = vmax.f32 %v1562_v8, 0.0  ;;  %v875_v2 = vadd.f32 %v2850_v34, %v2856_v48 }
 0x118   : > { %v1539_v5 = vadd.f32 %v1520_v60, %v1405_v4  ;;  %v1009_v8 = vadd.f32 %v2854_v45, %v875_v2 }
 0x119   : > { %v1121_v6 = vpop.f32.mrf.mxu1  ;;  %v1523_v7 = vpop.f32.mrf.mxu0 }
 0x11a   : > { %v1551_v9 = vmul.f32 %v2862_v55, %v1539_v5  ;;  %v1138_v10 = vadd.f32 %v1121_v6, %v1004_v14  ;;  %v1262_v22 = vpop.f32.mrf.mxu2  ;;  %v1396_v52 = vpop.f32.mrf.mxu3 }
 0x11c   : > { %v1563_v12 = vadd.f32 %v2868_v53, %v1551_v9  ;;  %v1272_v13 = vadd.f32 %v1255_v43, %v1138_v10 }
 0x11e   : > { %v1571_v19 = vmax.f32 %v1563_v12, 0.0  ;;  %v1406_v21 = vadd.f32 %v1389_v0, %v1272_v13 }
 0x120   : > { %v2422_v14 = vpack.c.bf16 %v1571_v19, %v1570_v17  ;;  %v1540_v20 = vadd.f32 %v1523_v7, %v1406_v21 }
 0x121   : > { %v1123_v24 = vpop.f32.mrf.mxu1  ;;  %v1525_v63 = vpop.f32.mrf.mxu0 }
 0x122   : > { %2423 = vst [vmem:[%s2878_s16] sm:$0xff] %v2422_v14   ;;  %v1139_v25 = vadd.f32 %v1123_v24, %v1005_v23  ;;  %v1552_v27 = vmul.f32 %v2862_v55, %v1540_v20  ;;  %v1265_v35 = vpop.f32.mrf.mxu2  ;;  %v1399_v0 = vpop.f32.mrf.mxu3 }
 0x124   : > { %v1273_v26 = vadd.f32 %v1257_v54, %v1139_v25  ;;  %v1564_v37 = vadd.f32 %v2868_v53, %v1552_v27 }
 0x126   : > { %v1407_v29 = vadd.f32 %v1391_v15, %v1273_v26  ;;  %v1572_v44 = vmax.f32 %v1564_v37, 0.0 }
 0x128   : > { %v1541_v32 = vadd.f32 %v1525_v63, %v1407_v29 }
 0x129   : > { %v1126_v36 = vpop.f32.mrf.mxu1  ;;  %v1528_v39 = vpop.f32.mrf.mxu0 }
 0x12a   : > { %v1553_v38 = vmul.f32 %v2862_v55, %v1541_v32  ;;  %v1140_v18 = vadd.f32 %v1126_v36, %v2844_v28  ;;  %v1267_v57 = vpop.f32.mrf.mxu2  ;;  %v1401_v13 = vpop.f32.mrf.mxu3 }
 0x12c   : > { %v1565_v41 = vadd.f32 %v2868_v53, %v1553_v38  ;;  %v1274_v43 = vadd.f32 %v1260_v3, %v1140_v18 }
 0x12e   : > { %v1573_v47 = vmax.f32 %v1565_v41, 0.0  ;;  %v1408_v46 = vadd.f32 %v1394_v30, %v1274_v43 }
 0x130   : > { %v2427_v50 = vpack.c.bf16 %v1573_v47, %v1572_v44  ;;  %v1542_v56 = vadd.f32 %v1528_v39, %v1408_v46 }
 0x131   : > { %v1128_v54 = vpop.f32.mrf.mxu1  ;;  %v1530_v58 = vpop.f32.mrf.mxu0 }
 0x132   : > { %2439 = vst [vmem:[%s2878_s16 + $0x8] sm:$0xff] %v2427_v50   ;;  %v1141_v51 = vadd.f32 %v1128_v54, %v1007_v49  ;;  %v1554_v59 = vmul.f32 %v2862_v55, %v1542_v56  ;;  %v1533_v4 = vpop.f32.mrf.mxu2 }
 0x134   : > { %v1275_v28 = vadd.f32 %v1262_v22, %v1141_v51  ;;  %v1566_v61 = vadd.f32 %v2868_v53, %v1554_v59 }
 0x136   : > { %v1409_v16 = vadd.f32 %v1396_v52, %v1275_v28  ;;  %v1574_v5 = vmax.f32 %v1566_v61, 0.0 }
 0x138   : > { %v1543_v33 = vadd.f32 %v1530_v58, %v1409_v16 }
 0x139   : > { %v1131_v60 = vpop.f32.mrf.mxu1 }
 0x13a   : > { %v1555_v62 = vmul.f32 %v2862_v55, %v1543_v33  ;;  %v1142_v31 = vadd.f32 %v1131_v60, %v2852_v42  ;;  %v1535_v48 = vpop.f32.mrf.mxu2 }
 0x13c   : > { %v1567_v3 = vadd.f32 %v2868_v53, %v1555_v62  ;;  %v1276_v1 = vadd.f32 %v1265_v35, %v1142_v31 }
 0x13e   : > { %v1575_v6 = vmax.f32 %v1567_v3, 0.0  ;;  %v1410_v7 = vadd.f32 %v1399_v0, %v1276_v1 }
 0x140   : > { %v2432_v9 = vpack.c.bf16 %v1575_v6, %v1574_v5  ;;  %v1544_v11 = vadd.f32 %v1533_v4, %v1410_v7 }
 0x141   : > { %v1133_v10 = vpop.f32.mrf.mxu1 }
 0x142   : > { %2440 = vst [vmem:[%s2878_s16 + $0x10] sm:$0xff] %v2432_v9   ;;  %v1143_v12 = vadd.f32 %v1133_v10, %v1009_v8  ;;  %v1556_v15 = vmul.f32 %v2862_v55, %v1544_v11 }
 0x144   : > { %v1277_v42 = vadd.f32 %v1267_v57, %v1143_v12  ;;  %v1568_v19 = vadd.f32 %v2868_v53, %v1556_v15 }
 0x146   : > { %v1411_v34 = vadd.f32 %v1401_v13, %v1277_v42  ;;  %v1576_v45 = vmax.f32 %v1568_v19, 0.0 }
 0x148   : > { %v1545_v17 = vadd.f32 %v1535_v48, %v1411_v34 }
 0x14a   : > { %v1557_v21 = vmul.f32 %v2862_v55, %v1545_v17 }
 0x14c   : > { %v1569_v22 = vadd.f32 %v2868_v53, %v1557_v21 }
 0x14e   : > { %v1577_v23 = vmax.f32 %v1569_v22, 0.0 }
 0x150   : > { %v2437_v14 = vpack.c.bf16 %v1577_v23, %v1576_v45 }
 0x152   : > { %2441 = vst [vmem:[%s2878_s16 + $0x18] sm:$0xff] %v2437_v14  }
 0x153 PF: > { %s16_s23 = sadd.s32 1, %s2507_s23   ;;  %s2921_s21 = smov %s2503_s22 }
 0x154   : > { %p13_p5 = scmp.ge.s32.totalorder %s16_s23, 4   ;;  %s2922_s22 = smov %s2924_s24 }
 0x156   :  { %15 = sbr.rel (!%p13_p5) target bundleno = 2 (0x2), region = 97 }

</bundles_post_ra>
